<compile_context>
chip_gen: v6e
topology: v6e:2x2x1
jax: 0.10.0
libtpu: 0.0.40
codegen_flags: <defaults>
</compile_context>

<pallas_src>
import jax
import jax.numpy as jnp
from jax.experimental import pallas as pl
from jax.experimental.pallas import tpu as pltpu

LATENT_DIM = 100
LATENT_PAD = 128          # 100 -> 128 lanes, zero-padded (exact)
IMG_PIXELS = 28 * 28      # 784
OUT_PAD = 896             # 784 -> 7*128 lanes (lane-dense output slab)
LEAK = 0.2
BN_EPS = 0.8              # nn.BatchNorm1d(out_feat, 0.8): 2nd positional arg is eps


# ----------------------------- math helpers ---------------------------------

def _leaky(y):
    return jnp.where(y > 0, y, LEAK * y)


def _bn_leaky(y, gamma, beta):
    # Training-mode BatchNorm1d over the batch axis (biased variance, eps=0.8),
    # folded into a per-feature scale/shift.
    mean = jnp.mean(y, axis=0, keepdims=True)
    yc = y - mean
    var = jnp.mean(yc * yc, axis=0, keepdims=True)
    scale = gamma * jax.lax.rsqrt(var + BN_EPS)
    return _leaky(yc * scale + beta)


# ----------------------------- fused kernel ---------------------------------

def generator_fused_kernel(
    z_ref,
    w0_ref, b0_ref,
    w1_ref, g1_ref, be1_ref,
    w2_ref, g2_ref, be2_ref,
    w3_ref, g3_ref, be3_ref,
    w4_ref, b4_ref,
    o_ref,
):
    # layer 0: Linear(128p, 128) + LeakyReLU (no BN -> keep the bias)
    h = jnp.dot(z_ref[...], w0_ref[...], preferred_element_type=jnp.float32)
    h = _leaky(h + b0_ref[...])

    # layer 1: Linear(128, 256) -> BN -> LeakyReLU (bias cancelled by BN mean)
    y = jnp.dot(h.astype(jnp.bfloat16), w1_ref[...],
                preferred_element_type=jnp.float32)
    h = _bn_leaky(y, g1_ref[...], be1_ref[...])

    # layer 2: Linear(256, 512) -> BN -> LeakyReLU
    y = jnp.dot(h.astype(jnp.bfloat16), w2_ref[...],
                preferred_element_type=jnp.float32)
    h = _bn_leaky(y, g2_ref[...], be2_ref[...])

    # layer 3: Linear(512, 1024) -> BN -> LeakyReLU
    y = jnp.dot(h.astype(jnp.bfloat16), w3_ref[...],
                preferred_element_type=jnp.float32)
    h = _bn_leaky(y, g3_ref[...], be3_ref[...])

    # layer 4: Linear(1024, 896p) + Tanh
    y = jnp.dot(h.astype(jnp.bfloat16), w4_ref[...],
                preferred_element_type=jnp.float32)
    o_ref[...] = jnp.tanh(y + b4_ref[...])


# ----------------------------- parameters -----------------------------------

def init_params(key):
    """PyTorch nn.Linear default init: W, b ~ U(-1/sqrt(fan_in), 1/sqrt(fan_in)).
    Weights are stored (in, out) so the kernel computes x @ W directly, cast to
    bf16 (matmuls accumulate in f32), and zero-padded to lane-aligned shapes.
    Biases that feed a BatchNorm layer (layers 1-3) are omitted: BN's mean
    subtraction cancels them exactly, so the forward output is unchanged."""
    dims = [(LATENT_DIM, 128), (128, 256), (256, 512), (512, 1024),
            (1024, IMG_PIXELS)]
    params = {}
    for i, (fin, fout) in enumerate(dims):
        key, kw, kb = jax.random.split(key, 3)
        bound = 1.0 / jnp.sqrt(float(fin))
        w = jax.random.uniform(kw, (fin, fout), jnp.float32, -bound, bound)
        b = jax.random.uniform(kb, (1, fout), jnp.float32, -bound, bound)
        # Lane padding (exact: padded K rows multiply zero-padded inputs,
        # padded N columns are sliced off in the wrapper).
        fin_p = LATENT_PAD if i == 0 else fin
        fout_p = OUT_PAD if i == 4 else fout
        w = jnp.pad(w, ((0, fin_p - fin), (0, fout_p - fout)))
        b = jnp.pad(b, ((0, 0), (0, fout_p - fout)))
        params[f"w{i}"] = w.astype(jnp.bfloat16)
        if i in (0, 4):                      # drop b1..b3 (cancelled by BN)
            params[f"b{i}"] = b
    for i, f in zip((1, 2, 3), (256, 512, 1024)):
        params[f"gamma{i}"] = jnp.ones((1, f), jnp.float32)
        params[f"beta{i}"] = jnp.zeros((1, f), jnp.float32)
    return params


# ----------------------------- forward --------------------------------------

def _pallas_forward(params, zs):
    """zs: (num_batches, B, LATENT_DIM). Each leading entry is an independent
    forward call (BatchNorm statistics over its own B samples). Weights are
    DMA'd once (constant block index across the grid) and amortized."""
    nb, B, _ = zs.shape
    zp = jnp.pad(zs, ((0, 0), (0, 0), (0, LATENT_PAD - LATENT_DIM)))
    zp = zp.astype(jnp.bfloat16)

    def const_spec(arr):
        shp = arr.shape
        return pl.BlockSpec(shp, lambda b, _s=shp: (0,) * len(_s))

    flops_per_block = 2 * B * (LATENT_PAD * 128 + 128 * 256 + 256 * 512
                               + 512 * 1024 + 1024 * OUT_PAD)
    weight_bytes = sum(int(v.size) * v.dtype.itemsize for v in params.values())
    io_bytes = int(zp.size) * 2 + nb * B * OUT_PAD * 4

    out = pl.pallas_call(
        generator_fused_kernel,
        grid=(nb,),
        out_shape=jax.ShapeDtypeStruct((nb, B, OUT_PAD), jnp.float32),
        in_specs=[
            pl.BlockSpec((None, B, LATENT_PAD), lambda b: (b, 0, 0)),
            const_spec(params["w0"]), const_spec(params["b0"]),
            const_spec(params["w1"]), const_spec(params["gamma1"]), const_spec(params["beta1"]),
            const_spec(params["w2"]), const_spec(params["gamma2"]), const_spec(params["beta2"]),
            const_spec(params["w3"]), const_spec(params["gamma3"]), const_spec(params["beta3"]),
            const_spec(params["w4"]), const_spec(params["b4"]),
        ],
        out_specs=pl.BlockSpec((None, B, OUT_PAD), lambda b: (b, 0, 0)),
        compiler_params=pltpu.CompilerParams(
            # "arbitrary": grid steps run sequentially so the constant-index
            # weight blocks are fetched exactly once.
            dimension_semantics=("arbitrary",),
            # ~6-7 MiB (double-buffered bf16 weights + small blocks); explicit
            # budget keeps it safe on v5e (16 MiB default) / v6e / v7x.
            vmem_limit_bytes=32 * 1024 * 1024,
        ),
        cost_estimate=pl.CostEstimate(
            flops=nb * flops_per_block,
            transcendentals=nb * B * (OUT_PAD + 256 + 512 + 1024),
            bytes_accessed=weight_bytes + io_bytes,
        ),
    )(
        zp,
        params["w0"], params["b0"],
        params["w1"], params["gamma1"], params["beta1"],
        params["w2"], params["gamma2"], params["beta2"],
        params["w3"], params["gamma3"], params["beta3"],
        params["w4"], params["b4"],
    )
    img = out[..., :IMG_PIXELS]
    return img.reshape(nb, B, 1, 28, 28)      # img.view(B, 1, 28, 28) per batch


def generator_forward(params, z):
    """Single forward call, matching the PyTorch module: z (B, 100) -> (B,1,28,28)."""
    return _pallas_forward(params, z[None])[0]


def generator_forward_batched(params, zs):
    """Amortized sampling: zs (num_batches, B, 100) -> (num_batches, B, 1, 28, 28).
    Each batch is an independent forward (BN stats per batch); the ~3.1 MB of
    weights is DMA'd once for the whole call."""
    return _pallas_forward(params, zs)


# ----------------------------- pure-JAX reference ----------------------------

def generator_reference(params, z):
    """Same math in plain JAX (same padded bf16 weights, f32 accumulation);
    used only to validate the fused kernel."""
    zp = jnp.pad(z, ((0, 0), (0, LATENT_PAD - LATENT_DIM))).astype(jnp.bfloat16)
    h = _leaky(jnp.dot(zp, params["w0"],
                       preferred_element_type=jnp.float32) + params["b0"])
    for i in (1, 2, 3):
        y = jnp.dot(h.astype(jnp.bfloat16), params[f"w{i}"],
                    preferred_element_type=jnp.float32)
        h = _bn_leaky(y, params[f"gamma{i}"], params[f"beta{i}"])
    y = jnp.dot(h.astype(jnp.bfloat16), params["w4"],
                preferred_element_type=jnp.float32) + params["b4"]
    img = jnp.tanh(y)[:, :IMG_PIXELS]
    return img.reshape(img.shape[0], 1, 28, 28)


if __name__ == "__main__":
    key = jax.random.PRNGKey(0)
    key, pkey, zkey, zskey = jax.random.split(key, 4)

    params = init_params(pkey)

    # --- single forward call (BN stats over the full batch, as in PyTorch) ---
    batch = 8
    z = jax.random.normal(zkey, (batch, LATENT_DIM), dtype=jnp.float32)

    img = jax.block_until_ready(jax.jit(generator_forward)(params, z))
    assert img.shape == (batch, 1, 28, 28), img.shape
    assert img.dtype == jnp.float32
    assert bool(jnp.all(jnp.isfinite(img)))
    assert bool(jnp.all(jnp.abs(img) <= 1.0))          # tanh range

    ref = jax.block_until_ready(jax.jit(generator_reference)(params, z))
    max_err = float(jnp.max(jnp.abs(img - ref)))
    assert bool(jnp.allclose(img, ref, atol=1e-2, rtol=0.0)), max_err

    # --- amortized path: several independent batches, weights DMA'd once -----
    num_batches = 4
    zs = jax.random.normal(zskey, (num_batches, batch, LATENT_DIM),
                           dtype=jnp.float32)
    imgs = jax.block_until_ready(jax.jit(generator_forward_batched)(params, zs))
    assert imgs.shape == (num_batches, batch, 1, 28, 28), imgs.shape
    refs = jax.block_until_ready(
        jax.jit(jax.vmap(lambda zz: generator_reference(params, zz)))(zs))
    max_err_b = float(jnp.max(jnp.abs(imgs - refs)))
    assert bool(jnp.allclose(imgs, refs, atol=1e-2, rtol=0.0)), max_err_b

    print("KERNEL_OK")
</pallas_src>

<mosaic_0001>
module attributes {stable_mosaic.version = 11 : i64} {
  func.func @generator_fused_kernel(%arg0: i32, %arg1: memref<1x8x128xbf16, #tpu.memory_space<vmem>>, %arg2: memref<128x128xbf16, #tpu.memory_space<vmem>>, %arg3: memref<1x128xf32, #tpu.memory_space<vmem>>, %arg4: memref<128x256xbf16, #tpu.memory_space<vmem>>, %arg5: memref<1x256xf32, #tpu.memory_space<vmem>>, %arg6: memref<1x256xf32, #tpu.memory_space<vmem>>, %arg7: memref<256x512xbf16, #tpu.memory_space<vmem>>, %arg8: memref<1x512xf32, #tpu.memory_space<vmem>>, %arg9: memref<1x512xf32, #tpu.memory_space<vmem>>, %arg10: memref<512x1024xbf16, #tpu.memory_space<vmem>>, %arg11: memref<1x1024xf32, #tpu.memory_space<vmem>>, %arg12: memref<1x1024xf32, #tpu.memory_space<vmem>>, %arg13: memref<1024x896xbf16, #tpu.memory_space<vmem>>, %arg14: memref<1x896xf32, #tpu.memory_space<vmem>>, %arg15: memref<1x8x896xf32, #tpu.memory_space<vmem>>) attributes {dimension_semantics = [#tpu.dimension_semantics<arbitrary>], iteration_bounds = array<i64: 1>, scalar_prefetch = 0 : i64, scratch_operands = 0 : i64, tpu.core_type = #tpu.core_type<tc>, window_params = [{transform_indices = @transform_0, window_bounds = array<i64: 1, 8, 128>}, {pipeline_mode = #tpu.pipeline_mode<synchronous>, transform_indices = @transform_1, window_bounds = array<i64: 128, 128>}, {pipeline_mode = #tpu.pipeline_mode<synchronous>, transform_indices = @transform_2, window_bounds = array<i64: 1, 128>}, {pipeline_mode = #tpu.pipeline_mode<synchronous>, transform_indices = @transform_3, window_bounds = array<i64: 128, 256>}, {pipeline_mode = #tpu.pipeline_mode<synchronous>, transform_indices = @transform_4, window_bounds = array<i64: 1, 256>}, {pipeline_mode = #tpu.pipeline_mode<synchronous>, transform_indices = @transform_5, window_bounds = array<i64: 1, 256>}, {pipeline_mode = #tpu.pipeline_mode<synchronous>, transform_indices = @transform_6, window_bounds = array<i64: 256, 512>}, {pipeline_mode = #tpu.pipeline_mode<synchronous>, transform_indices = @transform_7, window_bounds = array<i64: 1, 512>}, {pipeline_mode = #tpu.pipeline_mode<synchronous>, transform_indices = @transform_8, window_bounds = array<i64: 1, 512>}, {pipeline_mode = #tpu.pipeline_mode<synchronous>, transform_indices = @transform_9, window_bounds = array<i64: 512, 1024>}, {pipeline_mode = #tpu.pipeline_mode<synchronous>, transform_indices = @transform_10, window_bounds = array<i64: 1, 1024>}, {pipeline_mode = #tpu.pipeline_mode<synchronous>, transform_indices = @transform_11, window_bounds = array<i64: 1, 1024>}, {pipeline_mode = #tpu.pipeline_mode<synchronous>, transform_indices = @transform_12, window_bounds = array<i64: 1024, 896>}, {pipeline_mode = #tpu.pipeline_mode<synchronous>, transform_indices = @transform_13, window_bounds = array<i64: 1, 896>}, {transform_indices = @transform_14, window_bounds = array<i64: 1, 8, 896>}]} {
    %c0 = arith.constant 0 : index
    %c0_0 = arith.constant 0 : index
    %c0_1 = arith.constant 0 : index
    %0 = vector.load %arg1[%c0, %c0_0, %c0_1] : memref<1x8x128xbf16, #tpu.memory_space<vmem>>, vector<1x8x128xbf16>
    %1 = vector.shape_cast %0 : vector<1x8x128xbf16> to vector<8x128xbf16>
    %c0_2 = arith.constant 0 : index
    %c0_3 = arith.constant 0 : index
    %2 = vector.load %arg2[%c0_2, %c0_3] : memref<128x128xbf16, #tpu.memory_space<vmem>>, vector<128x128xbf16>
    %cst = arith.constant dense<0.000000e+00> : vector<8x128xf32>
    %3 = tpu.matmul %1, %2, %cst {dimension_numbers = #tpu.dot_dimension_numbers<[1], [0], [0], [1], [0, 0, 1, 1], [], []>} : vector<8x128xbf16>, vector<128x128xbf16>, vector<8x128xf32> -> vector<8x128xf32>
    %c0_4 = arith.constant 0 : index
    %c0_5 = arith.constant 0 : index
    %4 = vector.load %arg3[%c0_4, %c0_5] : memref<1x128xf32, #tpu.memory_space<vmem>>, vector<1x128xf32>
    %5 = vector.broadcast %4 : vector<1x128xf32> to vector<8x128xf32>
    %6 = arith.addf %3, %5 : vector<8x128xf32>
    %cst_6 = arith.constant 0.000000e+00 : f32
    %7 = vector.broadcast %cst_6 : f32 to vector<8x128xf32>
    %8 = arith.cmpf ogt, %6, %7 : vector<8x128xf32>
    %cst_7 = arith.constant 2.000000e-01 : f32
    %9 = vector.broadcast %cst_7 : f32 to vector<8x128xf32>
    %10 = arith.mulf %9, %6 : vector<8x128xf32>
    %11 = arith.select %8, %6, %10 : vector<8x128xi1>, vector<8x128xf32>
    %12 = arith.truncf %11 : vector<8x128xf32> to vector<8x128xbf16>
    %c0_8 = arith.constant 0 : index
    %c0_9 = arith.constant 0 : index
    %13 = vector.load %arg4[%c0_8, %c0_9] : memref<128x256xbf16, #tpu.memory_space<vmem>>, vector<128x256xbf16>
    %cst_10 = arith.constant dense<0.000000e+00> : vector<8x256xf32>
    %14 = tpu.matmul %12, %13, %cst_10 {dimension_numbers = #tpu.dot_dimension_numbers<[1], [0], [0], [1], [0, 0, 1, 1], [], []>} : vector<8x128xbf16>, vector<128x256xbf16>, vector<8x256xf32> -> vector<8x256xf32>
    %c0_11 = arith.constant 0 : index
    %c0_12 = arith.constant 0 : index
    %15 = vector.load %arg5[%c0_11, %c0_12] : memref<1x256xf32, #tpu.memory_space<vmem>>, vector<1x256xf32>
    %c0_13 = arith.constant 0 : index
    %c0_14 = arith.constant 0 : index
    %16 = vector.load %arg6[%c0_13, %c0_14] : memref<1x256xf32, #tpu.memory_space<vmem>>, vector<1x256xf32>
    %cst_15 = arith.constant dense<0.000000e+00> : vector<256xf32>
    %17 = vector.multi_reduction <add>, %14, %cst_15 [0] : vector<8x256xf32> to vector<256xf32>
    %18 = vector.shape_cast %17 : vector<256xf32> to vector<1x256xf32>
    %cst_16 = arith.constant 8.000000e+00 : f32
    %19 = vector.broadcast %cst_16 : f32 to vector<1x256xf32>
    %20 = arith.divf %18, %19 : vector<1x256xf32>
    %21 = vector.broadcast %20 : vector<1x256xf32> to vector<8x256xf32>
    %22 = arith.subf %14, %21 : vector<8x256xf32>
    %23 = arith.mulf %22, %22 : vector<8x256xf32>
    %cst_17 = arith.constant dense<0.000000e+00> : vector<256xf32>
    %24 = vector.multi_reduction <add>, %23, %cst_17 [0] : vector<8x256xf32> to vector<256xf32>
    %25 = vector.shape_cast %24 : vector<256xf32> to vector<1x256xf32>
    %cst_18 = arith.constant 8.000000e+00 : f32
    %26 = vector.broadcast %cst_18 : f32 to vector<1x256xf32>
    %27 = arith.divf %25, %26 : vector<1x256xf32>
    %cst_19 = arith.constant 8.000000e-01 : f32
    %28 = vector.broadcast %cst_19 : f32 to vector<1x256xf32>
    %29 = arith.addf %27, %28 : vector<1x256xf32>
    %30 = math.rsqrt %29 : vector<1x256xf32>
    %31 = arith.mulf %15, %30 : vector<1x256xf32>
    %32 = vector.broadcast %31 : vector<1x256xf32> to vector<8x256xf32>
    %33 = arith.mulf %22, %32 : vector<8x256xf32>
    %34 = vector.broadcast %16 : vector<1x256xf32> to vector<8x256xf32>
    %35 = arith.addf %33, %34 : vector<8x256xf32>
    %cst_20 = arith.constant 0.000000e+00 : f32
    %36 = vector.broadcast %cst_20 : f32 to vector<8x256xf32>
    %37 = arith.cmpf ogt, %35, %36 : vector<8x256xf32>
    %cst_21 = arith.constant 2.000000e-01 : f32
    %38 = vector.broadcast %cst_21 : f32 to vector<8x256xf32>
    %39 = arith.mulf %38, %35 : vector<8x256xf32>
    %40 = arith.select %37, %35, %39 : vector<8x256xi1>, vector<8x256xf32>
    %41 = arith.truncf %40 : vector<8x256xf32> to vector<8x256xbf16>
    %c0_22 = arith.constant 0 : index
    %c0_23 = arith.constant 0 : index
    %42 = vector.load %arg7[%c0_22, %c0_23] : memref<256x512xbf16, #tpu.memory_space<vmem>>, vector<256x512xbf16>
    %cst_24 = arith.constant dense<0.000000e+00> : vector<8x512xf32>
    %43 = tpu.matmul %41, %42, %cst_24 {dimension_numbers = #tpu.dot_dimension_numbers<[1], [0], [0], [1], [0, 0, 1, 1], [], []>} : vector<8x256xbf16>, vector<256x512xbf16>, vector<8x512xf32> -> vector<8x512xf32>
    %c0_25 = arith.constant 0 : index
    %c0_26 = arith.constant 0 : index
    %44 = vector.load %arg8[%c0_25, %c0_26] : memref<1x512xf32, #tpu.memory_space<vmem>>, vector<1x512xf32>
    %c0_27 = arith.constant 0 : index
    %c0_28 = arith.constant 0 : index
    %45 = vector.load %arg9[%c0_27, %c0_28] : memref<1x512xf32, #tpu.memory_space<vmem>>, vector<1x512xf32>
    %cst_29 = arith.constant dense<0.000000e+00> : vector<512xf32>
    %46 = vector.multi_reduction <add>, %43, %cst_29 [0] : vector<8x512xf32> to vector<512xf32>
    %47 = vector.shape_cast %46 : vector<512xf32> to vector<1x512xf32>
    %cst_30 = arith.constant 8.000000e+00 : f32
    %48 = vector.broadcast %cst_30 : f32 to vector<1x512xf32>
    %49 = arith.divf %47, %48 : vector<1x512xf32>
    %50 = vector.broadcast %49 : vector<1x512xf32> to vector<8x512xf32>
    %51 = arith.subf %43, %50 : vector<8x512xf32>
    %52 = arith.mulf %51, %51 : vector<8x512xf32>
    %cst_31 = arith.constant dense<0.000000e+00> : vector<512xf32>
    %53 = vector.multi_reduction <add>, %52, %cst_31 [0] : vector<8x512xf32> to vector<512xf32>
    %54 = vector.shape_cast %53 : vector<512xf32> to vector<1x512xf32>
    %cst_32 = arith.constant 8.000000e+00 : f32
    %55 = vector.broadcast %cst_32 : f32 to vector<1x512xf32>
    %56 = arith.divf %54, %55 : vector<1x512xf32>
    %cst_33 = arith.constant 8.000000e-01 : f32
    %57 = vector.broadcast %cst_33 : f32 to vector<1x512xf32>
    %58 = arith.addf %56, %57 : vector<1x512xf32>
    %59 = math.rsqrt %58 : vector<1x512xf32>
    %60 = arith.mulf %44, %59 : vector<1x512xf32>
    %61 = vector.broadcast %60 : vector<1x512xf32> to vector<8x512xf32>
    %62 = arith.mulf %51, %61 : vector<8x512xf32>
    %63 = vector.broadcast %45 : vector<1x512xf32> to vector<8x512xf32>
    %64 = arith.addf %62, %63 : vector<8x512xf32>
    %cst_34 = arith.constant 0.000000e+00 : f32
    %65 = vector.broadcast %cst_34 : f32 to vector<8x512xf32>
    %66 = arith.cmpf ogt, %64, %65 : vector<8x512xf32>
    %cst_35 = arith.constant 2.000000e-01 : f32
    %67 = vector.broadcast %cst_35 : f32 to vector<8x512xf32>
    %68 = arith.mulf %67, %64 : vector<8x512xf32>
    %69 = arith.select %66, %64, %68 : vector<8x512xi1>, vector<8x512xf32>
    %70 = arith.truncf %69 : vector<8x512xf32> to vector<8x512xbf16>
    %c0_36 = arith.constant 0 : index
    %c0_37 = arith.constant 0 : index
    %71 = vector.load %arg10[%c0_36, %c0_37] : memref<512x1024xbf16, #tpu.memory_space<vmem>>, vector<512x1024xbf16>
    %cst_38 = arith.constant dense<0.000000e+00> : vector<8x1024xf32>
    %72 = tpu.matmul %70, %71, %cst_38 {dimension_numbers = #tpu.dot_dimension_numbers<[1], [0], [0], [1], [0, 0, 1, 1], [], []>} : vector<8x512xbf16>, vector<512x1024xbf16>, vector<8x1024xf32> -> vector<8x1024xf32>
    %c0_39 = arith.constant 0 : index
    %c0_40 = arith.constant 0 : index
    %73 = vector.load %arg11[%c0_39, %c0_40] : memref<1x1024xf32, #tpu.memory_space<vmem>>, vector<1x1024xf32>
    %c0_41 = arith.constant 0 : index
    %c0_42 = arith.constant 0 : index
    %74 = vector.load %arg12[%c0_41, %c0_42] : memref<1x1024xf32, #tpu.memory_space<vmem>>, vector<1x1024xf32>
    %cst_43 = arith.constant dense<0.000000e+00> : vector<1024xf32>
    %75 = vector.multi_reduction <add>, %72, %cst_43 [0] : vector<8x1024xf32> to vector<1024xf32>
    %76 = vector.shape_cast %75 : vector<1024xf32> to vector<1x1024xf32>
    %cst_44 = arith.constant 8.000000e+00 : f32
    %77 = vector.broadcast %cst_44 : f32 to vector<1x1024xf32>
    %78 = arith.divf %76, %77 : vector<1x1024xf32>
    %79 = vector.broadcast %78 : vector<1x1024xf32> to vector<8x1024xf32>
    %80 = arith.subf %72, %79 : vector<8x1024xf32>
    %81 = arith.mulf %80, %80 : vector<8x1024xf32>
    %cst_45 = arith.constant dense<0.000000e+00> : vector<1024xf32>
    %82 = vector.multi_reduction <add>, %81, %cst_45 [0] : vector<8x1024xf32> to vector<1024xf32>
    %83 = vector.shape_cast %82 : vector<1024xf32> to vector<1x1024xf32>
    %cst_46 = arith.constant 8.000000e+00 : f32
    %84 = vector.broadcast %cst_46 : f32 to vector<1x1024xf32>
    %85 = arith.divf %83, %84 : vector<1x1024xf32>
    %cst_47 = arith.constant 8.000000e-01 : f32
    %86 = vector.broadcast %cst_47 : f32 to vector<1x1024xf32>
    %87 = arith.addf %85, %86 : vector<1x1024xf32>
    %88 = math.rsqrt %87 : vector<1x1024xf32>
    %89 = arith.mulf %73, %88 : vector<1x1024xf32>
    %90 = vector.broadcast %89 : vector<1x1024xf32> to vector<8x1024xf32>
    %91 = arith.mulf %80, %90 : vector<8x1024xf32>
    %92 = vector.broadcast %74 : vector<1x1024xf32> to vector<8x1024xf32>
    %93 = arith.addf %91, %92 : vector<8x1024xf32>
    %cst_48 = arith.constant 0.000000e+00 : f32
    %94 = vector.broadcast %cst_48 : f32 to vector<8x1024xf32>
    %95 = arith.cmpf ogt, %93, %94 : vector<8x1024xf32>
    %cst_49 = arith.constant 2.000000e-01 : f32
    %96 = vector.broadcast %cst_49 : f32 to vector<8x1024xf32>
    %97 = arith.mulf %96, %93 : vector<8x1024xf32>
    %98 = arith.select %95, %93, %97 : vector<8x1024xi1>, vector<8x1024xf32>
    %99 = arith.truncf %98 : vector<8x1024xf32> to vector<8x1024xbf16>
    %c0_50 = arith.constant 0 : index
    %c0_51 = arith.constant 0 : index
    %100 = vector.load %arg13[%c0_50, %c0_51] : memref<1024x896xbf16, #tpu.memory_space<vmem>>, vector<1024x896xbf16>
    %cst_52 = arith.constant dense<0.000000e+00> : vector<8x896xf32>
    %101 = tpu.matmul %99, %100, %cst_52 {dimension_numbers = #tpu.dot_dimension_numbers<[1], [0], [0], [1], [0, 0, 1, 1], [], []>} : vector<8x1024xbf16>, vector<1024x896xbf16>, vector<8x896xf32> -> vector<8x896xf32>
    %c0_53 = arith.constant 0 : index
    %c0_54 = arith.constant 0 : index
    %102 = vector.load %arg14[%c0_53, %c0_54] : memref<1x896xf32, #tpu.memory_space<vmem>>, vector<1x896xf32>
    %103 = vector.broadcast %102 : vector<1x896xf32> to vector<8x896xf32>
    %104 = arith.addf %101, %103 : vector<8x896xf32>
    %105 = math.tanh %104 : vector<8x896xf32>
    %c0_55 = arith.constant 0 : index
    %c0_56 = arith.constant 0 : index
    %c0_57 = arith.constant 0 : index
    %106 = vector.load %arg15[%c0_55, %c0_56, %c0_57] : memref<1x8x896xf32, #tpu.memory_space<vmem>>, vector<1x8x896xf32>
    %107 = vector.shape_cast %106 : vector<1x8x896xf32> to vector<8x896xf32>
    %108 = vector.shape_cast %105 : vector<8x896xf32> to vector<1x8x896xf32>
    tpu.vector_store %arg15[%c0_55, %c0_56, %c0_57], %108 {strides = array<i32>} : memref<1x8x896xf32, #tpu.memory_space<vmem>>, vector<1x8x896xf32>,
    return
  }
  func.func @transform_0(%arg0: i32) -> (i32, i32, i32) {
    %c0_i32 = arith.constant 0 : i32
    %c0_i32_0 = arith.constant 0 : i32
    %c0_i32_1 = arith.constant 0 : i32
    return %arg0, %c0_i32, %c0_i32_0 : i32, i32, i32
  }
  func.func @transform_1(%arg0: i32) -> (i32, i32) {
    %c0_i32 = arith.constant 0 : i32
    %c0_i32_0 = arith.constant 0 : i32
    %c0_i32_1 = arith.constant 0 : i32
    return %c0_i32, %c0_i32_0 : i32, i32
  }
  func.func @transform_2(%arg0: i32) -> (i32, i32) {
    %c0_i32 = arith.constant 0 : i32
    %c0_i32_0 = arith.constant 0 : i32
    %c0_i32_1 = arith.constant 0 : i32
    return %c0_i32, %c0_i32_0 : i32, i32
  }
  func.func @transform_3(%arg0: i32) -> (i32, i32) {
    %c0_i32 = arith.constant 0 : i32
    %c0_i32_0 = arith.constant 0 : i32
    %c0_i32_1 = arith.constant 0 : i32
    return %c0_i32, %c0_i32_0 : i32, i32
  }
  func.func @transform_4(%arg0: i32) -> (i32, i32) {
    %c0_i32 = arith.constant 0 : i32
    %c0_i32_0 = arith.constant 0 : i32
    %c0_i32_1 = arith.constant 0 : i32
    return %c0_i32, %c0_i32_0 : i32, i32
  }
  func.func @transform_5(%arg0: i32) -> (i32, i32) {
    %c0_i32 = arith.constant 0 : i32
    %c0_i32_0 = arith.constant 0 : i32
    %c0_i32_1 = arith.constant 0 : i32
    return %c0_i32, %c0_i32_0 : i32, i32
  }
  func.func @transform_6(%arg0: i32) -> (i32, i32) {
    %c0_i32 = arith.constant 0 : i32
    %c0_i32_0 = arith.constant 0 : i32
    %c0_i32_1 = arith.constant 0 : i32
    return %c0_i32, %c0_i32_0 : i32, i32
  }
  func.func @transform_7(%arg0: i32) -> (i32, i32) {
    %c0_i32 = arith.constant 0 : i32
    %c0_i32_0 = arith.constant 0 : i32
    %c0_i32_1 = arith.constant 0 : i32
    return %c0_i32, %c0_i32_0 : i32, i32
  }
  func.func @transform_8(%arg0: i32) -> (i32, i32) {
    %c0_i32 = arith.constant 0 : i32
    %c0_i32_0 = arith.constant 0 : i32
    %c0_i32_1 = arith.constant 0 : i32
    return %c0_i32, %c0_i32_0 : i32, i32
  }
  func.func @transform_9(%arg0: i32) -> (i32, i32) {
    %c0_i32 = arith.constant 0 : i32
    %c0_i32_0 = arith.constant 0 : i32
    %c0_i32_1 = arith.constant 0 : i32
    return %c0_i32, %c0_i32_0 : i32, i32
  }
  func.func @transform_10(%arg0: i32) -> (i32, i32) {
    %c0_i32 = arith.constant 0 : i32
    %c0_i32_0 = arith.constant 0 : i32
    %c0_i32_1 = arith.constant 0 : i32
    return %c0_i32, %c0_i32_0 : i32, i32
  }
  func.func @transform_11(%arg0: i32) -> (i32, i32) {
    %c0_i32 = arith.constant 0 : i32
    %c0_i32_0 = arith.constant 0 : i32
    %c0_i32_1 = arith.constant 0 : i32
    return %c0_i32, %c0_i32_0 : i32, i32
  }
  func.func @transform_12(%arg0: i32) -> (i32, i32) {
    %c0_i32 = arith.constant 0 : i32
    %c0_i32_0 = arith.constant 0 : i32
    %c0_i32_1 = arith.constant 0 : i32
    return %c0_i32, %c0_i32_0 : i32, i32
  }
  func.func @transform_13(%arg0: i32) -> (i32, i32) {
    %c0_i32 = arith.constant 0 : i32
    %c0_i32_0 = arith.constant 0 : i32
    %c0_i32_1 = arith.constant 0 : i32
    return %c0_i32, %c0_i32_0 : i32, i32
  }
  func.func @transform_14(%arg0: i32) -> (i32, i32, i32) {
    %c0_i32 = arith.constant 0 : i32
    %c0_i32_0 = arith.constant 0 : i32
    %c0_i32_1 = arith.constant 0 : i32
    return %arg0, %c0_i32, %c0_i32_0 : i32, i32, i32
  }
}

</mosaic_0001>

<bundles_post_ra>
// kernel: generator_forward.1
= control target key start
LH: loop header
LB: loop body
LE: loop exit
PB: predicated region body
PF: predicated region fallthrough
CT: control target
= control target key end

     0   :  { %19 = vsyncpa [#allocation3], 0  ;;  %s9385_s0 = inlined_call_operand.vmem [shape: bf16[1,8,128], index: 0, kind: input, shape index: {}]   ;;  %s9386_s1 = inlined_call_operand.hbm [shape: bf16[128,128], index: 1, kind: input, shape index: {}]   ;;  %s9387_s2 = inlined_call_operand.hbm [shape: f32[1,128], index: 2, kind: input, shape index: {}]   ;;  %s9388_s3 = inlined_call_operand.hbm [shape: bf16[128,256], index: 3, kind: input, shape index: {}]   ;;  %s9389_s4 = inlined_call_operand.hbm [shape: f32[1,256], index: 4, kind: input, shape index: {}]   ;;  %s9390_s5 = inlined_call_operand.hbm [shape: f32[1,256], index: 5, kind: input, shape index: {}]   ;;  %s9391_s6 = inlined_call_operand.hbm [shape: bf16[256,512], index: 6, kind: input, shape index: {}]   ;;  %s9392_s7 = inlined_call_operand.hbm [shape: f32[1,512], index: 7, kind: input, shape index: {}]   ;;  %s9393_s8 = inlined_call_operand.hbm [shape: f32[1,512], index: 8, kind: input, shape index: {}]   ;;  %s9394_s9 = inlined_call_operand.hbm [shape: bf16[512,1024], index: 9, kind: input, shape index: {}]   ;;  %s9395_s10 = inlined_call_operand.hbm [shape: f32[1,1024], index: 10, kind: input, shape index: {}]   ;;  %s9396_s11 = inlined_call_operand.hbm [shape: f32[1,1024], index: 11, kind: input, shape index: {}]   ;;  %s9397_s12 = inlined_call_operand.hbm [shape: bf16[1024,896], index: 12, kind: input, shape index: {}]   ;;  %s9398_s13 = inlined_call_operand.hbm [shape: f32[1,896], index: 13, kind: input, shape index: {}]   ;;  %s9399_s14 = inlined_call_operand.vmem [shape: f32[1,8,896], index: 14, kind: output, shape index: {}]  }
   0x1   :  { %20 = vsyncpa [#allocation5], 0 }
   0x2   :  { %21 = vsyncpa [#allocation8], 0 }
   0x3   :  { %22 = vsyncpa [#allocation11], 0 }
   0x4   :  { %23 = vsyncpa [#allocation14], 0 }
   0x5   :  { %24 = vsyncpa [#allocation17], 0 }
   0x6   :  { %25 = vsyncpa [#allocation20], 0  ;;  %s8939_s29 = smov [#allocation4]   ;;  %s8940_s15 = smov [#allocation7]  }
   0x7   :  { %s46_s30 = sshll.u32 %s8939_s29, 4  ;;  %s68_s16 = sshll.u32 %s8940_s15, 4  ;;  %s47_s30 = int_to_ptr.vmem [resolvable:$true] %s46_s30  ;;  %s69_s16 = int_to_ptr.vmem [resolvable:$true] %s68_s16 }
   0x8   :  { %s8673_s17 = scalar_lea.vmem %s47_s30, 16  ;;  %s8677_s18 = scalar_lea.vmem %s47_s30, 32 }
   0x9   :  { %p8674_p0 = scmp.ne.s32.totalorder %s47_s30, %s8673_s17  ;;  %p8678_p1 = scmp.lt.s32.totalorder %s47_s30, %s47_s30 }
   0xa   :  { %p8679_p2 = scmp.lt.s32.totalorder %s8677_s18, %s8673_s17 }
   0xc   :  { %p8680_p3 = por %p8679_p2, %p8678_p1 }
   0xe   :  { %p8681_p4 = pnand %p8680_p3, %p8674_p0 }
  0x10   :  { %8684 = shalt.err (!%p8681_p4)
}
  0x11   :  { %49 = dma.hbm_to_vmem [thread:$0]  %s9387_s2, 16, %s47_s30, [#allocation5]  }
  0x12   :  { %s8693_s21 = scalar_lea.vmem %s69_s16, 32  ;;  %p8698_p6 = scmp.lt.s32.totalorder %s69_s16, %s69_s16 }
  0x13   :  { %p8694_p5 = scmp.ne.s32.totalorder %s69_s16, %s8693_s21  ;;  %p8699_p7 = scmp.lt.s32.totalorder %s8693_s21, %s8693_s21 }
  0x15   :  { %p8700_p8 = por %p8699_p7, %p8698_p6 }
  0x17   :  { %p8701_p9 = pnand %p8700_p8, %p8694_p5 }
  0x19   :  { %8704 = shalt.err (!%p8701_p9)
}
  0x1a   :  { %71 = dma.hbm_to_vmem [thread:$0]  %s9389_s4, 32, %s69_s16, [#allocation8]  }
  0x1b   :  { %s8941_s24 = smov [#allocation10]  }
  0x1c   :  { %s87_s25 = sshll.u32 %s8941_s24, 4  ;;  %s88_s25 = int_to_ptr.vmem [resolvable:$true] %s87_s25 }
  0x1d   :  { %s8713_s26 = scalar_lea.vmem %s88_s25, 8192  ;;  %p8718_p11 = scmp.lt.s32.totalorder %s88_s25, %s88_s25 }
  0x1e   :  { %p8714_p10 = scmp.ne.s32.totalorder %s88_s25, %s8713_s26  ;;  %p8719_p12 = scmp.lt.s32.totalorder %s8713_s26, %s8713_s26 }
  0x20   :  { %p8720_p13 = por %p8719_p12, %p8718_p11 }
  0x22   :  { %p8721_p0 = pnand %p8720_p13, %p8714_p10 }
  0x24   :  { %8724 = shalt.err (!%p8721_p0)
}
  0x25   :  { %s8942_s2 = smov 256   ;;  %s8943_s27 = smov 16  }
  0x26   :  { %93 = dma.hbm_to_vmem [thread:$0]  %s9391_s6, 8192, %s88_s25, [#allocation11], %s8942_s2, %s8942_s2, %s8943_s27  }
  0x27   :  { %s8944_s30 = smov [#allocation13]   ;;  %s8945_s4 = smov [#allocation16]  }
  0x28   :  { %s110_s15 = sshll.u32 %s8944_s30, 4  ;;  %s132_s16 = sshll.u32 %s8945_s4, 4  ;;  %s111_s15 = int_to_ptr.vmem [resolvable:$true] %s110_s15  ;;  %s133_s16 = int_to_ptr.vmem [resolvable:$true] %s132_s16 }
  0x29   :  { %s8733_s17 = scalar_lea.vmem %s111_s15, 64  ;;  %p8738_p2 = scmp.lt.s32.totalorder %s111_s15, %s111_s15 }
  0x2a   :  { %p8734_p1 = scmp.ne.s32.totalorder %s111_s15, %s8733_s17  ;;  %p8739_p3 = scmp.lt.s32.totalorder %s8733_s17, %s8733_s17 }
  0x2c   :  { %p8740_p4 = por %p8739_p3, %p8738_p2 }
  0x2e   :  { %p8741_p5 = pnand %p8740_p4, %p8734_p1 }
  0x30   :  { %8744 = shalt.err (!%p8741_p5)
}
  0x31   :  { %113 = dma.hbm_to_vmem [thread:$0]  %s9393_s8, 64, %s111_s15, [#allocation14]  }
  0x32   :  { %s8753_s20 = scalar_lea.vmem %s133_s16, 128  ;;  %p8758_p7 = scmp.lt.s32.totalorder %s133_s16, %s133_s16 }
  0x33   :  { %p8754_p6 = scmp.ne.s32.totalorder %s133_s16, %s8753_s20  ;;  %p8759_p8 = scmp.lt.s32.totalorder %s8753_s20, %s8753_s20 }
  0x35   :  { %p8760_p9 = por %p8759_p8, %p8758_p7 }
  0x37   :  { %p8761_p10 = pnand %p8760_p9, %p8754_p6 }
  0x39   :  { %8764 = shalt.err (!%p8761_p10)
}
  0x3a   :  { %135 = dma.hbm_to_vmem [thread:$0]  %s9395_s10, 128, %s133_s16, [#allocation17]  }
  0x3b   :  { %s8946_s22 = smov [#allocation19]  }
  0x3c   :  { %s151_s23 = sshll.u32 %s8946_s22, 4  ;;  %s152_s23 = int_to_ptr.vmem [resolvable:$true] %s151_s23 }
  0x3d   :  { %s8773_s24 = scalar_lea.vmem %s152_s23, 57344  ;;  %p8778_p12 = scmp.lt.s32.totalorder %s152_s23, %s152_s23 }
  0x3e   :  { %p8774_p11 = scmp.ne.s32.totalorder %s152_s23, %s8773_s24  ;;  %p8779_p13 = scmp.lt.s32.totalorder %s8773_s24, %s8773_s24 }
  0x40   :  { %p8780_p0 = por %p8779_p13, %p8778_p12 }
  0x42   :  { %p8781_p1 = pnand %p8780_p0, %p8774_p11 }
  0x44   :  { %8784 = shalt.err (!%p8781_p1)
}
  0x45   :  { %s8947_s8 = smov 448   ;;  %s8948_s25 = smov 28  }
  0x46   :  { %157 = dma.hbm_to_vmem [thread:$0]  %s9397_s12, 57344, %s152_s23, [#allocation20], %s8947_s8, %s8947_s8, %s8948_s25  }
  0x47   :  { %s8949_s27 = smov [#allocation2]  }
  0x48   :  { %s33_s28 = sshll.u32 %s8949_s27, 4  ;;  %s34_s28 = int_to_ptr.vmem [resolvable:$true] %s33_s28 }
  0x49   :  { %s8793_s10 = scalar_lea.vmem %s34_s28, 1024  ;;  %p8798_p3 = scmp.lt.s32.totalorder %s34_s28, %s34_s28 }
  0x4a   :  { %p8794_p2 = scmp.ne.s32.totalorder %s34_s28, %s8793_s10  ;;  %p8799_p4 = scmp.lt.s32.totalorder %s8793_s10, %s8793_s10 }
  0x4c   :  { %p8800_p5 = por %p8799_p4, %p8798_p3 }
  0x4e   :  { %p8801_p6 = pnand %p8800_p5, %p8794_p2 }
  0x50   :  { %8804 = shalt.err (!%p8801_p6)
}
  0x51   :  { %s8950_s29 = smov 64   ;;  %s8951_s30 = smov 4  }
  0x52   :  { %39 = dma.hbm_to_vmem [thread:$0]  %s9386_s1, 1024, %s34_s28, [#allocation3], %s8950_s29, %s8950_s29, %s8951_s30  }
  0x53   :  { %s8952_s16 = smov [#allocation6]  }
  0x54   :  { %s55_s17 = sshll.u32 %s8952_s16, 4  ;;  %s56_s17 = int_to_ptr.vmem [resolvable:$true] %s55_s17 }
  0x55   :  { %s8813_s12 = scalar_lea.vmem %s56_s17, 2048  ;;  %p8818_p8 = scmp.lt.s32.totalorder %s56_s17, %s56_s17 }
  0x56   :  { %p8814_p7 = scmp.ne.s32.totalorder %s56_s17, %s8813_s12  ;;  %p8819_p9 = scmp.lt.s32.totalorder %s8813_s12, %s8813_s12 }
  0x58   :  { %p8820_p10 = por %p8819_p9, %p8818_p8 }
  0x5a   :  { %p8821_p11 = pnand %p8820_p10, %p8814_p7 }
  0x5c   :  { %8824 = shalt.err (!%p8821_p11)
}
  0x5d   :  { %s8953_s18 = smov 128   ;;  %s8954_s19 = smov 8  }
  0x5e   :  { %61 = dma.hbm_to_vmem [thread:$0]  %s9388_s3, 2048, %s56_s17, [#allocation5], %s8953_s18, %s8953_s18, %s8954_s19  }
  0x5f   :  { %s8955_s21 = smov [#allocation9]   ;;  %s8956_s23 = smov [#allocation12]  }
  0x60   :  { %s78_s22 = sshll.u32 %s8955_s21, 4  ;;  %s100_s1 = sshll.u32 %s8956_s23, 4  ;;  %s79_s22 = int_to_ptr.vmem [resolvable:$true] %s78_s22  ;;  %s101_s1 = int_to_ptr.vmem [resolvable:$true] %s100_s1 }
  0x61   :  { %s8833_s24 = scalar_lea.vmem %s79_s22, 32  ;;  %p8838_p13 = scmp.lt.s32.totalorder %s79_s22, %s79_s22 }
  0x62   :  { %p8834_p12 = scmp.ne.s32.totalorder %s79_s22, %s8833_s24  ;;  %p8839_p0 = scmp.lt.s32.totalorder %s8833_s24, %s8833_s24 }
  0x64   :  { %p8840_p1 = por %p8839_p0, %p8838_p13 }
  0x66   :  { %p8841_p2 = pnand %p8840_p1, %p8834_p12 }
  0x68   :  { %8844 = shalt.err (!%p8841_p2)
}
  0x69   :  { %81 = dma.hbm_to_vmem [thread:$0]  %s9390_s5, 32, %s79_s22, [#allocation8]  }
  0x6a   :  { %s8853_s26 = scalar_lea.vmem %s101_s1, 64  ;;  %p8858_p4 = scmp.lt.s32.totalorder %s101_s1, %s101_s1 }
  0x6b   :  { %p8854_p3 = scmp.ne.s32.totalorder %s101_s1, %s8853_s26  ;;  %p8859_p5 = scmp.lt.s32.totalorder %s8853_s26, %s8853_s26 }
  0x6d   :  { %p8860_p6 = por %p8859_p5, %p8858_p4 }
  0x6f   :  { %p8861_p7 = pnand %p8860_p6, %p8854_p3 }
  0x71   :  { %8864 = shalt.err (!%p8861_p7)
}
  0x72   :  { %103 = dma.hbm_to_vmem [thread:$0]  %s9392_s7, 64, %s101_s1, [#allocation11]  }
  0x73   :  { %s8957_s27 = smov [#allocation15]  }
  0x74   :  { %s119_s28 = sshll.u32 %s8957_s27, 4  ;;  %s120_s28 = int_to_ptr.vmem [resolvable:$true] %s119_s28 }
  0x75   :  { %s8873_s10 = scalar_lea.vmem %s120_s28, 32768  ;;  %p8878_p9 = scmp.lt.s32.totalorder %s120_s28, %s120_s28 }
  0x76   :  { %p8874_p8 = scmp.ne.s32.totalorder %s120_s28, %s8873_s10  ;;  %p8879_p10 = scmp.lt.s32.totalorder %s8873_s10, %s8873_s10 }
  0x78   :  { %p8880_p11 = por %p8879_p10, %p8878_p9 }
  0x7a   :  { %p8881_p12 = pnand %p8880_p11, %p8874_p8 }
  0x7c   :  { %8884 = shalt.err (!%p8881_p12)
}
  0x7d   :  { %s8958_s5 = smov 512   ;;  %s8959_s29 = smov 32  }
  0x7e   :  { %125 = dma.hbm_to_vmem [thread:$0]  %s9394_s9, 32768, %s120_s28, [#allocation14], %s8958_s5, %s8958_s5, %s8959_s29  }
  0x7f   :  { %s8960_s4 = smov [#allocation18]   ;;  %s8961_s7 = smov [#allocation21]  }
  0x80   :  { %s142_s16 = sshll.u32 %s8960_s4, 4  ;;  %s164_s17 = sshll.u32 %s8961_s7, 4  ;;  %s143_s16 = int_to_ptr.vmem [resolvable:$true] %s142_s16  ;;  %s165_s17 = int_to_ptr.vmem [resolvable:$true] %s164_s17 }
  0x81   :  { %s8893_s12 = scalar_lea.vmem %s143_s16, 128  ;;  %p8898_p0 = scmp.lt.s32.totalorder %s143_s16, %s143_s16 }
  0x82   :  { %p8894_p13 = scmp.ne.s32.totalorder %s143_s16, %s8893_s12  ;;  %p8899_p1 = scmp.lt.s32.totalorder %s8893_s12, %s8893_s12 }
  0x84   :  { %p8900_p2 = por %p8899_p1, %p8898_p0 }
  0x86   :  { %p8901_p3 = pnand %p8900_p2, %p8894_p13 }
  0x88   :  { %8904 = shalt.err (!%p8901_p3)
}
  0x89   :  { %145 = dma.hbm_to_vmem [thread:$0]  %s9396_s11, 128, %s143_s16, [#allocation17]  }
  0x8a   :  { %s8913_s20 = scalar_lea.vmem %s165_s17, 112  ;;  %s8917_s9 = scalar_lea.vmem %s165_s17, 128 }
  0x8b   :  { %p8914_p4 = scmp.ne.s32.totalorder %s165_s17, %s8913_s20  ;;  %p8918_p5 = scmp.lt.s32.totalorder %s165_s17, %s165_s17 }
  0x8c   :  { %p8919_p6 = scmp.lt.s32.totalorder %s8917_s9, %s8913_s20 }
  0x8e   :  { %p8920_p7 = por %p8919_p6, %p8918_p5 }
  0x90   :  { %p8921_p8 = pnand %p8920_p7, %p8914_p4 }
  0x92   :  { %8924 = shalt.err (!%p8921_p8)
}
  0x93   :  { %167 = dma.hbm_to_vmem [thread:$0]  %s9398_s13, 112, %s165_s17, [#allocation20]  }
  0x94   :  { %8925 = dma.done.wait [#allocation3], 1024  }
  0x95   :  { %8926 = vsyncadd [#allocation3], 4294966272 }
  0x96   :  { %8927 = dma.done.wait [#allocation5], 2064  }
  0x97   :  { %8928 = vsyncadd [#allocation5], 4294965232 }
  0x98   :  { %8929 = dma.done.wait [#allocation8], 64  }
  0x99   :  { %8930 = vsyncadd [#allocation8], 4294967232 }
  0x9a   :  { %8931 = dma.done.wait [#allocation11], 8256  }
  0x9b   :  { %8932 = vsyncadd [#allocation11], 4294959040 }
  0x9c   :  { %8933 = dma.done.wait [#allocation14], 32832  }
  0x9d   :  { %8934 = vsyncadd [#allocation14], 4294934464 }
  0x9e   :  { %8935 = dma.done.wait [#allocation17], 256  }
  0x9f   :  { %8936 = vsyncadd [#allocation17], 4294967040 }
  0xa0   :  { %8937 = dma.done.wait [#allocation20], 57456  }
  0xa1   :  { %8938 = vsyncadd [#allocation20], 4294909840  ;;  %v8962_v0 = vmov 0.0   ;;  %vm8963_vm0 = vmmov 0   ;;  %v7855_v1 = vld [vmem:[#allocation2 + $0x38] sm:$0xff]   ;;  %v7856_v2 = vld [vmem:[#allocation2 + $0x30] sm:$0xff]  }
  0xa2   :  { %7808 = vmatprep.subr.bf16.mxu0 %v8962_v0  ;;  %7824 = vmatprep.mubr.msk.bf16.mxu0 %vm8963_vm0, %v8962_v0  ;;  %v7857_v3 = vld [vmem:[#allocation2 + $0x28] sm:$0xff]   ;;  %v7863_v4 = vld [vmem:[#allocation6 + $0x74] ss:$8 sps:$4 sm:$0xff]   ;;  %v7865_v5 = vld [vmem:[#allocation6 + $0x70] ss:$8 sps:$4 sm:$0xff]   ;;  %v8964_v26 = vmov 0  }
  0xa3   :  { %7809 = vmatpush3.bf16.msra.mxu0 %v7855_v1  ;;  %v7858_v6 = vld [vmem:[#allocation2 + $0x20] sm:$0xff]   ;;  %420 = vmatprep.subr.bf16.mxu1 %v7863_v4  ;;  %v7859_v10 = vld [vmem:[#allocation2 + $0x18] sm:$0xff]   ;;  %v7860_v11 = vld [vmem:[#allocation2 + $0x10] sm:$0xff]  }
  0xa4   :  { %7810 = vmatprep.subr.bf16.mxu0 %v8962_v0  ;;  %v7866_v7 = vld [vmem:[#allocation6 + $0x64] ss:$8 sps:$4 sm:$0xff]   ;;  %421 = vmatpush1.bf16.msra.mxu1 %v7865_v5  ;;  %v7868_v8 = vld [vmem:[#allocation6 + $0x60] ss:$8 sps:$4 sm:$0xff]   ;;  %v7869_v9 = vld [vmem:[#allocation6 + $0x54] ss:$8 sps:$4 sm:$0xff]  }
  0xa5   :  { %422 = vmatprep.subr.bf16.mxu1 %v7866_v7  ;;  %v7871_v12 = vld [vmem:[#allocation6 + $0x50] ss:$8 sps:$4 sm:$0xff]   ;;  %v7872_v13 = vld [vmem:[#allocation6 + $0x44] ss:$8 sps:$4 sm:$0xff]   ;;  %v7874_v14 = vld [vmem:[#allocation6 + $0x40] ss:$8 sps:$4 sm:$0xff]   ;;  %452 = vmatprep.mubr.bf16.mxu1 %v8964_v26 }
  0xa6   :  { %v7875_v15 = vld [vmem:[#allocation6 + $0x34] ss:$8 sps:$4 sm:$0xff]   ;;  %v7861_v16 = vld [vmem:[#allocation2 + $0x8] sm:$0xff]   ;;  %v7877_v17 = vld [vmem:[#allocation6 + $0x30] ss:$8 sps:$4 sm:$0xff]  }
  0xa7   :  { %7811 = vmatpush3.bf16.msra.mxu0 %v7856_v2  ;;  %v7878_v18 = vld [vmem:[#allocation6 + $0x24] ss:$8 sps:$4 sm:$0xff]   ;;  %v7880_v20 = vld [vmem:[#allocation6 + $0x20] ss:$8 sps:$4 sm:$0xff]   ;;  %v7881_v22 = vld [vmem:[#allocation6 + $0x14] ss:$8 sps:$4 sm:$0xff]  }
  0xa8   :  { %7812 = vmatprep.subr.bf16.mxu0 %v8962_v0  ;;  %423 = vmatpush1.bf16.msra.mxu1 %v7868_v8  ;;  %v7862_v19 = vld [vmem:[#allocation2] sm:$0xff]   ;;  %v7883_v23 = vld [vmem:[#allocation6 + $0x10] ss:$8 sps:$4 sm:$0xff]  }
  0xa9   :  { %424 = vmatprep.subr.bf16.mxu1 %v7869_v9  ;;  %v208_v21 = vld [vmem:[%s9385_s0] sm:$0xf]  ;;  %v7884_v24 = vld [vmem:[#allocation6 + $0x4] ss:$8 sps:$4 sm:$0xff]   ;;  %v7889_v36 = vld [vmem:[#allocation10 + $0xe4] ss:$16 sps:$4 sm:$0xff]  }
  0xaa   :  { %v7886_v25 = vld [vmem:[#allocation6] ss:$8 sps:$4 sm:$0xff]   ;;  %v6918_v27 = vld [vmem:[#allocation4] ss:$0 sm:$0xff]  ;;  %v7887_v38 = vld [vmem:[#allocation10 + $0xe0] ss:$16 sps:$4 sm:$0xff]  }
  0xab   :  { %7813 = vmatpush3.bf16.msra.mxu0 %v7857_v3  ;;  %v7892_v37 = vld [vmem:[#allocation10 + $0xec] ss:$16 sps:$4 sm:$0xff]   ;;  %v7890_v39 = vld [vmem:[#allocation10 + $0xe8] ss:$16 sps:$4 sm:$0xff]   ;;  %v7895_v40 = vld [vmem:[#allocation10 + $0xc4] ss:$16 sps:$4 sm:$0xff]  }
  0xac   :  { %7814 = vmatprep.subr.bf16.mxu0 %v8962_v0  ;;  %425 = vmatpush1.bf16.msra.mxu1 %v7871_v12  ;;  %v7898_v41 = vld [vmem:[#allocation10 + $0xcc] ss:$16 sps:$4 sm:$0xff]   ;;  %v7893_v42 = vld [vmem:[#allocation10 + $0xc0] ss:$16 sps:$4 sm:$0xff]   ;;  %v7896_v43 = vld [vmem:[#allocation10 + $0xc8] ss:$16 sps:$4 sm:$0xff]  }
  0xad   :  { %426 = vmatprep.subr.bf16.mxu1 %v7872_v13  ;;  %v7901_v44 = vld [vmem:[#allocation10 + $0xa4] ss:$16 sps:$4 sm:$0xff]   ;;  %v7904_v45 = vld [vmem:[#allocation10 + $0xac] ss:$16 sps:$4 sm:$0xff]   ;;  %v7899_v46 = vld [vmem:[#allocation10 + $0xa0] ss:$16 sps:$4 sm:$0xff]  }
  0xae   :  { %v7902_v47 = vld [vmem:[#allocation10 + $0xa8] ss:$16 sps:$4 sm:$0xff]   ;;  %v7907_v48 = vld [vmem:[#allocation10 + $0x84] ss:$16 sps:$4 sm:$0xff]   ;;  %v7910_v49 = vld [vmem:[#allocation10 + $0x8c] ss:$16 sps:$4 sm:$0xff]  }
  0xaf   :  { %7815 = vmatpush3.bf16.msra.mxu0 %v7858_v6  ;;  %v7905_v50 = vld [vmem:[#allocation10 + $0x80] ss:$16 sps:$4 sm:$0xff]   ;;  %v7908_v51 = vld [vmem:[#allocation10 + $0x88] ss:$16 sps:$4 sm:$0xff]   ;;  %v7913_v52 = vld [vmem:[#allocation10 + $0x64] ss:$16 sps:$4 sm:$0xff]  }
  0xb0   :  { %7816 = vmatprep.subr.bf16.mxu0 %v8962_v0  ;;  %427 = vmatpush1.bf16.msra.mxu1 %v7874_v14  ;;  %v7916_v53 = vld [vmem:[#allocation10 + $0x6c] ss:$16 sps:$4 sm:$0xff]   ;;  %v7911_v54 = vld [vmem:[#allocation10 + $0x60] ss:$16 sps:$4 sm:$0xff]   ;;  %v7914_v55 = vld [vmem:[#allocation10 + $0x68] ss:$16 sps:$4 sm:$0xff]  }
  0xb1   :  { %428 = vmatprep.subr.bf16.mxu1 %v7875_v15  ;;  %v7919_v56 = vld [vmem:[#allocation10 + $0x44] ss:$16 sps:$4 sm:$0xff]   ;;  %v7922_v57 = vld [vmem:[#allocation10 + $0x4c] ss:$16 sps:$4 sm:$0xff]   ;;  %v7917_v58 = vld [vmem:[#allocation10 + $0x40] ss:$16 sps:$4 sm:$0xff]  }
  0xb2   :  { %v7920_v59 = vld [vmem:[#allocation10 + $0x48] ss:$16 sps:$4 sm:$0xff]   ;;  %v7925_v60 = vld [vmem:[#allocation10 + $0x24] ss:$16 sps:$4 sm:$0xff]   ;;  %v7928_v61 = vld [vmem:[#allocation10 + $0x2c] ss:$16 sps:$4 sm:$0xff]  }
  0xb3   :  { %7817 = vmatpush3.bf16.msra.mxu0 %v7859_v10  ;;  %v7923_v62 = vld [vmem:[#allocation10 + $0x20] ss:$16 sps:$4 sm:$0xff]   ;;  %v7926_v63 = vld [vmem:[#allocation10 + $0x28] ss:$16 sps:$4 sm:$0xff]   ;;  %v7934_v1 = vld [vmem:[#allocation10 + $0xc] ss:$16 sps:$4 sm:$0xff]  }
  0xb4   :  { %7818 = vmatprep.subr.bf16.mxu0 %v8962_v0  ;;  %429 = vmatpush1.bf16.msra.mxu1 %v7877_v17  ;;  %v7929_v2 = vld [vmem:[#allocation10] ss:$16 sps:$4 sm:$0xff]   ;;  %v7932_v3 = vld [vmem:[#allocation10 + $0x8] ss:$16 sps:$4 sm:$0xff]   ;;  %v7937_v4 = vld [vmem:[#allocation10 + $0x1e4] ss:$16 sps:$4 sm:$0xff]  }
  0xb5   :  { %430 = vmatprep.subr.bf16.mxu1 %v7878_v18  ;;  %v7940_v5 = vld [vmem:[#allocation10 + $0x1ec] ss:$16 sps:$4 sm:$0xff]   ;;  %v7935_v6 = vld [vmem:[#allocation10 + $0x1e0] ss:$16 sps:$4 sm:$0xff]   ;;  %v7938_v7 = vld [vmem:[#allocation10 + $0x1e8] ss:$16 sps:$4 sm:$0xff]  }
  0xb6   :  { %v7943_v8 = vld [vmem:[#allocation10 + $0x1c4] ss:$16 sps:$4 sm:$0xff]   ;;  %v7946_v9 = vld [vmem:[#allocation10 + $0x1cc] ss:$16 sps:$4 sm:$0xff]   ;;  %v7941_v10 = vld [vmem:[#allocation10 + $0x1c0] ss:$16 sps:$4 sm:$0xff]  }
  0xb7   :  { %7819 = vmatpush3.bf16.msra.mxu0 %v7860_v11  ;;  %v7944_v11 = vld [vmem:[#allocation10 + $0x1c8] ss:$16 sps:$4 sm:$0xff]   ;;  %v7949_v12 = vld [vmem:[#allocation10 + $0x1a4] ss:$16 sps:$4 sm:$0xff]   ;;  %v7952_v13 = vld [vmem:[#allocation10 + $0x1ac] ss:$16 sps:$4 sm:$0xff]  }
  0xb8   :  { %7820 = vmatprep.subr.bf16.mxu0 %v8962_v0  ;;  %431 = vmatpush1.bf16.msra.mxu1 %v7880_v20  ;;  %v7947_v14 = vld [vmem:[#allocation10 + $0x1a0] ss:$16 sps:$4 sm:$0xff]   ;;  %v7950_v15 = vld [vmem:[#allocation10 + $0x1a8] ss:$16 sps:$4 sm:$0xff]   ;;  %v7958_v17 = vld [vmem:[#allocation10 + $0x18c] ss:$16 sps:$4 sm:$0xff]  }
  0xb9   :  { %432 = vmatprep.subr.bf16.mxu1 %v7881_v22  ;;  %v7953_v18 = vld [vmem:[#allocation10 + $0x180] ss:$16 sps:$4 sm:$0xff]   ;;  %v7961_v20 = vld [vmem:[#allocation10 + $0x164] ss:$16 sps:$4 sm:$0xff]  }
  0xba   :  { %v7959_v22 = vld [vmem:[#allocation10 + $0x160] ss:$16 sps:$4 sm:$0xff]  }
  0xbb   :  { %7821 = vmatpush3.bf16.msra.mxu0 %v7861_v16  ;;  %v7955_v16 = vld [vmem:[#allocation10 + $0x184] ss:$16 sps:$4 sm:$0xff]   ;;  %v7965_v26 = vld [vmem:[#allocation10 + $0x140] ss:$16 sps:$4 sm:$0xff]  }
  0xbc   :  { %7822 = vmatprep.subr.bf16.mxu0 %v8962_v0  ;;  %433 = vmatpush1.bf16.msra.mxu1 %v7883_v23  ;;  %v7931_v0 = vld [vmem:[#allocation10 + $0x4] ss:$16 sps:$4 sm:$0xff]   ;;  %v7962_v23 = vld [vmem:[#allocation10 + $0x168] ss:$16 sps:$4 sm:$0xff]  }
  0xbd   :  { %434 = vmatprep.subr.bf16.mxu1 %v7884_v24  ;;  %v7967_v24 = vld [vmem:[#allocation10 + $0x144] ss:$16 sps:$4 sm:$0xff]  }
  0xbf   :  { %7823 = vmatpush3.bf16.msra.mxu0 %v7862_v19  ;;  %v7956_v19 = vld [vmem:[#allocation10 + $0x188] ss:$16 sps:$4 sm:$0xff]  }
  0xc0   :  { %435 = vmatpush1.bf16.msra.mxu1 %v7886_v25  ;;  %937 = vmatprep.subr.bf16.mxu0 %v7889_v36  ;;  %v7970_v25 = vld [vmem:[#allocation10 + $0x14c] ss:$16 sps:$4 sm:$0xff]  }
  0xc1   :  { %978 = vmatprep.subr.bf16.mxu1 %v7892_v37 }
  0xc2   :  { %7825 = vmatmul.mubr.bf16.vlgmr.msra.gmra.mxu0 %v208_v21  ;;  %v7964_v21 = vld [vmem:[#allocation10 + $0x16c] ss:$16 sps:$4 sm:$0xff]  }
  0xc3   :  { %938 = vmatpush1.bf16.msra.mxu0 %v7887_v38 }
  0xc4   :  { %939 = vmatprep.subr.bf16.mxu0 %v7895_v40 }
  0xc7   :  { %940 = vmatpush1.bf16.msra.mxu0 %v7893_v42 }
  0xc8   :  { %941 = vmatprep.subr.bf16.mxu0 %v7901_v44 }
  0xcb   :  { %942 = vmatpush1.bf16.msra.mxu0 %v7899_v46 }
  0xcc   :  { %943 = vmatprep.subr.bf16.mxu0 %v7907_v48 }
  0xcf   :  { %944 = vmatpush1.bf16.msra.mxu0 %v7905_v50 }
  0xd0   :  { %945 = vmatprep.subr.bf16.mxu0 %v7913_v52 }
  0xd3   :  { %946 = vmatpush1.bf16.msra.mxu0 %v7911_v54 }
  0xd4   :  { %947 = vmatprep.subr.bf16.mxu0 %v7919_v56 }
  0xd7   :  { %948 = vmatpush1.bf16.msra.mxu0 %v7917_v58 }
  0xd8   :  { %949 = vmatprep.subr.bf16.mxu0 %v7925_v60 }
  0xdb   :  { %950 = vmatpush1.bf16.msra.mxu0 %v7923_v62 }
  0xdc   :  { %951 = vmatprep.subr.bf16.mxu0 %v7931_v0 }
  0xdf   :  { %952 = vmatpush1.bf16.msra.mxu0 %v7929_v2 }
  0xe0   :  { %953 = vmatprep.subr.bf16.mxu0 %v7937_v4 }
  0xe3   :  { %954 = vmatpush2.bf16.msra.mxu0 %v7935_v6 }
  0xe4   :  { %955 = vmatprep.subr.bf16.mxu0 %v7943_v8 }
  0xe7   :  { %956 = vmatpush2.bf16.msra.mxu0 %v7941_v10  ;;  %v8965_v10 = vmov 1966171168  }
  0xe8   :  { %957 = vmatprep.subr.bf16.mxu0 %v7949_v12  ;;  %v506_v12 = vlaneseq }
  0xeb   :  { %958 = vmatpush2.bf16.msra.mxu0 %v7947_v14  ;;  %v9083_v14 = vshrl.u32 %v506_v12, 7  ;;  %v1345_v12 = vld [vmem:[#allocation15 + $0x4e0] sm:$0xff] }
  0xec   :  { %959 = vmatprep.subr.bf16.mxu0 %v7955_v16 }
  0xef   :  { %960 = vmatpush2.bf16.msra.mxu0 %v7953_v18 }
  0xf0   :  { %961 = vmatprep.subr.bf16.mxu0 %v7961_v20  ;;  %v461_v20 = vld [vmem:[#allocation7] sm:$0x3] }
  0xf3   :  { %962 = vmatpush2.bf16.msra.mxu0 %v7959_v22  ;;  %v9091_v22 = vsub.s32 0, %v9083_v14 }
  0xf4   :  { %963 = vmatprep.subr.bf16.mxu0 %v7967_v24  ;;  %v462_v24 = vld [vmem:[#allocation9] sm:$0x3] }
  0xf7   :  { %964 = vmatpush2.bf16.msra.mxu0 %v7965_v26 }
 0x182   :  { %v314_v28 = vpop.f32.mrf.mxu0 }
 0x183   :  { %v315_v29 = vadd.f32 %v6918_v27, %v314_v28  ;;  %v7968_v27 = vld [vmem:[#allocation10 + $0x148] ss:$16 sps:$4 sm:$0xff]   ;;  %v7973_v28 = vld [vmem:[#allocation10 + $0x124] ss:$16 sps:$4 sm:$0xff]  }
 0x184   :  { %v7826_v30 = vpop.f32.mrf.mxu0  ;;  %965 = vmatprep.subr.bf16.mxu0 %v7973_v28  ;;  %v536_v28 = vrot.slane %v462_v24, %v9091_v22 }
 0x185   :  { %vm320_vm1 = vcmp.gt.f32.partialorder %v315_v29, 0.0  ;;  %v321_v31 = vmul.f32 0.2, %v315_v29  ;;  %v7971_v30 = vld [vmem:[#allocation10 + $0x120] ss:$16 sps:$4 sm:$0xff]  }
 0x186   :  { %v317_v32 = vpop.f32.mrf.mxu0  ;;  %966 = vmatpush2.bf16.msra.mxu0 %v7971_v30 }
 0x187   :  { %v322_v33 = vsel %vm320_vm1, %v315_v29, %v321_v31  ;;  %v7976_v29 = vld [vmem:[#allocation10 + $0x12c] ss:$16 sps:$4 sm:$0xff]   ;;  %v7974_v31 = vld [vmem:[#allocation10 + $0x128] ss:$16 sps:$4 sm:$0xff]   ;;  %v7979_v32 = vld [vmem:[#allocation10 + $0x104] ss:$16 sps:$4 sm:$0xff]  }
 0x188   :  { %v7827_v34 = vpop.f32.mrf.mxu0  ;;  %v323_v35 = vpack.c.bf16 %v322_v33, %v322_v33  ;;  %v7977_v33 = vld [vmem:[#allocation10 + $0x100] ss:$16 sps:$4 sm:$0xff]   ;;  %967 = vmatprep.subr.bf16.mxu0 %v7979_v32 }
 0x189   :  { %v7980_v34 = vld [vmem:[#allocation10 + $0x108] ss:$16 sps:$4 sm:$0xff]  }
 0x18a   :  { %453 = vmatmul.mubr.bf16.vlgmr.msra.gmra.mxu1 %v323_v35  ;;  %v7982_v35 = vld [vmem:[#allocation10 + $0x10c] ss:$16 sps:$4 sm:$0xff]   ;;  %968 = vmatpush2.bf16.msra.mxu0 %v7977_v33 }
 0x18b   :  { %979 = vmatpush1.bf16.msra.mxu1 %v7890_v39 }
 0x18c   :  { %980 = vmatprep.subr.bf16.mxu1 %v7898_v41 }
 0x18f   :  { %981 = vmatpush1.bf16.msra.mxu1 %v7896_v43 }
 0x190   :  { %982 = vmatprep.subr.bf16.mxu1 %v7904_v45 }
 0x193   :  { %983 = vmatpush1.bf16.msra.mxu1 %v7902_v47 }
 0x194   :  { %984 = vmatprep.subr.bf16.mxu1 %v7910_v49 }
 0x197   :  { %985 = vmatpush1.bf16.msra.mxu1 %v7908_v51 }
 0x198   :  { %986 = vmatprep.subr.bf16.mxu1 %v7916_v53 }
 0x19b   :  { %987 = vmatpush1.bf16.msra.mxu1 %v7914_v55 }
 0x19c   :  { %988 = vmatprep.subr.bf16.mxu1 %v7922_v57 }
 0x19f   :  { %989 = vmatpush1.bf16.msra.mxu1 %v7920_v59 }
 0x1a0   :  { %990 = vmatprep.subr.bf16.mxu1 %v7928_v61 }
 0x1a3   :  { %991 = vmatpush1.bf16.msra.mxu1 %v7926_v63 }
 0x1a4   :  { %992 = vmatprep.subr.bf16.mxu1 %v7934_v1 }
 0x1a7   :  { %993 = vmatpush1.bf16.msra.mxu1 %v7932_v3 }
 0x1a8   :  { %994 = vmatprep.subr.bf16.mxu1 %v7940_v5 }
 0x1ab   :  { %995 = vmatpush2.bf16.msra.mxu1 %v7938_v7 }
 0x1ac   :  { %996 = vmatprep.subr.bf16.mxu1 %v7946_v9 }
 0x1af   :  { %997 = vmatpush2.bf16.msra.mxu1 %v7944_v11  ;;  %v504_v11 = vunpack.c.l.s4 %v8965_v10  ;;  %v1341_v10 = vld [vmem:[#allocation15 + $0x4c0] sm:$0xff] }
 0x1b0   :  { %998 = vmatprep.subr.bf16.mxu1 %v7952_v13 }
 0x1b1   :  { %v505_v13 = vunpack.c.0.s8 %v504_v11 }
 0x1b3   :  { %999 = vmatpush2.bf16.msra.mxu1 %v7950_v15  ;;  %v9086_v16 = vsub.s32 %v505_v13, %v9083_v14 }
 0x1b4   :  { %1000 = vmatprep.subr.bf16.mxu1 %v7958_v17 }
 0x1b7   :  { %1001 = vmatpush2.bf16.msra.mxu1 %v7956_v19 }
 0x1b8   :  { %1002 = vmatprep.subr.bf16.mxu1 %v7964_v21 }
 0x1bb   :  { %1003 = vmatpush2.bf16.msra.mxu1 %v7962_v23  ;;  %v9094_v23 = vsub.s32 1, %v9083_v14 }
 0x1bc   :  { %1004 = vmatprep.subr.bf16.mxu1 %v7970_v25 }
 0x1bf   :  { %1005 = vmatpush2.bf16.msra.mxu1 %v7968_v27 }
 0x1c0   :  { %1006 = vmatprep.subr.bf16.mxu1 %v7976_v29  ;;  %v540_v29 = vrot.slane %v462_v24, %v9094_v23  ;;  %v1337_v24 = vld [vmem:[#allocation15 + $0x4a0] sm:$0xff] }
 0x1c3   :  { %1007 = vmatpush2.bf16.msra.mxu1 %v7974_v31 }
 0x1c4   :  { %1008 = vmatprep.subr.bf16.mxu1 %v7982_v35 }
 0x1c7   :  { %1009 = vmatpush2.bf16.msra.mxu1 %v7980_v34 }
 0x24a   :  { %v454_v36 = vpop.f32.mrf.mxu1 }
 0x24b   :  { %v463_v37 = vrot.slane %v454_v36, 4 }
 0x24c   :  { %v456_v38 = vpop.f32.mrf.mxu1 }
 0x24d   :  { %v464_v39 = vadd.f32 %v463_v37, %v454_v36  ;;  %v469_v40 = vrot.slane %v456_v38, 4 }
 0x24e   :  { %v458_v41 = vpop.f32.mrf.mxu1 }
 0x24f   :  { %v465_v42 = vrot.slane %v464_v39, 2  ;;  %v470_v43 = vadd.f32 %v469_v40, %v456_v38  ;;  %v1245_v40 = vld [vmem:[#allocation15 + $0x1c0] sm:$0xff] }
 0x250   :  { %v459_v44 = vpop.f32.mrf.mxu1  ;;  %v1249_v41 = vld [vmem:[#allocation15 + $0x1e0] sm:$0xff] }
 0x251   :  { %v466_v45 = vadd.f32 %v465_v42, %v464_v39  ;;  %v471_v46 = vrot.slane %v470_v43, 2  ;;  %v1373_v42 = vld [vmem:[#allocation15 + $0x5c0] sm:$0xff] }
 0x252   :  { %v1377_v44 = vld [vmem:[#allocation15 + $0x5e0] sm:$0xff] }
 0x253   :  { %v467_v47 = vrot.slane %v466_v45, 1  ;;  %v472_v48 = vadd.f32 %v471_v46, %v470_v43  ;;  %v7064_v43 = vcombine.high %v1245_v40, %v1249_v41  ;;  %v7191_v46 = vcombine.low %v1373_v42, %v1377_v44 }
 0x255   :  { %v468_v49 = vadd.f32 %v467_v47, %v466_v45  ;;  %v473_v50 = vrot.slane %v472_v48, 1  ;;  %v7063_v45 = vcombine.low %v1245_v40, %v1249_v41  ;;  %v7192_v47 = vcombine.high %v1373_v42, %v1377_v44  ;;  %2725 = vmatprep.subr.bf16.mxu0 %v7064_v43  ;;  %v1321_v40 = vld [vmem:[#allocation15 + $0x420] sm:$0xff] }
 0x256   :  { %v1309_v44 = vld [vmem:[#allocation15 + $0x3c0] sm:$0xff] }
 0x257   :  { %v476_v51 = vmul.f32 0.125, %v468_v49  ;;  %v474_v52 = vadd.f32 %v473_v50, %v472_v48  ;;  %2766 = vmatprep.subr.bf16.mxu1 %v7192_v47  ;;  %v1237_v48 = vld [vmem:[#allocation15 + $0x180] sm:$0xff] }
 0x258   :  { %v1241_v49 = vld [vmem:[#allocation15 + $0x1a0] sm:$0xff] }
 0x259   :  { %v478_v53 = vsub.f32 %v454_v36, %v476_v51  ;;  %v477_v54 = vmul.f32 0.125, %v474_v52  ;;  %v1365_v50 = vld [vmem:[#allocation15 + $0x580] sm:$0xff]  ;;  %v7056_v51 = vcombine.high %v1237_v48, %v1241_v49 }
 0x25a   :  { %v1369_v52 = vld [vmem:[#allocation15 + $0x5a0] sm:$0xff] }
 0x25b   :  { %v480_v55 = vmul.f32 %v478_v53, %v478_v53  ;;  %v479_v56 = vsub.f32 %v456_v38, %v477_v54  ;;  %v7183_v54 = vcombine.low %v1365_v50, %v1369_v52 }
 0x25d   :  { %v482_v57 = vrot.slane %v480_v55, 4  ;;  %v481_v58 = vmul.f32 %v479_v56, %v479_v56 }
 0x25f   :  { %v483_v59 = vadd.f32 %v482_v57, %v480_v55  ;;  %v488_v60 = vrot.slane %v481_v58, 4  ;;  %v7184_v55 = vcombine.high %v1365_v50, %v1369_v52  ;;  %v1233_v57 = vld [vmem:[#allocation15 + $0x160] sm:$0xff] }
 0x260   :  { %v1301_v52 = vld [vmem:[#allocation15 + $0x380] sm:$0xff] }
 0x261   :  { %v484_v61 = vrot.slane %v483_v59, 2  ;;  %v489_v62 = vadd.f32 %v488_v60, %v481_v58  ;;  %v1357_v58 = vld [vmem:[#allocation15 + $0x540] sm:$0xff] }
 0x262   :  { %v1361_v60 = vld [vmem:[#allocation15 + $0x560] sm:$0xff] }
 0x263   :  { %v485_v63 = vadd.f32 %v484_v61, %v483_v59  ;;  %v490_v0 = vrot.slane %v489_v62, 2 }
 0x265   :  { %v486_v1 = vrot.slane %v485_v63, 1  ;;  %v491_v2 = vadd.f32 %v490_v0, %v489_v62  ;;  %v7175_v62 = vcombine.low %v1357_v58, %v1361_v60  ;;  %v1221_v0 = vld [vmem:[#allocation15 + $0x100] sm:$0xff] }
 0x267   :  { %v487_v3 = vadd.f32 %v486_v1, %v485_v63  ;;  %v492_v4 = vrot.slane %v491_v2, 1  ;;  %v7176_v63 = vcombine.high %v1357_v58, %v1361_v60  ;;  %v1225_v1 = vld [vmem:[#allocation15 + $0x120] sm:$0xff] }
 0x268   :  { %v1293_v60 = vld [vmem:[#allocation15 + $0x340] sm:$0xff] }
 0x269   :  { %v494_v5 = vmul.f32 0.125, %v487_v3  ;;  %v493_v6 = vadd.f32 %v492_v4, %v491_v2  ;;  %v1349_v2 = vld [vmem:[#allocation15 + $0x500] sm:$0xff]  ;;  %v7040_v3 = vcombine.high %v1221_v0, %v1225_v1 }
 0x26a   :  { %v1353_v4 = vld [vmem:[#allocation15 + $0x520] sm:$0xff] }
 0x26b   :  { %v496_v7 = vadd.f32 0.8, %v494_v5  ;;  %v495_v8 = vmul.f32 0.125, %v493_v6  ;;  %v7039_v5 = vcombine.low %v1221_v0, %v1225_v1  ;;  %v7167_v6 = vcombine.low %v1349_v2, %v1353_v4  ;;  %v1425_v0 = vld [vmem:[#allocation15 + $0x760] sm:$0xff] }
 0x26d   :  { %v497_v9 = vadd.f32 0.8, %v495_v8  ;;  %8623 = vrsqrt.f32 %v496_v7  ;;  %v7168_v7 = vcombine.high %v1349_v2, %v1353_v4  ;;  %v1213_v8 = vld [vmem:[#allocation15 + $0xc0] sm:$0xff] }
 0x26e   :  { %v1285_v4 = vld [vmem:[#allocation15 + $0x300] sm:$0xff] }
 0x26f   :  { %8625 = vrsqrt.f32 %v497_v9  ;;  %v1217_v9 = vld [vmem:[#allocation15 + $0xe0] sm:$0xff] }
 0x270   :  { %v7032_v11 = vcombine.high %v1213_v8, %v1217_v9  ;;  %v7031_v13 = vcombine.low %v1213_v8, %v1217_v9  ;;  %v1417_v8 = vld [vmem:[#allocation15 + $0x720] sm:$0xff] }
 0x27a   :  { %v8624_v15 = vpop.eup %8623 }
 0x27c   :  { %v8626_v17 = vpop.eup %8625 }
 0x27d   :  { %v502_v18 = vcombine.low %v8624_v15, %v8626_v17  ;;  %v7159_v15 = vcombine.low %v1341_v10, %v1345_v12  ;;  %v7160_v17 = vcombine.high %v1341_v10, %v1345_v12  ;;  %v1277_v12 = vld [vmem:[#allocation15 + $0x2c0] sm:$0xff] }
 0x27f   :  { %v509_v19 = vrot.slane %v502_v18, %v9086_v16  ;;  %v1205_v18 = vld [vmem:[#allocation15 + $0x80] sm:$0xff] }
 0x281   :  { %v516_v21 = vrot.slane %v509_v19, %v9086_v16  ;;  %v1209_v19 = vld [vmem:[#allocation15 + $0xa0] sm:$0xff] }
 0x283   :  { %v518_v25 = vmul.f32 %v516_v21, %v461_v20  ;;  %v1333_v20 = vld [vmem:[#allocation15 + $0x480] sm:$0xff]  ;;  %v7024_v21 = vcombine.high %v1205_v18, %v1209_v19 }
 0x285   :  { %v523_v26 = vrot.slane %v518_v25, %v9091_v22  ;;  %v527_v27 = vrot.slane %v518_v25, %v9094_v23  ;;  %v7023_v25 = vcombine.low %v1205_v18, %v1209_v19  ;;  %v1409_v18 = vld [vmem:[#allocation15 + $0x6e0] sm:$0xff] }
 0x287   :  { %v530_v30 = vmul.f32 %v523_v26, %v478_v53  ;;  %v531_v31 = vmul.f32 %v527_v27, %v479_v56  ;;  %v7055_v53 = vcombine.low %v1237_v48, %v1241_v49  ;;  %v1229_v56 = vld [vmem:[#allocation15 + $0x140] sm:$0xff]  ;;  %v7151_v26 = vcombine.low %v1333_v20, %v1337_v24 }
 0x288   :  { %v7048_v59 = vcombine.high %v1229_v56, %v1233_v57  ;;  %v7047_v61 = vcombine.low %v1229_v56, %v1233_v57  ;;  %v7152_v27 = vcombine.high %v1333_v20, %v1337_v24  ;;  %v1441_v48 = vld [vmem:[#allocation15 + $0x7e0] sm:$0xff] }
 0x289   :  { %v544_v32 = vadd.f32 %v540_v29, %v531_v31  ;;  %v543_v33 = vadd.f32 %v536_v28, %v530_v30  ;;  %v1197_v28 = vld [vmem:[#allocation15 + $0x40] sm:$0xff] }
 0x28a   :  { %v1201_v29 = vld [vmem:[#allocation15 + $0x60] sm:$0xff] }
 0x28b   :  { %vm546_vm2 = vcmp.gt.f32.partialorder %v544_v32, 0.0  ;;  %v548_v34 = vmul.f32 0.2, %v544_v32  ;;  %vm545_vm3 = vcmp.gt.f32.partialorder %v543_v33, 0.0  ;;  %v547_v35 = vmul.f32 0.2, %v543_v33 }
 0x28c   :  { %v1325_v30 = vld [vmem:[#allocation15 + $0x440] sm:$0xff]  ;;  %v7016_v31 = vcombine.high %v1197_v28, %v1201_v29 }
 0x28d   :  { %v550_v36 = vsel %vm546_vm2, %v544_v32, %v548_v34  ;;  %v549_v37 = vsel %vm545_vm3, %v543_v33, %v547_v35  ;;  %v1329_v32 = vld [vmem:[#allocation15 + $0x460] sm:$0xff]  ;;  %v7015_v33 = vcombine.low %v1197_v28, %v1201_v29 }
 0x28e   :  { %v552_v38 = vpack.c.bf16 %v550_v36, %v550_v36  ;;  %v551_v39 = vpack.c.bf16 %v549_v37, %v549_v37  ;;  %v7143_v34 = vcombine.low %v1325_v30, %v1329_v32  ;;  %v7144_v35 = vcombine.high %v1325_v30, %v1329_v32  ;;  %v1189_v36 = vld [vmem:[#allocation15] sm:$0xff] }
 0x28f   :  { %v1193_v37 = vld [vmem:[#allocation15 + $0x20] sm:$0xff] }
 0x290   :  { %969 = vmatprep.mubr.bf16.mxu0 %v552_v38  ;;  %1010 = vmatprep.mubr.bf16.mxu1 %v552_v38  ;;  %v1317_v38 = vld [vmem:[#allocation15 + $0x400] sm:$0xff]  ;;  %v7007_v41 = vcombine.low %v1189_v36, %v1193_v37 }
 0x291   :  { %970 = vmatmul.mubr.bf16.vlgmr.msra.gmra.mxu0 %v551_v39  ;;  %1011 = vmatmul.mubr.bf16.vlgmr.msra.gmra.mxu1 %v551_v39  ;;  %v7008_v39 = vcombine.high %v1189_v36, %v1193_v37  ;;  %v7135_v42 = vcombine.low %v1317_v38, %v1321_v40  ;;  %v7136_v43 = vcombine.high %v1317_v38, %v1321_v40  ;;  %v1433_v56 = vld [vmem:[#allocation15 + $0x7a0] sm:$0xff] }
 0x292   :  { %2726 = vmatpush1.bf16.msra.mxu0 %v7063_v45  ;;  %2767 = vmatpush1.bf16.msra.mxu1 %v7191_v46  ;;  %v1313_v45 = vld [vmem:[#allocation15 + $0x3e0] sm:$0xff] }
 0x293   :  { %2727 = vmatprep.subr.bf16.mxu0 %v7056_v51  ;;  %2768 = vmatprep.subr.bf16.mxu1 %v7184_v55  ;;  %v1437_v46 = vld [vmem:[#allocation15 + $0x7c0] sm:$0xff]  ;;  %v7128_v47 = vcombine.high %v1309_v44, %v1313_v45  ;;  %v7127_v49 = vcombine.low %v1309_v44, %v1313_v45 }
 0x294   :  { %v7255_v50 = vcombine.low %v1437_v46, %v1441_v48  ;;  %v7256_v51 = vcombine.high %v1437_v46, %v1441_v48  ;;  %v1269_v24 = vld [vmem:[#allocation15 + $0x280] sm:$0xff]  ;;  %v9100_v48 = vld [vmem:[#allocation15 + $0x1c8] sm:$0xff] }
 0x295   :  { %v1401_v28 = vld [vmem:[#allocation15 + $0x6a0] sm:$0xff] }
 0x296   :  { %2728 = vmatpush1.bf16.msra.mxu0 %v7055_v53  ;;  %2769 = vmatpush1.bf16.msra.mxu1 %v7183_v54  ;;  %v1305_v53 = vld [vmem:[#allocation15 + $0x3a0] sm:$0xff] }
 0x297   :  { %2729 = vmatprep.subr.bf16.mxu0 %v7048_v59  ;;  %2770 = vmatprep.subr.bf16.mxu1 %v7176_v63  ;;  %v1429_v54 = vld [vmem:[#allocation15 + $0x780] sm:$0xff]  ;;  %v7120_v55 = vcombine.high %v1301_v52, %v1305_v53  ;;  %v7119_v57 = vcombine.low %v1301_v52, %v1305_v53  ;;  %v9108_v52 = vld [vmem:[#allocation15 + $0x5e8] sm:$0xff] }
 0x298   :  { %v7247_v58 = vcombine.low %v1429_v54, %v1433_v56  ;;  %v7248_v59 = vcombine.high %v1429_v54, %v1433_v56  ;;  %v1261_v32 = vld [vmem:[#allocation15 + $0x240] sm:$0xff] }
 0x299   :  { %v1393_v36 = vld [vmem:[#allocation15 + $0x660] sm:$0xff] }
 0x29a   :  { %2730 = vmatpush1.bf16.msra.mxu0 %v7047_v61  ;;  %2771 = vmatpush1.bf16.msra.mxu1 %v7175_v62  ;;  %v1297_v61 = vld [vmem:[#allocation15 + $0x360] sm:$0xff] }
 0x29b   :  { %2731 = vmatprep.subr.bf16.mxu0 %v7040_v3  ;;  %2772 = vmatprep.subr.bf16.mxu1 %v7168_v7  ;;  %v1421_v62 = vld [vmem:[#allocation15 + $0x740] sm:$0xff]  ;;  %v7112_v63 = vcombine.high %v1293_v60, %v1297_v61  ;;  %v7111_v1 = vcombine.low %v1293_v60, %v1297_v61 }
 0x29c   :  { %v7239_v2 = vcombine.low %v1421_v62, %v1425_v0  ;;  %v7240_v3 = vcombine.high %v1421_v62, %v1425_v0  ;;  %v1253_v40 = vld [vmem:[#allocation15 + $0x200] sm:$0xff] }
 0x29d   :  { %v1385_v44 = vld [vmem:[#allocation15 + $0x620] sm:$0xff] }
 0x29e   :  { %2732 = vmatpush1.bf16.msra.mxu0 %v7039_v5  ;;  %2773 = vmatpush1.bf16.msra.mxu1 %v7167_v6  ;;  %v1289_v5 = vld [vmem:[#allocation15 + $0x320] sm:$0xff] }
 0x29f   :  { %2733 = vmatprep.subr.bf16.mxu0 %v7032_v11  ;;  %2774 = vmatprep.subr.bf16.mxu1 %v7160_v17  ;;  %v1413_v6 = vld [vmem:[#allocation15 + $0x700] sm:$0xff]  ;;  %v7104_v7 = vcombine.high %v1285_v4, %v1289_v5  ;;  %v7103_v9 = vcombine.low %v1285_v4, %v1289_v5 }
 0x2a0   :  { %v7231_v10 = vcombine.low %v1413_v6, %v1417_v8  ;;  %v7232_v11 = vcombine.high %v1413_v6, %v1417_v8 }
 0x2a2   :  { %2734 = vmatpush1.bf16.msra.mxu0 %v7031_v13  ;;  %2775 = vmatpush1.bf16.msra.mxu1 %v7159_v15  ;;  %v1281_v13 = vld [vmem:[#allocation15 + $0x2e0] sm:$0xff] }
 0x2a3   :  { %2735 = vmatprep.subr.bf16.mxu0 %v7024_v21  ;;  %2776 = vmatprep.subr.bf16.mxu1 %v7152_v27  ;;  %v1405_v15 = vld [vmem:[#allocation15 + $0x6c0] sm:$0xff]  ;;  %v7096_v17 = vcombine.high %v1277_v12, %v1281_v13  ;;  %v7095_v19 = vcombine.low %v1277_v12, %v1281_v13 }
 0x2a4   :  { %v7223_v20 = vcombine.low %v1405_v15, %v1409_v18  ;;  %v7224_v21 = vcombine.high %v1405_v15, %v1409_v18 }
 0x2a6   :  { %2736 = vmatpush1.bf16.msra.mxu0 %v7023_v25  ;;  %2777 = vmatpush1.bf16.msra.mxu1 %v7151_v26  ;;  %v1273_v25 = vld [vmem:[#allocation15 + $0x2a0] sm:$0xff] }
 0x2a7   :  { %2737 = vmatprep.subr.bf16.mxu0 %v7016_v31  ;;  %2778 = vmatprep.subr.bf16.mxu1 %v7144_v35  ;;  %v1397_v26 = vld [vmem:[#allocation15 + $0x680] sm:$0xff]  ;;  %v7088_v27 = vcombine.high %v1269_v24, %v1273_v25  ;;  %v7087_v29 = vcombine.low %v1269_v24, %v1273_v25 }
 0x2a8   :  { %v7215_v30 = vcombine.low %v1397_v26, %v1401_v28  ;;  %v7216_v31 = vcombine.high %v1397_v26, %v1401_v28 }
 0x2aa   :  { %2738 = vmatpush1.bf16.msra.mxu0 %v7015_v33  ;;  %2779 = vmatpush1.bf16.msra.mxu1 %v7143_v34  ;;  %v1265_v33 = vld [vmem:[#allocation15 + $0x260] sm:$0xff] }
 0x2ab   :  { %2739 = vmatprep.subr.bf16.mxu0 %v7008_v39  ;;  %2780 = vmatprep.subr.bf16.mxu1 %v7136_v43  ;;  %v1389_v34 = vld [vmem:[#allocation15 + $0x640] sm:$0xff]  ;;  %v7080_v35 = vcombine.high %v1261_v32, %v1265_v33  ;;  %v7079_v37 = vcombine.low %v1261_v32, %v1265_v33 }
 0x2ac   :  { %v7207_v38 = vcombine.low %v1389_v34, %v1393_v36  ;;  %v7208_v39 = vcombine.high %v1389_v34, %v1393_v36 }
 0x2ae   :  { %2740 = vmatpush1.bf16.msra.mxu0 %v7007_v41  ;;  %2781 = vmatpush1.bf16.msra.mxu1 %v7135_v42  ;;  %v1257_v41 = vld [vmem:[#allocation15 + $0x220] sm:$0xff] }
 0x2af   :  { %2741 = vmatprep.subr.bf16.mxu0 %v7128_v47  ;;  %2782 = vmatprep.subr.bf16.mxu1 %v7256_v51  ;;  %v1381_v42 = vld [vmem:[#allocation15 + $0x600] sm:$0xff]  ;;  %v7072_v43 = vcombine.high %v1253_v40, %v1257_v41  ;;  %v7071_v45 = vcombine.low %v1253_v40, %v1257_v41 }
 0x2b0   :  { %v7199_v46 = vcombine.low %v1381_v42, %v1385_v44  ;;  %v7200_v47 = vcombine.high %v1381_v42, %v1385_v44 }
 0x2b2   :  { %2742 = vmatpush2.bf16.msra.mxu0 %v7127_v49  ;;  %2783 = vmatpush2.bf16.msra.mxu1 %v7255_v50  ;;  %v9102_v49 = vld [vmem:[#allocation15 + $0x1e8] sm:$0xff] }
 0x2b3   :  { %2743 = vmatprep.subr.bf16.mxu0 %v7120_v55  ;;  %2784 = vmatprep.subr.bf16.mxu1 %v7248_v59  ;;  %v9104_v50 = vld [vmem:[#allocation15 + $0x5c8] sm:$0xff]  ;;  %v7066_v51 = vcombine.high %v9100_v48, %v9102_v49  ;;  %v7065_v53 = vcombine.low %v9100_v48, %v9102_v49 }
 0x2b4   :  { %v7193_v54 = vcombine.low %v9104_v50, %v9108_v52  ;;  %v7194_v55 = vcombine.high %v9104_v50, %v9108_v52 }
 0x2b6   :  { %2744 = vmatpush2.bf16.msra.mxu0 %v7119_v57  ;;  %2785 = vmatpush2.bf16.msra.mxu1 %v7247_v58 }
 0x2b7   :  { %2745 = vmatprep.subr.bf16.mxu0 %v7112_v63  ;;  %2786 = vmatprep.subr.bf16.mxu1 %v7240_v3 }
 0x2ba   :  { %2746 = vmatpush2.bf16.msra.mxu0 %v7111_v1  ;;  %2787 = vmatpush2.bf16.msra.mxu1 %v7239_v2 }
 0x2bb   :  { %2747 = vmatprep.subr.bf16.mxu0 %v7104_v7  ;;  %2788 = vmatprep.subr.bf16.mxu1 %v7232_v11 }
 0x2be   :  { %2748 = vmatpush2.bf16.msra.mxu0 %v7103_v9  ;;  %2789 = vmatpush2.bf16.msra.mxu1 %v7231_v10 }
 0x2bf   :  { %2749 = vmatprep.subr.bf16.mxu0 %v7096_v17  ;;  %2790 = vmatprep.subr.bf16.mxu1 %v7224_v21 }
 0x2c2   :  { %2750 = vmatpush2.bf16.msra.mxu0 %v7095_v19  ;;  %2791 = vmatpush2.bf16.msra.mxu1 %v7223_v20 }
 0x2c3   :  { %2751 = vmatprep.subr.bf16.mxu0 %v7088_v27  ;;  %2792 = vmatprep.subr.bf16.mxu1 %v7216_v31 }
 0x2c6   :  { %2752 = vmatpush2.bf16.msra.mxu0 %v7087_v29  ;;  %2793 = vmatpush2.bf16.msra.mxu1 %v7215_v30 }
 0x2c7   :  { %2753 = vmatprep.subr.bf16.mxu0 %v7080_v35  ;;  %2794 = vmatprep.subr.bf16.mxu1 %v7208_v39 }
 0x2ca   :  { %2754 = vmatpush2.bf16.msra.mxu0 %v7079_v37  ;;  %2795 = vmatpush2.bf16.msra.mxu1 %v7207_v38 }
 0x2cb   :  { %2755 = vmatprep.subr.bf16.mxu0 %v7072_v43  ;;  %2796 = vmatprep.subr.bf16.mxu1 %v7200_v47 }
 0x2ce   :  { %2756 = vmatpush2.bf16.msra.mxu0 %v7071_v45  ;;  %2797 = vmatpush2.bf16.msra.mxu1 %v7199_v46 }
 0x2cf   :  { %2807 = vmatprep.subr.bf16.mxu0 %v7066_v51  ;;  %2848 = vmatprep.subr.bf16.mxu1 %v7194_v55 }
 0x351   :  { %v971_v56 = vpop.f32.mrf.mxu0  ;;  %v1012_v57 = vpop.f32.mrf.mxu1 }
 0x352   :  { %v1021_v58 = vrot.slane %v971_v56, 4  ;;  %v1033_v59 = vrot.slane %v1012_v57, 4 }
 0x353   :  { %v973_v60 = vpop.f32.mrf.mxu0  ;;  %v1014_v61 = vpop.f32.mrf.mxu1 }
 0x354   :  { %v1022_v62 = vadd.f32 %v1021_v58, %v971_v56  ;;  %v1034_v63 = vadd.f32 %v1033_v59, %v1012_v57  ;;  %v1027_v0 = vrot.slane %v973_v60, 4  ;;  %v1039_v1 = vrot.slane %v1014_v61, 4 }
 0x355   :  { %v975_v2 = vpop.f32.mrf.mxu0  ;;  %v1016_v3 = vpop.f32.mrf.mxu1 }
 0x356   :  { %v1023_v4 = vrot.slane %v1022_v62, 2  ;;  %v1035_v5 = vrot.slane %v1034_v63, 2  ;;  %v1028_v6 = vadd.f32 %v1027_v0, %v973_v60  ;;  %v1040_v7 = vadd.f32 %v1039_v1, %v1014_v61 }
 0x357   :  { %v976_v8 = vpop.f32.mrf.mxu0  ;;  %v1017_v9 = vpop.f32.mrf.mxu1 }
 0x358   :  { %v1024_v10 = vadd.f32 %v1023_v4, %v1022_v62  ;;  %v1036_v11 = vadd.f32 %v1035_v5, %v1034_v63  ;;  %v1029_v12 = vrot.slane %v1028_v6, 2  ;;  %v1041_v13 = vrot.slane %v1040_v7, 2 }
 0x35a   :  { %v1025_v15 = vrot.slane %v1024_v10, 1  ;;  %v1037_v17 = vrot.slane %v1036_v11, 1  ;;  %v1030_v18 = vadd.f32 %v1029_v12, %v1028_v6  ;;  %v1042_v19 = vadd.f32 %v1041_v13, %v1040_v7 }
 0x35c   :  { %v1026_v20 = vadd.f32 %v1025_v15, %v1024_v10  ;;  %v1038_v21 = vadd.f32 %v1037_v17, %v1036_v11  ;;  %v1031_v24 = vrot.slane %v1030_v18, 1  ;;  %v1043_v25 = vrot.slane %v1042_v19, 1 }
 0x35e   :  { %v1045_v26 = vmul.f32 0.125, %v1026_v20  ;;  %v1047_v27 = vmul.f32 0.125, %v1038_v21  ;;  %v1032_v28 = vadd.f32 %v1031_v24, %v1030_v18  ;;  %v1044_v29 = vadd.f32 %v1043_v25, %v1042_v19 }
 0x360   :  { %v9116_v30 = vsub.f32 %v971_v56, %v1045_v26  ;;  %v9118_v31 = vsub.f32 %v1012_v57, %v1047_v27  ;;  %v1046_v32 = vmul.f32 0.125, %v1032_v28  ;;  %v1048_v33 = vmul.f32 0.125, %v1044_v29  ;;  %v1019_v27 = vld [vmem:[#allocation12] sm:$0xf]  ;;  %v1020_v28 = vld [vmem:[#allocation13] sm:$0xf] }
 0x362   :  { %v1053_v34 = vmul.f32 %v9116_v30, %v9116_v30  ;;  %v1055_v35 = vmul.f32 %v9118_v31, %v9118_v31  ;;  %v9124_v36 = vsub.f32 %v973_v60, %v1046_v32  ;;  %v1052_v37 = vsub.f32 %v1014_v61, %v1048_v33 }
 0x363   :  { %v9132_v32 = vsub.s32 3, %v9083_v14  ;;  %v9135_v33 = vsub.s32 2, %v9083_v14 }
 0x364   :  { %v1057_v38 = vrot.slane %v1053_v34, 4  ;;  %v1069_v39 = vrot.slane %v1055_v35, 4  ;;  %v1054_v40 = vmul.f32 %v9124_v36, %v9124_v36  ;;  %v1056_v41 = vmul.f32 %v1052_v37, %v1052_v37 }
 0x366   :  { %v1058_v42 = vadd.f32 %v1057_v38, %v1053_v34  ;;  %v1070_v43 = vadd.f32 %v1069_v39, %v1055_v35  ;;  %v1063_v44 = vrot.slane %v1054_v40, 4  ;;  %v1075_v45 = vrot.slane %v1056_v41, 4 }
 0x367   :  { %v1164_v35 = vrot.slane %v1020_v28, %v9132_v32  ;;  %v1156_v38 = vrot.slane %v1020_v28, %v9094_v23  ;;  %v1152_v39 = vrot.slane %v1020_v28, %v9091_v22 }
 0x368   :  { %v1059_v46 = vrot.slane %v1058_v42, 2  ;;  %v1071_v47 = vrot.slane %v1070_v43, 2  ;;  %v1064_v51 = vadd.f32 %v1063_v44, %v1054_v40  ;;  %v1076_v55 = vadd.f32 %v1075_v45, %v1056_v41 }
 0x369   :  { %v1160_v40 = vrot.slane %v1020_v28, %v9135_v33 }
 0x36a   :  { %v1060_v56 = vadd.f32 %v1059_v46, %v1058_v42  ;;  %v1072_v57 = vadd.f32 %v1071_v47, %v1070_v43  ;;  %v1065_v58 = vrot.slane %v1064_v51, 2  ;;  %v1077_v59 = vrot.slane %v1076_v55, 2 }
 0x36c   :  { %v1061_v60 = vrot.slane %v1060_v56, 1  ;;  %v1073_v61 = vrot.slane %v1072_v57, 1  ;;  %v1066_v62 = vadd.f32 %v1065_v58, %v1064_v51  ;;  %v1078_v63 = vadd.f32 %v1077_v59, %v1076_v55 }
 0x36e   :  { %v1062_v0 = vadd.f32 %v1061_v60, %v1060_v56  ;;  %v1074_v1 = vadd.f32 %v1073_v61, %v1072_v57  ;;  %v1067_v2 = vrot.slane %v1066_v62, 1  ;;  %v1079_v3 = vrot.slane %v1078_v63, 1  ;;  %v1238_v61 = vld [vmem:[#allocation15 + $0x188] sm:$0xff] }
 0x370   :  { %v1081_v4 = vmul.f32 0.125, %v1062_v0  ;;  %v1083_v5 = vmul.f32 0.125, %v1074_v1  ;;  %v1068_v6 = vadd.f32 %v1067_v2, %v1066_v62  ;;  %v1080_v7 = vadd.f32 %v1079_v3, %v1078_v63  ;;  %v1366_v1 = vld [vmem:[#allocation15 + $0x588] sm:$0xff] }
 0x372   :  { %v1085_v8 = vadd.f32 0.8, %v1081_v4  ;;  %v1087_v9 = vadd.f32 0.8, %v1083_v5  ;;  %v1082_v10 = vmul.f32 0.125, %v1068_v6  ;;  %v1084_v11 = vmul.f32 0.125, %v1080_v7 }
 0x373   :  { %v1230_v7 = vld [vmem:[#allocation15 + $0x148] sm:$0xff] }
 0x374   :  { %8627 = vrsqrt.f32 %v1085_v8  ;;  %v1086_v12 = vadd.f32 0.8, %v1082_v10  ;;  %v1088_v13 = vadd.f32 0.8, %v1084_v11  ;;  %v1234_v10 = vld [vmem:[#allocation15 + $0x168] sm:$0xff] }
 0x375   :  { %8629 = vrsqrt.f32 %v1087_v9  ;;  %v1358_v11 = vld [vmem:[#allocation15 + $0x548] sm:$0xff]  ;;  %v7049_v48 = vcombine.low %v1230_v7, %v1234_v10 }
 0x376   :  { %8631 = vrsqrt.f32 %v1086_v12  ;;  %v1362_v12 = vld [vmem:[#allocation15 + $0x568] sm:$0xff] }
 0x377   :  { %8633 = vrsqrt.f32 %v1088_v13  ;;  %v7177_v49 = vcombine.low %v1358_v11, %v1362_v12 }
 0x381   :  { %v8628_v15 = vpop.eup %8627 }
 0x382   :  { %v8630_v17 = vpop.eup %8629 }
 0x383   :  { %v8632_v18 = vpop.eup %8631 }
 0x384   :  { %v8634_v19 = vpop.eup %8633  ;;  %v1097_v20 = vcombine.low %v8628_v15, %v8632_v18  ;;  %v7178_v18 = vcombine.high %v1358_v11, %v1362_v12  ;;  %v1302_v11 = vld [vmem:[#allocation15 + $0x388] sm:$0xff] }
 0x385   :  { %v1098_v21 = vcombine.low %v8630_v17, %v8634_v19  ;;  %v7050_v17 = vcombine.high %v1230_v7, %v1234_v10  ;;  %v1222_v19 = vld [vmem:[#allocation15 + $0x108] sm:$0xff] }
 0x386   :  { %v1105_v24 = vrot.slane %v1097_v20, %v9086_v16  ;;  %v1226_v20 = vld [vmem:[#allocation15 + $0x128] sm:$0xff] }
 0x387   :  { %v1112_v25 = vrot.slane %v1098_v21, %v9086_v16  ;;  %v1350_v21 = vld [vmem:[#allocation15 + $0x508] sm:$0xff]  ;;  %v7042_v50 = vcombine.high %v1222_v19, %v1226_v20 }
 0x388   :  { %v1306_v12 = vld [vmem:[#allocation15 + $0x3a8] sm:$0xff] }
 0x389   :  { %v1113_v26 = vcombine.low %v1105_v24, %v1112_v25  ;;  %v1354_v24 = vld [vmem:[#allocation15 + $0x528] sm:$0xff] }
 0x38a   :  { %v7170_v52 = vcombine.high %v1350_v21, %v1354_v24  ;;  %v1342_v25 = vld [vmem:[#allocation15 + $0x4c8] sm:$0xff]  ;;  %v7169_v28 = vcombine.low %v1350_v21, %v1354_v24 }
 0x38b   :  { %v1120_v29 = vrot.slane %v1113_v26, %v9086_v16  ;;  %v1346_v26 = vld [vmem:[#allocation15 + $0x4e8] sm:$0xff] }
 0x38c   :  { %v1294_v21 = vld [vmem:[#allocation15 + $0x348] sm:$0xff] }
 0x38d   :  { %v1122_v34 = vmul.f32 %v1120_v29, %v1019_v27  ;;  %v7041_v27 = vcombine.low %v1222_v19, %v1226_v20  ;;  %v7122_v19 = vcombine.high %v1302_v11, %v1306_v12  ;;  %v1298_v24 = vld [vmem:[#allocation15 + $0x368] sm:$0xff] }
 0x38f   :  { %v1139_v41 = vrot.slane %v1122_v34, %v9132_v32  ;;  %v1131_v42 = vrot.slane %v1122_v34, %v9094_v23  ;;  %v1127_v43 = vrot.slane %v1122_v34, %v9091_v22  ;;  %v1135_v44 = vrot.slane %v1122_v34, %v9135_v33 }
 0x390   :  { %v7162_v34 = vcombine.high %v1342_v25, %v1346_v26 }
 0x391   :  { %v1147_v45 = vmul.f32 %v1139_v41, %v1052_v37  ;;  %v1145_v46 = vmul.f32 %v1131_v42, %v9124_v36  ;;  %v1144_v47 = vmul.f32 %v1127_v43, %v9116_v30  ;;  %v1146_v51 = vmul.f32 %v1135_v44, %v9118_v31  ;;  %v1242_v36 = vld [vmem:[#allocation15 + $0x1a8] sm:$0xff] }
 0x392   :  { %v1370_v30 = vld [vmem:[#allocation15 + $0x5a8] sm:$0xff]  ;;  %v7058_v8 = vcombine.high %v1238_v61, %v1242_v36  ;;  %v7057_v13 = vcombine.low %v1238_v61, %v1242_v36  ;;  %v7161_v42 = vcombine.low %v1342_v25, %v1346_v26 }
 0x393   :  { %v1172_v55 = vadd.f32 %v1164_v35, %v1147_v45  ;;  %v1170_v56 = vadd.f32 %v1156_v38, %v1145_v46  ;;  %v1169_v57 = vadd.f32 %v1152_v39, %v1144_v47  ;;  %v1171_v58 = vadd.f32 %v1160_v40, %v1146_v51  ;;  %v1206_v35 = vld [vmem:[#allocation15 + $0x88] sm:$0xff] }
 0x394   :  { %v7186_v9 = vcombine.high %v1366_v1, %v1370_v30  ;;  %v7185_v15 = vcombine.low %v1366_v1, %v1370_v30  ;;  %v1210_v38 = vld [vmem:[#allocation15 + $0xa8] sm:$0xff] }
 0x395   :  { %v1180_v59 = vmul.f32 0.2, %v1172_v55  ;;  %vm1174_vm4 = vcmp.gt.f32.partialorder %v1170_v56, 0.0  ;;  %v1178_v60 = vmul.f32 0.2, %v1170_v56  ;;  %vm1176_vm5 = vcmp.gt.f32.partialorder %v1172_v55, 0.0 }
 0x396   :  { %vm1173_vm6 = vcmp.gt.f32.partialorder %v1169_v57, 0.0  ;;  %v1177_v62 = vmul.f32 0.2, %v1169_v57  ;;  %vm1175_vm7 = vcmp.gt.f32.partialorder %v1171_v58, 0.0  ;;  %v1179_v63 = vmul.f32 0.2, %v1171_v58 }
 0x397   :  { %v1182_v37 = vsel %vm1174_vm4, %v1170_v56, %v1178_v60  ;;  %v1184_v0 = vsel %vm1176_vm5, %v1172_v55, %v1180_v59  ;;  %v1334_v39 = vld [vmem:[#allocation15 + $0x488] sm:$0xff]  ;;  %v7026_v43 = vcombine.high %v1206_v35, %v1210_v38  ;;  %v7025_v55 = vcombine.low %v1206_v35, %v1210_v38 }
 0x398   :  { %v9148_v2 = vpack.c.bf16 %v1182_v37, %v1182_v37  ;;  %v9150_v31 = vpack.c.bf16 %v1184_v0, %v1184_v0  ;;  %v1181_v3 = vsel %vm1173_vm6, %v1169_v57, %v1177_v62  ;;  %v1183_v4 = vsel %vm1175_vm7, %v1171_v58, %v1179_v63  ;;  %v1338_v40 = vld [vmem:[#allocation15 + $0x4a8] sm:$0xff] }
 0x399   :  { %v9152_v5 = vpack.c.bf16 %v1181_v3, %v1181_v3  ;;  %v9154_v6 = vpack.c.bf16 %v1183_v4, %v1183_v4  ;;  %v7154_v44 = vcombine.high %v1334_v39, %v1338_v40  ;;  %v1198_v45 = vld [vmem:[#allocation15 + $0x48] sm:$0xff]  ;;  %v7153_v56 = vcombine.low %v1334_v39, %v1338_v40 }
 0x39a   :  { %2757 = vmatprep.mubr.bf16.mxu0 %v9148_v2  ;;  %2798 = vmatprep.mubr.bf16.mxu1 %v9150_v31  ;;  %v1202_v46 = vld [vmem:[#allocation15 + $0x68] sm:$0xff] }
 0x39b   :  { %2758 = vmatmul.mubr.bf16.vlgmr.msra.gmra.mxu0 %v9152_v5  ;;  %2799 = vmatmul.mubr.bf16.vlgmr.msra.gmra.mxu1 %v9154_v6  ;;  %v1326_v47 = vld [vmem:[#allocation15 + $0x448] sm:$0xff]  ;;  %v7018_v57 = vcombine.high %v1198_v45, %v1202_v46  ;;  %v7017_v63 = vcombine.low %v1198_v45, %v1202_v46 }
 0x39c   :  { %2808 = vmatpush1.bf16.msra.mxu0 %v7065_v53  ;;  %2849 = vmatpush1.bf16.msra.mxu1 %v7193_v54  ;;  %v1214_v53 = vld [vmem:[#allocation15 + $0xc8] sm:$0xff] }
 0x39d   :  { %2839 = vmatprep.mubr.bf16.mxu0 %v9148_v2  ;;  %2880 = vmatprep.mubr.bf16.mxu1 %v9150_v31  ;;  %v1218_v54 = vld [vmem:[#allocation15 + $0xe8] sm:$0xff] }
 0x39e   :  { %2809 = vmatprep.subr.bf16.mxu0 %v7058_v8  ;;  %2850 = vmatprep.subr.bf16.mxu1 %v7186_v9  ;;  %v7034_v29 = vcombine.high %v1214_v53, %v1218_v54  ;;  %v7033_v41 = vcombine.low %v1214_v53, %v1218_v54  ;;  %v1330_v51 = vld [vmem:[#allocation15 + $0x468] sm:$0xff]  ;;  %v7114_v53 = vcombine.high %v1294_v21, %v1298_v24 }
 0x39f   :  { %v7146_v58 = vcombine.high %v1326_v47, %v1330_v51  ;;  %v1190_v59 = vld [vmem:[#allocation15 + $0x8] sm:$0xff]  ;;  %v7145_v37 = vcombine.low %v1326_v47, %v1330_v51 }
 0x3a0   :  { %2810 = vmatpush1.bf16.msra.mxu0 %v7057_v13  ;;  %2851 = vmatpush1.bf16.msra.mxu1 %v7185_v15  ;;  %v1194_v60 = vld [vmem:[#allocation15 + $0x28] sm:$0xff] }
 0x3a1   :  { %2811 = vmatprep.subr.bf16.mxu0 %v7050_v17  ;;  %2852 = vmatprep.subr.bf16.mxu1 %v7178_v18  ;;  %v1318_v61 = vld [vmem:[#allocation15 + $0x408] sm:$0xff]  ;;  %v7010_v0 = vcombine.high %v1190_v59, %v1194_v60  ;;  %v7009_v7 = vcombine.low %v1190_v59, %v1194_v60 }
 0x3a2   :  { %v1322_v62 = vld [vmem:[#allocation15 + $0x428] sm:$0xff] }
 0x3a3   :  { %v7138_v36 = vcombine.high %v1318_v61, %v1322_v62  ;;  %v1310_v1 = vld [vmem:[#allocation15 + $0x3c8] sm:$0xff]  ;;  %v7137_v8 = vcombine.low %v1318_v61, %v1322_v62 }
 0x3a4   :  { %2812 = vmatpush1.bf16.msra.mxu0 %v7049_v48  ;;  %2853 = vmatpush1.bf16.msra.mxu1 %v7177_v49  ;;  %v1314_v30 = vld [vmem:[#allocation15 + $0x3e8] sm:$0xff] }
 0x3a5   :  { %2813 = vmatprep.subr.bf16.mxu0 %v7042_v50  ;;  %2854 = vmatprep.subr.bf16.mxu1 %v7170_v52  ;;  %v1438_v3 = vld [vmem:[#allocation15 + $0x7c8] sm:$0xff]  ;;  %v7130_v9 = vcombine.high %v1310_v1, %v1314_v30  ;;  %v7129_v17 = vcombine.low %v1310_v1, %v1314_v30  ;;  %v7121_v50 = vcombine.low %v1302_v11, %v1306_v12 }
 0x3a6   :  { %v1442_v4 = vld [vmem:[#allocation15 + $0x7e8] sm:$0xff] }
 0x3a7   :  { %v7258_v10 = vcombine.high %v1438_v3, %v1442_v4  ;;  %v1430_v13 = vld [vmem:[#allocation15 + $0x788] sm:$0xff]  ;;  %v7257_v18 = vcombine.low %v1438_v3, %v1442_v4 }
 0x3a8   :  { %2814 = vmatpush1.bf16.msra.mxu0 %v7041_v27  ;;  %2855 = vmatpush1.bf16.msra.mxu1 %v7169_v28  ;;  %v1434_v15 = vld [vmem:[#allocation15 + $0x7a8] sm:$0xff] }
 0x3a9   :  { %2815 = vmatprep.subr.bf16.mxu0 %v7034_v29  ;;  %2856 = vmatprep.subr.bf16.mxu1 %v7162_v34  ;;  %v7250_v20 = vcombine.high %v1430_v13, %v1434_v15  ;;  %v1422_v48 = vld [vmem:[#allocation15 + $0x748] sm:$0xff]  ;;  %v7249_v52 = vcombine.low %v1430_v13, %v1434_v15  ;;  %v7113_v29 = vcombine.low %v1294_v21, %v1298_v24  ;;  %v1247_v13 = vld [vmem:[#allocation15 + $0x1d0] sm:$0xff] }
 0x3aa   :  { %v1426_v49 = vld [vmem:[#allocation15 + $0x768] sm:$0xff]  ;;  %v1251_v15 = vld [vmem:[#allocation15 + $0x1f0] sm:$0xff] }
 0x3ab   :  { %v7242_v54 = vcombine.high %v1422_v48, %v1426_v49  ;;  %v1286_v25 = vld [vmem:[#allocation15 + $0x308] sm:$0xff]  ;;  %v7241_v34 = vcombine.low %v1422_v48, %v1426_v49  ;;  %v7068_v21 = vcombine.high %v1247_v13, %v1251_v15  ;;  %v1239_v48 = vld [vmem:[#allocation15 + $0x190] sm:$0xff] }
 0x3ac   :  { %2816 = vmatpush1.bf16.msra.mxu0 %v7033_v41  ;;  %2857 = vmatpush1.bf16.msra.mxu1 %v7161_v42  ;;  %v1290_v26 = vld [vmem:[#allocation15 + $0x328] sm:$0xff]  ;;  %v1243_v49 = vld [vmem:[#allocation15 + $0x1b0] sm:$0xff] }
 0x3ad   :  { %2817 = vmatprep.subr.bf16.mxu0 %v7026_v43  ;;  %2858 = vmatprep.subr.bf16.mxu1 %v7154_v44  ;;  %v1414_v27 = vld [vmem:[#allocation15 + $0x708] sm:$0xff]  ;;  %v7106_v35 = vcombine.high %v1286_v25, %v1290_v26  ;;  %v7105_v43 = vcombine.low %v1286_v25, %v1290_v26  ;;  %v7060_v25 = vcombine.high %v1239_v48, %v1243_v49 }
 0x3ae   :  { %v1418_v28 = vld [vmem:[#allocation15 + $0x728] sm:$0xff] }
 0x3af   :  { %v7234_v38 = vcombine.high %v1414_v27, %v1418_v28  ;;  %v1278_v39 = vld [vmem:[#allocation15 + $0x2c8] sm:$0xff]  ;;  %v7233_v44 = vcombine.low %v1414_v27, %v1418_v28  ;;  %v1231_v27 = vld [vmem:[#allocation15 + $0x150] sm:$0xff] }
 0x3b0   :  { %2818 = vmatpush1.bf16.msra.mxu0 %v7025_v55  ;;  %2859 = vmatpush1.bf16.msra.mxu1 %v7153_v56  ;;  %v1282_v40 = vld [vmem:[#allocation15 + $0x2e8] sm:$0xff]  ;;  %v1235_v28 = vld [vmem:[#allocation15 + $0x170] sm:$0xff] }
 0x3b1   :  { %2819 = vmatprep.subr.bf16.mxu0 %v7018_v57  ;;  %2860 = vmatprep.subr.bf16.mxu1 %v7146_v58  ;;  %v1406_v41 = vld [vmem:[#allocation15 + $0x6c8] sm:$0xff]  ;;  %v7098_v45 = vcombine.high %v1278_v39, %v1282_v40  ;;  %v7097_v57 = vcombine.low %v1278_v39, %v1282_v40  ;;  %v7052_v39 = vcombine.high %v1231_v27, %v1235_v28 }
 0x3b2   :  { %v1410_v42 = vld [vmem:[#allocation15 + $0x6e8] sm:$0xff] }
 0x3b3   :  { %v7226_v46 = vcombine.high %v1406_v41, %v1410_v42  ;;  %v1270_v47 = vld [vmem:[#allocation15 + $0x288] sm:$0xff]  ;;  %v7225_v58 = vcombine.low %v1406_v41, %v1410_v42  ;;  %v1223_v41 = vld [vmem:[#allocation15 + $0x110] sm:$0xff] }
 0x3b4   :  { %2820 = vmatpush1.bf16.msra.mxu0 %v7017_v63  ;;  %2861 = vmatpush1.bf16.msra.mxu1 %v7145_v37  ;;  %v1274_v51 = vld [vmem:[#allocation15 + $0x2a8] sm:$0xff]  ;;  %v1227_v42 = vld [vmem:[#allocation15 + $0x130] sm:$0xff] }
 0x3b5   :  { %2821 = vmatprep.subr.bf16.mxu0 %v7010_v0  ;;  %2862 = vmatprep.subr.bf16.mxu1 %v7138_v36  ;;  %v1398_v55 = vld [vmem:[#allocation15 + $0x688] sm:$0xff]  ;;  %v7090_v59 = vcombine.high %v1270_v47, %v1274_v51  ;;  %v7089_v0 = vcombine.low %v1270_v47, %v1274_v51  ;;  %v7044_v47 = vcombine.high %v1223_v41, %v1227_v42 }
 0x3b6   :  { %v1402_v56 = vld [vmem:[#allocation15 + $0x6a8] sm:$0xff] }
 0x3b7   :  { %v7218_v60 = vcombine.high %v1398_v55, %v1402_v56  ;;  %v1262_v61 = vld [vmem:[#allocation15 + $0x248] sm:$0xff]  ;;  %v7217_v36 = vcombine.low %v1398_v55, %v1402_v56  ;;  %v1215_v55 = vld [vmem:[#allocation15 + $0xd0] sm:$0xff] }
 0x3b8   :  { %2822 = vmatpush1.bf16.msra.mxu0 %v7009_v7  ;;  %2863 = vmatpush1.bf16.msra.mxu1 %v7137_v8  ;;  %v1266_v62 = vld [vmem:[#allocation15 + $0x268] sm:$0xff]  ;;  %v1219_v56 = vld [vmem:[#allocation15 + $0xf0] sm:$0xff] }
 0x3b9   :  { %2823 = vmatprep.subr.bf16.mxu0 %v7130_v9  ;;  %2864 = vmatprep.subr.bf16.mxu1 %v7258_v10  ;;  %v1390_v63 = vld [vmem:[#allocation15 + $0x648] sm:$0xff]  ;;  %v7082_v1 = vcombine.high %v1262_v61, %v1266_v62  ;;  %v7081_v9 = vcombine.low %v1262_v61, %v1266_v62  ;;  %v7036_v61 = vcombine.high %v1215_v55, %v1219_v56 }
 0x3ba   :  { %v1394_v37 = vld [vmem:[#allocation15 + $0x668] sm:$0xff] }
 0x3bb   :  { %v7210_v30 = vcombine.high %v1390_v63, %v1394_v37  ;;  %v1254_v3 = vld [vmem:[#allocation15 + $0x208] sm:$0xff]  ;;  %v7209_v10 = vcombine.low %v1390_v63, %v1394_v37  ;;  %v1207_v63 = vld [vmem:[#allocation15 + $0x90] sm:$0xff] }
 0x3bc   :  { %2824 = vmatpush2.bf16.msra.mxu0 %v7129_v17  ;;  %2865 = vmatpush2.bf16.msra.mxu1 %v7257_v18  ;;  %v1258_v4 = vld [vmem:[#allocation15 + $0x228] sm:$0xff]  ;;  %v1375_v17 = vld [vmem:[#allocation15 + $0x5d0] sm:$0xff] }
 0x3bd   :  { %2825 = vmatprep.subr.bf16.mxu0 %v7122_v19  ;;  %2866 = vmatprep.subr.bf16.mxu1 %v7250_v20  ;;  %v1382_v7 = vld [vmem:[#allocation15 + $0x608] sm:$0xff]  ;;  %v7074_v11 = vcombine.high %v1254_v3, %v1258_v4  ;;  %v1379_v18 = vld [vmem:[#allocation15 + $0x5f0] sm:$0xff]  ;;  %v7073_v19 = vcombine.low %v1254_v3, %v1258_v4 }
 0x3be   :  { %v1386_v8 = vld [vmem:[#allocation15 + $0x628] sm:$0xff]  ;;  %v7196_v24 = vcombine.high %v1375_v17, %v1379_v18  ;;  %v1211_v37 = vld [vmem:[#allocation15 + $0xb0] sm:$0xff] }
 0x3bf   :  { %v7202_v12 = vcombine.high %v1382_v7, %v1386_v8  ;;  %v7201_v20 = vcombine.low %v1382_v7, %v1386_v8  ;;  %v7028_v3 = vcombine.high %v1207_v63, %v1211_v37  ;;  %v1199_v7 = vld [vmem:[#allocation15 + $0x50] sm:$0xff] }
 0x3c0   :  { %2826 = vmatpush2.bf16.msra.mxu0 %v7121_v50  ;;  %2867 = vmatpush2.bf16.msra.mxu1 %v7249_v52  ;;  %v1367_v50 = vld [vmem:[#allocation15 + $0x590] sm:$0xff] }
 0x3c1   :  { %2827 = vmatprep.subr.bf16.mxu0 %v7114_v53  ;;  %2868 = vmatprep.subr.bf16.mxu1 %v7242_v54  ;;  %v1371_v52 = vld [vmem:[#allocation15 + $0x5b0] sm:$0xff]  ;;  %v7067_v53 = vcombine.low %v1247_v13, %v1251_v15  ;;  %v7195_v54 = vcombine.low %v1375_v17, %v1379_v18 }
 0x3c2   :  { %v7188_v26 = vcombine.high %v1367_v50, %v1371_v52  ;;  %v1203_v8 = vld [vmem:[#allocation15 + $0x70] sm:$0xff] }
 0x3c3   :  { %v7020_v13 = vcombine.high %v1199_v7, %v1203_v8  ;;  %v1191_v17 = vld [vmem:[#allocation15 + $0x10] sm:$0xff] }
 0x3c4   :  { %2828 = vmatpush2.bf16.msra.mxu0 %v7113_v29  ;;  %2869 = vmatpush2.bf16.msra.mxu1 %v7241_v34  ;;  %v1359_v29 = vld [vmem:[#allocation15 + $0x550] sm:$0xff] }
 0x3c5   :  { %2829 = vmatprep.subr.bf16.mxu0 %v7106_v35  ;;  %2870 = vmatprep.subr.bf16.mxu1 %v7234_v38  ;;  %v1363_v34 = vld [vmem:[#allocation15 + $0x570] sm:$0xff]  ;;  %v7059_v35 = vcombine.low %v1239_v48, %v1243_v49  ;;  %v7187_v38 = vcombine.low %v1367_v50, %v1371_v52 }
 0x3c6   :  { %v7180_v40 = vcombine.high %v1359_v29, %v1363_v34  ;;  %v1195_v18 = vld [vmem:[#allocation15 + $0x30] sm:$0xff] }
 0x3c7   :  { %v7012_v48 = vcombine.high %v1191_v17, %v1195_v18  ;;  %v1311_v50 = vld [vmem:[#allocation15 + $0x3d0] sm:$0xff] }
 0x3c8   :  { %2830 = vmatpush2.bf16.msra.mxu0 %v7105_v43  ;;  %2871 = vmatpush2.bf16.msra.mxu1 %v7233_v44  ;;  %v1351_v43 = vld [vmem:[#allocation15 + $0x510] sm:$0xff] }
 0x3c9   :  { %2831 = vmatprep.subr.bf16.mxu0 %v7098_v45  ;;  %2872 = vmatprep.subr.bf16.mxu1 %v7226_v46  ;;  %v1355_v44 = vld [vmem:[#allocation15 + $0x530] sm:$0xff]  ;;  %v7051_v45 = vcombine.low %v1231_v27, %v1235_v28  ;;  %v7179_v46 = vcombine.low %v1359_v29, %v1363_v34 }
 0x3ca   :  { %v7172_v51 = vcombine.high %v1351_v43, %v1355_v44  ;;  %v1315_v52 = vld [vmem:[#allocation15 + $0x3f0] sm:$0xff] }
 0x3cb   :  { %v7132_v27 = vcombine.high %v1311_v50, %v1315_v52  ;;  %v1303_v29 = vld [vmem:[#allocation15 + $0x390] sm:$0xff] }
 0x3cc   :  { %2832 = vmatpush2.bf16.msra.mxu0 %v7097_v57  ;;  %2873 = vmatpush2.bf16.msra.mxu1 %v7225_v58  ;;  %v1343_v57 = vld [vmem:[#allocation15 + $0x4d0] sm:$0xff] }
 0x3cd   :  { %2833 = vmatprep.subr.bf16.mxu0 %v7090_v59  ;;  %2874 = vmatprep.subr.bf16.mxu1 %v7218_v60  ;;  %v1347_v58 = vld [vmem:[#allocation15 + $0x4f0] sm:$0xff]  ;;  %v7043_v59 = vcombine.low %v1223_v41, %v1227_v42  ;;  %v7171_v60 = vcombine.low %v1351_v43, %v1355_v44 }
 0x3ce   :  { %v7164_v62 = vcombine.high %v1343_v57, %v1347_v58  ;;  %v1307_v34 = vld [vmem:[#allocation15 + $0x3b0] sm:$0xff] }
 0x3cf   :  { %v7124_v41 = vcombine.high %v1303_v29, %v1307_v34  ;;  %v1295_v43 = vld [vmem:[#allocation15 + $0x350] sm:$0xff] }
 0x3d0   :  { %2834 = vmatpush2.bf16.msra.mxu0 %v7089_v0  ;;  %2875 = vmatpush2.bf16.msra.mxu1 %v7217_v36  ;;  %v1335_v0 = vld [vmem:[#allocation15 + $0x490] sm:$0xff] }
 0x3d1   :  { %2835 = vmatprep.subr.bf16.mxu0 %v7082_v1  ;;  %2876 = vmatprep.subr.bf16.mxu1 %v7210_v30  ;;  %v1339_v36 = vld [vmem:[#allocation15 + $0x4b0] sm:$0xff]  ;;  %v7035_v1 = vcombine.low %v1215_v55, %v1219_v56  ;;  %v7163_v30 = vcombine.low %v1343_v57, %v1347_v58 }
 0x3d2   :  { %v7156_v4 = vcombine.high %v1335_v0, %v1339_v36  ;;  %v1299_v44 = vld [vmem:[#allocation15 + $0x370] sm:$0xff] }
 0x3d3   :  { %v7116_v55 = vcombine.high %v1295_v43, %v1299_v44  ;;  %v1287_v57 = vld [vmem:[#allocation15 + $0x310] sm:$0xff] }
 0x3d4   :  { %2836 = vmatpush2.bf16.msra.mxu0 %v7081_v9  ;;  %2877 = vmatpush2.bf16.msra.mxu1 %v7209_v10  ;;  %v1327_v9 = vld [vmem:[#allocation15 + $0x450] sm:$0xff] }
 0x3d5   :  { %2837 = vmatprep.subr.bf16.mxu0 %v7074_v11  ;;  %2878 = vmatprep.subr.bf16.mxu1 %v7202_v12  ;;  %v1331_v10 = vld [vmem:[#allocation15 + $0x470] sm:$0xff]  ;;  %v7027_v11 = vcombine.low %v1207_v63, %v1211_v37  ;;  %v7155_v12 = vcombine.low %v1335_v0, %v1339_v36 }
 0x3d6   :  { %v7148_v15 = vcombine.high %v1327_v9, %v1331_v10  ;;  %v1291_v58 = vld [vmem:[#allocation15 + $0x330] sm:$0xff] }
 0x3d7   :  { %v7108_v63 = vcombine.high %v1287_v57, %v1291_v58  ;;  %v1279_v0 = vld [vmem:[#allocation15 + $0x2d0] sm:$0xff] }
 0x3d8   :  { %2838 = vmatpush2.bf16.msra.mxu0 %v7073_v19  ;;  %2879 = vmatpush2.bf16.msra.mxu1 %v7201_v20  ;;  %v1319_v19 = vld [vmem:[#allocation15 + $0x410] sm:$0xff] }
 0x3d9   :  { %2889 = vmatprep.subr.bf16.mxu0 %v7068_v21  ;;  %2930 = vmatprep.subr.bf16.mxu1 %v7196_v24  ;;  %v1323_v20 = vld [vmem:[#allocation15 + $0x430] sm:$0xff]  ;;  %v7019_v21 = vcombine.low %v1199_v7, %v1203_v8  ;;  %v7147_v24 = vcombine.low %v1327_v9, %v1331_v10 }
 0x3da   :  { %v7140_v49 = vcombine.high %v1319_v19, %v1323_v20  ;;  %v1283_v36 = vld [vmem:[#allocation15 + $0x2f0] sm:$0xff] }
 0x3db   :  { %2840 = vmatmul.mubr.bf16.vlgmr.msra.gmra.mxu0 %v9152_v5  ;;  %2881 = vmatmul.mubr.bf16.vlgmr.msra.gmra.mxu1 %v9154_v6  ;;  %v7100_v7 = vcombine.high %v1279_v0, %v1283_v36  ;;  %v1271_v9 = vld [vmem:[#allocation15 + $0x290] sm:$0xff] }
 0x3dc   :  { %2890 = vmatpush1.bf16.msra.mxu0 %v7067_v53  ;;  %2921 = vmatprep.mubr.bf16.mxu0 %v9148_v2  ;;  %v1439_v53 = vld [vmem:[#allocation15 + $0x7d0] sm:$0xff] }
 0x3dd   :  { %2931 = vmatpush1.bf16.msra.mxu1 %v7195_v54  ;;  %2962 = vmatprep.mubr.bf16.mxu1 %v9150_v31  ;;  %v1443_v54 = vld [vmem:[#allocation15 + $0x7f0] sm:$0xff] }
 0x3de   :  { %2891 = vmatprep.subr.bf16.mxu0 %v7060_v25  ;;  %2932 = vmatprep.subr.bf16.mxu1 %v7188_v26  ;;  %v7011_v25 = vcombine.low %v1191_v17, %v1195_v18  ;;  %v7139_v26 = vcombine.low %v1319_v19, %v1323_v20  ;;  %v7260_v28 = vcombine.high %v1439_v53, %v1443_v54  ;;  %v1275_v10 = vld [vmem:[#allocation15 + $0x2b0] sm:$0xff] }
 0x3df   :  { %v7092_v17 = vcombine.high %v1271_v9, %v1275_v10  ;;  %v1263_v19 = vld [vmem:[#allocation15 + $0x250] sm:$0xff] }
 0x3e0   :  { %2892 = vmatpush1.bf16.msra.mxu0 %v7059_v35  ;;  %v1431_v35 = vld [vmem:[#allocation15 + $0x790] sm:$0xff] }
 0x3e1   :  { %2933 = vmatpush1.bf16.msra.mxu1 %v7187_v38  ;;  %2893 = vmatprep.subr.bf16.mxu0 %v7052_v39  ;;  %v1435_v38 = vld [vmem:[#allocation15 + $0x7b0] sm:$0xff]  ;;  %v7131_v39 = vcombine.low %v1311_v50, %v1315_v52 }
 0x3e2   :  { %2934 = vmatprep.subr.bf16.mxu1 %v7180_v40  ;;  %v7259_v40 = vcombine.low %v1439_v53, %v1443_v54  ;;  %v7252_v42 = vcombine.high %v1431_v35, %v1435_v38  ;;  %v1267_v20 = vld [vmem:[#allocation15 + $0x270] sm:$0xff] }
 0x3e3   :  { %v7084_v50 = vcombine.high %v1263_v19, %v1267_v20  ;;  %v1255_v53 = vld [vmem:[#allocation15 + $0x210] sm:$0xff] }
 0x3e4   :  { %2894 = vmatpush1.bf16.msra.mxu0 %v7051_v45  ;;  %v1423_v45 = vld [vmem:[#allocation15 + $0x750] sm:$0xff] }
 0x3e5   :  { %2935 = vmatpush1.bf16.msra.mxu1 %v7179_v46  ;;  %2895 = vmatprep.subr.bf16.mxu0 %v7044_v47  ;;  %v1427_v46 = vld [vmem:[#allocation15 + $0x770] sm:$0xff]  ;;  %v7123_v47 = vcombine.low %v1303_v29, %v1307_v34 }
 0x3e6   :  { %2936 = vmatprep.subr.bf16.mxu1 %v7172_v51  ;;  %v7251_v51 = vcombine.low %v1431_v35, %v1435_v38  ;;  %v7244_v56 = vcombine.high %v1423_v45, %v1427_v46  ;;  %v1259_v54 = vld [vmem:[#allocation15 + $0x230] sm:$0xff]  ;;  %v1248_v35 = vld [vmem:[#allocation15 + $0x1d8] sm:$0xff] }
 0x3e7   :  { %v7076_v29 = vcombine.high %v1255_v53, %v1259_v54  ;;  %v1252_v38 = vld [vmem:[#allocation15 + $0x1f8] sm:$0xff] }
 0x3e8   :  { %2896 = vmatpush1.bf16.msra.mxu0 %v7043_v59  ;;  %v1415_v59 = vld [vmem:[#allocation15 + $0x710] sm:$0xff] }
 0x3e9   :  { %2937 = vmatpush1.bf16.msra.mxu1 %v7171_v60  ;;  %2897 = vmatprep.subr.bf16.mxu0 %v7036_v61  ;;  %v1419_v60 = vld [vmem:[#allocation15 + $0x730] sm:$0xff]  ;;  %v7115_v61 = vcombine.low %v1295_v43, %v1299_v44  ;;  %v7070_v43 = vcombine.high %v1248_v35, %v1252_v38 }
 0x3ea   :  { %2938 = vmatprep.subr.bf16.mxu1 %v7164_v62  ;;  %v7243_v62 = vcombine.low %v1423_v45, %v1427_v46  ;;  %v7236_v37 = vcombine.high %v1415_v59, %v1419_v60  ;;  %v1240_v45 = vld [vmem:[#allocation15 + $0x198] sm:$0xff] }
 0x3eb   :  { %v1244_v46 = vld [vmem:[#allocation15 + $0x1b8] sm:$0xff] }
 0x3ec   :  { %2898 = vmatpush1.bf16.msra.mxu0 %v7035_v1  ;;  %v1407_v1 = vld [vmem:[#allocation15 + $0x6d0] sm:$0xff] }
 0x3ed   :  { %2939 = vmatpush1.bf16.msra.mxu1 %v7163_v30  ;;  %2899 = vmatprep.subr.bf16.mxu0 %v7028_v3  ;;  %v1411_v30 = vld [vmem:[#allocation15 + $0x6f0] sm:$0xff]  ;;  %v7107_v3 = vcombine.low %v1287_v57, %v1291_v58  ;;  %v7062_v57 = vcombine.high %v1240_v45, %v1244_v46  ;;  %v1232_v58 = vld [vmem:[#allocation15 + $0x158] sm:$0xff] }
 0x3ee   :  { %2940 = vmatprep.subr.bf16.mxu1 %v7156_v4  ;;  %v7235_v4 = vcombine.low %v1415_v59, %v1419_v60  ;;  %v7228_v8 = vcombine.high %v1407_v1, %v1411_v30  ;;  %v1236_v59 = vld [vmem:[#allocation15 + $0x178] sm:$0xff] }
 0x3f0   :  { %2900 = vmatpush1.bf16.msra.mxu0 %v7027_v11  ;;  %v1399_v11 = vld [vmem:[#allocation15 + $0x690] sm:$0xff] }
 0x3f1   :  { %2941 = vmatpush1.bf16.msra.mxu1 %v7155_v12  ;;  %2901 = vmatprep.subr.bf16.mxu0 %v7020_v13  ;;  %v1403_v12 = vld [vmem:[#allocation15 + $0x6b0] sm:$0xff]  ;;  %v7099_v13 = vcombine.low %v1279_v0, %v1283_v36  ;;  %v7054_v0 = vcombine.high %v1232_v58, %v1236_v59 }
 0x3f2   :  { %2942 = vmatprep.subr.bf16.mxu1 %v7148_v15  ;;  %v7227_v15 = vcombine.low %v1407_v1, %v1411_v30  ;;  %v7220_v18 = vcombine.high %v1399_v11, %v1403_v12  ;;  %v1224_v1 = vld [vmem:[#allocation15 + $0x118] sm:$0xff] }
 0x3f3   :  { %v1228_v30 = vld [vmem:[#allocation15 + $0x138] sm:$0xff] }
 0x3f4   :  { %2902 = vmatpush1.bf16.msra.mxu0 %v7019_v21  ;;  %v1391_v21 = vld [vmem:[#allocation15 + $0x650] sm:$0xff] }
 0x3f5   :  { %2943 = vmatpush1.bf16.msra.mxu1 %v7147_v24  ;;  %2903 = vmatprep.subr.bf16.mxu0 %v7012_v48  ;;  %v1395_v24 = vld [vmem:[#allocation15 + $0x670] sm:$0xff]  ;;  %v7091_v48 = vcombine.low %v1271_v9, %v1275_v10  ;;  %v7046_v9 = vcombine.high %v1224_v1, %v1228_v30  ;;  %v1216_v10 = vld [vmem:[#allocation15 + $0xd8] sm:$0xff] }
 0x3f6   :  { %2944 = vmatprep.subr.bf16.mxu1 %v7140_v49  ;;  %v7219_v49 = vcombine.low %v1399_v11, %v1403_v12  ;;  %v7212_v52 = vcombine.high %v1391_v21, %v1395_v24  ;;  %v1220_v11 = vld [vmem:[#allocation15 + $0xf8] sm:$0xff] }
 0x3f7   :  { %v1344_v12 = vld [vmem:[#allocation15 + $0x4d8] sm:$0xff] }
 0x3f8   :  { %2904 = vmatpush1.bf16.msra.mxu0 %v7011_v25  ;;  %v1383_v25 = vld [vmem:[#allocation15 + $0x610] sm:$0xff] }
 0x3f9   :  { %2945 = vmatpush1.bf16.msra.mxu1 %v7139_v26  ;;  %2905 = vmatprep.subr.bf16.mxu0 %v7132_v27  ;;  %v1387_v26 = vld [vmem:[#allocation15 + $0x630] sm:$0xff]  ;;  %v7083_v27 = vcombine.low %v1263_v19, %v1267_v20  ;;  %v1208_v19 = vld [vmem:[#allocation15 + $0x98] sm:$0xff] }
 0x3fa   :  { %2946 = vmatprep.subr.bf16.mxu1 %v7260_v28  ;;  %v7211_v28 = vcombine.low %v1391_v21, %v1395_v24  ;;  %v7204_v34 = vcombine.high %v1383_v25, %v1387_v26  ;;  %v1212_v20 = vld [vmem:[#allocation15 + $0xb8] sm:$0xff] }
 0x3fb   :  { %v1336_v21 = vld [vmem:[#allocation15 + $0x498] sm:$0xff] }
 0x3fc   :  { %2906 = vmatpush2.bf16.msra.mxu0 %v7131_v39  ;;  %v1376_v39 = vld [vmem:[#allocation15 + $0x5d8] sm:$0xff] }
 0x3fd   :  { %2947 = vmatpush2.bf16.msra.mxu1 %v7259_v40  ;;  %2907 = vmatprep.subr.bf16.mxu0 %v7124_v41  ;;  %v1380_v40 = vld [vmem:[#allocation15 + $0x5f8] sm:$0xff]  ;;  %v7075_v41 = vcombine.low %v1255_v53, %v1259_v54 }
 0x3fe   :  { %2948 = vmatprep.subr.bf16.mxu1 %v7252_v42  ;;  %v7203_v42 = vcombine.low %v1383_v25, %v1387_v26  ;;  %v7198_v44 = vcombine.high %v1376_v39, %v1380_v40  ;;  %v1340_v24 = vld [vmem:[#allocation15 + $0x4b8] sm:$0xff] }
 0x3ff   :  { %v1200_v53 = vld [vmem:[#allocation15 + $0x58] sm:$0xff] }
 0x400   :  { %2908 = vmatpush2.bf16.msra.mxu0 %v7123_v47  ;;  %v7069_v47 = vcombine.low %v1248_v35, %v1252_v38  ;;  %v1204_v54 = vld [vmem:[#allocation15 + $0x78] sm:$0xff] }
 0x401   :  { %2949 = vmatpush2.bf16.msra.mxu1 %v7251_v51  ;;  %2909 = vmatprep.subr.bf16.mxu0 %v7116_v55  ;;  %v1368_v51 = vld [vmem:[#allocation15 + $0x598] sm:$0xff] }
 0x402   :  { %2950 = vmatprep.subr.bf16.mxu1 %v7244_v56  ;;  %v1372_v55 = vld [vmem:[#allocation15 + $0x5b8] sm:$0xff]  ;;  %v7197_v56 = vcombine.low %v1376_v39, %v1380_v40 }
 0x403   :  { %v7190_v60 = vcombine.high %v1368_v51, %v1372_v55  ;;  %v1328_v25 = vld [vmem:[#allocation15 + $0x458] sm:$0xff] }
 0x404   :  { %2910 = vmatpush2.bf16.msra.mxu0 %v7115_v61  ;;  %v1360_v61 = vld [vmem:[#allocation15 + $0x558] sm:$0xff] }
 0x405   :  { %2951 = vmatpush2.bf16.msra.mxu1 %v7243_v62  ;;  %2911 = vmatprep.subr.bf16.mxu0 %v7108_v63  ;;  %v1364_v62 = vld [vmem:[#allocation15 + $0x578] sm:$0xff]  ;;  %v7061_v63 = vcombine.low %v1240_v45, %v1244_v46 }
 0x406   :  { %2952 = vmatprep.subr.bf16.mxu1 %v7236_v37  ;;  %v7189_v37 = vcombine.low %v1368_v51, %v1372_v55  ;;  %v7182_v36 = vcombine.high %v1360_v61, %v1364_v62  ;;  %v1332_v26 = vld [vmem:[#allocation15 + $0x478] sm:$0xff] }
 0x407   :  { %v1192_v35 = vld [vmem:[#allocation15 + $0x18] sm:$0xff] }
 0x408   :  { %2912 = vmatpush2.bf16.msra.mxu0 %v7107_v3  ;;  %v1352_v3 = vld [vmem:[#allocation15 + $0x518] sm:$0xff] }
 0x409   :  { %2953 = vmatpush2.bf16.msra.mxu1 %v7235_v4  ;;  %2913 = vmatprep.subr.bf16.mxu0 %v7100_v7  ;;  %v1356_v4 = vld [vmem:[#allocation15 + $0x538] sm:$0xff]  ;;  %v7053_v7 = vcombine.low %v1232_v58, %v1236_v59 }
 0x40a   :  { %2954 = vmatprep.subr.bf16.mxu1 %v7228_v8  ;;  %v7181_v8 = vcombine.low %v1360_v61, %v1364_v62  ;;  %v1196_v38 = vld [vmem:[#allocation15 + $0x38] sm:$0xff] }
 0x40b   :  { %v1320_v39 = vld [vmem:[#allocation15 + $0x418] sm:$0xff]  ;;  %v7013_v55 = vcombine.low %v1192_v35, %v1196_v38 }
 0x40c   :  { %2914 = vmatpush2.bf16.msra.mxu0 %v7099_v13  ;;  %v1348_v13 = vld [vmem:[#allocation15 + $0x4f8] sm:$0xff] }
 0x40d   :  { %2955 = vmatpush2.bf16.msra.mxu1 %v7227_v15  ;;  %2915 = vmatprep.subr.bf16.mxu0 %v7092_v17  ;;  %v7173_v15 = vcombine.low %v1352_v3, %v1356_v4  ;;  %v7038_v17 = vcombine.high %v1216_v10, %v1220_v11  ;;  %v1324_v40 = vld [vmem:[#allocation15 + $0x438] sm:$0xff] }
 0x40e   :  { %2956 = vmatprep.subr.bf16.mxu1 %v7220_v18  ;;  %v7166_v18 = vcombine.high %v1344_v12, %v1348_v13  ;;  %v1312_v45 = vld [vmem:[#allocation15 + $0x3d8] sm:$0xff] }
 0x40f   :  { %v1316_v46 = vld [vmem:[#allocation15 + $0x3f8] sm:$0xff] }
 0x410   :  { %2916 = vmatpush2.bf16.msra.mxu0 %v7091_v48  ;;  %v7037_v48 = vcombine.low %v1216_v10, %v1220_v11  ;;  %v1444_v51 = vld [vmem:[#allocation15 + $0x7f8] sm:$0xff] }
 0x411   :  { %2957 = vmatpush2.bf16.msra.mxu1 %v7219_v49  ;;  %2917 = vmatprep.subr.bf16.mxu0 %v7084_v50  ;;  %v7165_v49 = vcombine.low %v1344_v12, %v1348_v13  ;;  %v7030_v50 = vcombine.high %v1208_v19, %v1212_v20  ;;  %v1304_v59 = vld [vmem:[#allocation15 + $0x398] sm:$0xff] }
 0x412   :  { %2958 = vmatprep.subr.bf16.mxu1 %v7212_v52  ;;  %v7158_v52 = vcombine.high %v1336_v21, %v1340_v24  ;;  %v1432_v61 = vld [vmem:[#allocation15 + $0x798] sm:$0xff] }
 0x413   :  { %v1436_v62 = vld [vmem:[#allocation15 + $0x7b8] sm:$0xff] }
 0x414   :  { %2918 = vmatpush2.bf16.msra.mxu0 %v7083_v27  ;;  %v7029_v27 = vcombine.low %v1208_v19, %v1212_v20  ;;  %v1288_v10 = vld [vmem:[#allocation15 + $0x318] sm:$0xff] }
 0x415   :  { %2959 = vmatpush2.bf16.msra.mxu1 %v7211_v28  ;;  %2919 = vmatprep.subr.bf16.mxu0 %v7076_v29  ;;  %v7157_v28 = vcombine.low %v1336_v21, %v1340_v24  ;;  %v7022_v29 = vcombine.high %v1200_v53, %v1204_v54  ;;  %v1292_v11 = vld [vmem:[#allocation15 + $0x338] sm:$0xff] }
 0x416   :  { %2960 = vmatprep.subr.bf16.mxu1 %v7204_v34  ;;  %v7150_v34 = vcombine.high %v1328_v25, %v1332_v26  ;;  %v1416_v12 = vld [vmem:[#allocation15 + $0x718] sm:$0xff] }
 0x417   :  { %v1420_v13 = vld [vmem:[#allocation15 + $0x738] sm:$0xff] }
 0x418   :  { %2920 = vmatpush2.bf16.msra.mxu0 %v7075_v41  ;;  %v7021_v41 = vcombine.low %v1200_v53, %v1204_v54  ;;  %v1280_v19 = vld [vmem:[#allocation15 + $0x2d8] sm:$0xff] }
 0x419   :  { %2961 = vmatpush2.bf16.msra.mxu1 %v7203_v42  ;;  %2971 = vmatprep.subr.bf16.mxu0 %v7070_v43  ;;  %v7149_v42 = vcombine.low %v1328_v25, %v1332_v26  ;;  %v7014_v43 = vcombine.high %v1192_v35, %v1196_v38  ;;  %v1284_v20 = vld [vmem:[#allocation15 + $0x2f8] sm:$0xff] }
 0x41a   :  { %3012 = vmatprep.subr.bf16.mxu1 %v7198_v44  ;;  %v7142_v44 = vcombine.high %v1320_v39, %v1324_v40  ;;  %v1408_v21 = vld [vmem:[#allocation15 + $0x6d8] sm:$0xff] }
 0x41b   :  { %2922 = vmatmul.mubr.bf16.vlgmr.msra.gmra.mxu0 %v9152_v5  ;;  %v1412_v24 = vld [vmem:[#allocation15 + $0x6f8] sm:$0xff] }
 0x41c   :  { %2963 = vmatmul.mubr.bf16.vlgmr.msra.gmra.mxu1 %v9154_v6  ;;  %2972 = vmatpush1.bf16.msra.mxu0 %v7069_v47  ;;  %v1440_v47 = vld [vmem:[#allocation15 + $0x7d8] sm:$0xff] }
 0x41d   :  { %3003 = vmatprep.mubr.bf16.mxu0 %v9148_v2  ;;  %3013 = vmatpush1.bf16.msra.mxu1 %v7197_v56  ;;  %v7174_v2 = vcombine.high %v1352_v3, %v1356_v4  ;;  %v7141_v56 = vcombine.low %v1320_v39, %v1324_v40  ;;  %v7262_v58 = vcombine.high %v1440_v47, %v1444_v51  ;;  %v1424_v3 = vld [vmem:[#allocation15 + $0x758] sm:$0xff] }
 0x41e   :  { %3044 = vmatprep.mubr.bf16.mxu1 %v9150_v31  ;;  %2973 = vmatprep.subr.bf16.mxu0 %v7062_v57  ;;  %v7045_v31 = vcombine.low %v1224_v1, %v1228_v30  ;;  %v7134_v57 = vcombine.high %v1312_v45, %v1316_v46  ;;  %v1296_v1 = vld [vmem:[#allocation15 + $0x358] sm:$0xff] }
 0x41f   :  { %3014 = vmatprep.subr.bf16.mxu1 %v7190_v60  ;;  %v1308_v60 = vld [vmem:[#allocation15 + $0x3b8] sm:$0xff] }
 0x420   :  { %2974 = vmatpush1.bf16.msra.mxu0 %v7061_v63  ;;  %v7133_v63 = vcombine.low %v1312_v45, %v1316_v46  ;;  %v1300_v30 = vld [vmem:[#allocation15 + $0x378] sm:$0xff] }
 0x421   :  { %3015 = vmatpush1.bf16.msra.mxu1 %v7189_v37  ;;  %2975 = vmatprep.subr.bf16.mxu0 %v7054_v0  ;;  %v7261_v37 = vcombine.low %v1440_v47, %v1444_v51  ;;  %v7126_v0 = vcombine.high %v1304_v59, %v1308_v60  ;;  %v1428_v4 = vld [vmem:[#allocation15 + $0x778] sm:$0xff] }
 0x422   :  { %3016 = vmatprep.subr.bf16.mxu1 %v7182_v36  ;;  %v7254_v36 = vcombine.high %v1432_v61, %v1436_v62  ;;  %v1272_v53 = vld [vmem:[#allocation15 + $0x298] sm:$0xff] }
 0x423   :  { %v1276_v54 = vld [vmem:[#allocation15 + $0x2b8] sm:$0xff] }
 0x424   :  { %2976 = vmatpush1.bf16.msra.mxu0 %v7053_v7  ;;  %v7125_v7 = vcombine.low %v1304_v59, %v1308_v60  ;;  %v1400_v25 = vld [vmem:[#allocation15 + $0x698] sm:$0xff] }
 0x425   :  { %3017 = vmatpush1.bf16.msra.mxu1 %v7181_v8  ;;  %2977 = vmatprep.subr.bf16.mxu0 %v7046_v9  ;;  %v7253_v8 = vcombine.low %v1432_v61, %v1436_v62  ;;  %v7118_v9 = vcombine.high %v1296_v1, %v1300_v30  ;;  %v1404_v26 = vld [vmem:[#allocation15 + $0x6b8] sm:$0xff] }
 0x426   :  { %3018 = vmatprep.subr.bf16.mxu1 %v7174_v2  ;;  %v7246_v2 = vcombine.high %v1424_v3, %v1428_v4  ;;  %v1264_v35 = vld [vmem:[#allocation15 + $0x258] sm:$0xff] }
 0x427   :  { %v1268_v38 = vld [vmem:[#allocation15 + $0x278] sm:$0xff] }
 0x428   :  { %2978 = vmatpush1.bf16.msra.mxu0 %v7045_v31  ;;  %v7117_v31 = vcombine.low %v1296_v1, %v1300_v30  ;;  %v1392_v39 = vld [vmem:[#allocation15 + $0x658] sm:$0xff] }
 0x429   :  { %3019 = vmatpush1.bf16.msra.mxu1 %v7173_v15  ;;  %2979 = vmatprep.subr.bf16.mxu0 %v7038_v17  ;;  %v7245_v15 = vcombine.low %v1424_v3, %v1428_v4  ;;  %v7110_v17 = vcombine.high %v1288_v10, %v1292_v11  ;;  %v1396_v40 = vld [vmem:[#allocation15 + $0x678] sm:$0xff] }
 0x42a   :  { %3020 = vmatprep.subr.bf16.mxu1 %v7166_v18  ;;  %v7238_v18 = vcombine.high %v1416_v12, %v1420_v13  ;;  %v1256_v45 = vld [vmem:[#allocation15 + $0x218] sm:$0xff] }
 0x42b   :  { %v1260_v46 = vld [vmem:[#allocation15 + $0x238] sm:$0xff] }
 0x42c   :  { %2980 = vmatpush1.bf16.msra.mxu0 %v7037_v48  ;;  %v7109_v48 = vcombine.low %v1288_v10, %v1292_v11  ;;  %v1384_v47 = vld [vmem:[#allocation15 + $0x618] sm:$0xff]  ;;  %v7077_v59 = vcombine.low %v1256_v45, %v1260_v46 }
 0x42d   :  { %3021 = vmatpush1.bf16.msra.mxu1 %v7165_v49  ;;  %2981 = vmatprep.subr.bf16.mxu0 %v7030_v50  ;;  %v7237_v49 = vcombine.low %v1416_v12, %v1420_v13  ;;  %v7102_v50 = vcombine.high %v1280_v19, %v1284_v20  ;;  %v1388_v51 = vld [vmem:[#allocation15 + $0x638] sm:$0xff] }
 0x42e   :  { %3022 = vmatprep.subr.bf16.mxu1 %v7158_v52  ;;  %v7230_v52 = vcombine.high %v1408_v21, %v1412_v24  ;;  %v7205_v60 = vcombine.low %v1384_v47, %v1388_v51 }
 0x430   :  { %2982 = vmatpush1.bf16.msra.mxu0 %v7029_v27  ;;  %v7101_v27 = vcombine.low %v1280_v19, %v1284_v20 }
 0x431   :  { %3023 = vmatpush1.bf16.msra.mxu1 %v7157_v28  ;;  %2983 = vmatprep.subr.bf16.mxu0 %v7022_v29  ;;  %v7229_v28 = vcombine.low %v1408_v21, %v1412_v24  ;;  %v7094_v29 = vcombine.high %v1272_v53, %v1276_v54 }
 0x432   :  { %3024 = vmatprep.subr.bf16.mxu1 %v7150_v34  ;;  %v7222_v34 = vcombine.high %v1400_v25, %v1404_v26 }
 0x434   :  { %2984 = vmatpush1.bf16.msra.mxu0 %v7021_v41  ;;  %v7093_v41 = vcombine.low %v1272_v53, %v1276_v54 }
 0x435   :  { %3025 = vmatpush1.bf16.msra.mxu1 %v7149_v42  ;;  %2985 = vmatprep.subr.bf16.mxu0 %v7014_v43  ;;  %v7221_v42 = vcombine.low %v1400_v25, %v1404_v26  ;;  %v7086_v43 = vcombine.high %v1264_v35, %v1268_v38 }
 0x436   :  { %3026 = vmatprep.subr.bf16.mxu1 %v7142_v44  ;;  %v7214_v44 = vcombine.high %v1392_v39, %v1396_v40 }
 0x438   :  { %2986 = vmatpush1.bf16.msra.mxu0 %v7013_v55  ;;  %v7085_v55 = vcombine.low %v1264_v35, %v1268_v38 }
 0x439   :  { %3027 = vmatpush1.bf16.msra.mxu1 %v7141_v56  ;;  %2987 = vmatprep.subr.bf16.mxu0 %v7134_v57  ;;  %v7213_v56 = vcombine.low %v1392_v39, %v1396_v40  ;;  %v7078_v57 = vcombine.high %v1256_v45, %v1260_v46 }
 0x43a   :  { %3028 = vmatprep.subr.bf16.mxu1 %v7262_v58  ;;  %v7206_v58 = vcombine.high %v1384_v47, %v1388_v51 }
 0x43c   :  { %2988 = vmatpush2.bf16.msra.mxu0 %v7133_v63 }
 0x43d   :  { %3029 = vmatpush2.bf16.msra.mxu1 %v7261_v37  ;;  %2989 = vmatprep.subr.bf16.mxu0 %v7126_v0 }
 0x43e   :  { %3030 = vmatprep.subr.bf16.mxu1 %v7254_v36 }
 0x440   :  { %2990 = vmatpush2.bf16.msra.mxu0 %v7125_v7 }
 0x441   :  { %3031 = vmatpush2.bf16.msra.mxu1 %v7253_v8  ;;  %2991 = vmatprep.subr.bf16.mxu0 %v7118_v9 }
 0x442   :  { %3032 = vmatprep.subr.bf16.mxu1 %v7246_v2 }
 0x444   :  { %2992 = vmatpush2.bf16.msra.mxu0 %v7117_v31 }
 0x445   :  { %3033 = vmatpush2.bf16.msra.mxu1 %v7245_v15  ;;  %2993 = vmatprep.subr.bf16.mxu0 %v7110_v17 }
 0x446   :  { %3034 = vmatprep.subr.bf16.mxu1 %v7238_v18 }
 0x448   :  { %2994 = vmatpush2.bf16.msra.mxu0 %v7109_v48 }
 0x449   :  { %3035 = vmatpush2.bf16.msra.mxu1 %v7237_v49  ;;  %2995 = vmatprep.subr.bf16.mxu0 %v7102_v50 }
 0x44a   :  { %3036 = vmatprep.subr.bf16.mxu1 %v7230_v52 }
 0x44c   :  { %2996 = vmatpush2.bf16.msra.mxu0 %v7101_v27 }
 0x44d   :  { %3037 = vmatpush2.bf16.msra.mxu1 %v7229_v28  ;;  %2997 = vmatprep.subr.bf16.mxu0 %v7094_v29 }
 0x44e   :  { %3038 = vmatprep.subr.bf16.mxu1 %v7222_v34 }
 0x450   :  { %2998 = vmatpush2.bf16.msra.mxu0 %v7093_v41 }
 0x451   :  { %3039 = vmatpush2.bf16.msra.mxu1 %v7221_v42  ;;  %2999 = vmatprep.subr.bf16.mxu0 %v7086_v43 }
 0x452   :  { %3040 = vmatprep.subr.bf16.mxu1 %v7214_v44 }
 0x454   :  { %3000 = vmatpush2.bf16.msra.mxu0 %v7085_v55 }
 0x455   :  { %3041 = vmatpush2.bf16.msra.mxu1 %v7213_v56  ;;  %3001 = vmatprep.subr.bf16.mxu0 %v7078_v57 }
 0x456   :  { %3042 = vmatprep.subr.bf16.mxu1 %v7206_v58 }
 0x458   :  { %3002 = vmatpush2.bf16.msra.mxu0 %v7077_v59 }
 0x459   :  { %3043 = vmatpush2.bf16.msra.mxu1 %v7205_v60 }
 0x45b   :  { %3004 = vmatmul.mubr.bf16.vlgmr.msra.gmra.mxu0 %v9152_v5  ;;  %v2759_v61 = vpop.f32.mrf.mxu0  ;;  %v2800_v62 = vpop.f32.mrf.mxu1 }
 0x45c   :  { %3045 = vmatmul.mubr.bf16.vlgmr.msra.gmra.mxu1 %v9154_v6  ;;  %v2801_v63 = vadd.f32 %v2800_v62, %v2759_v61 }
 0x45d   :  { %v2761_v37 = vpop.f32.mrf.mxu0  ;;  %v2802_v0 = vpop.f32.mrf.mxu1 }
 0x45e   :  { %v3055_v36 = vrot.slane %v2801_v63, 4  ;;  %v2803_v1 = vadd.f32 %v2802_v0, %v2761_v37 }
 0x45f   :  { %v2763_v30 = vpop.f32.mrf.mxu0  ;;  %v2804_v3 = vpop.f32.mrf.mxu1 }
 0x460   :  { %v3056_v4 = vadd.f32 %v3055_v36, %v2801_v63  ;;  %v3061_v7 = vrot.slane %v2803_v1, 4  ;;  %v7985_v3 = vld [vmem:[#allocation19 + $0x18c] ss:$28 sps:$4 sm:$0xff]  }
 0x461   :  { %v2764_v8 = vpop.f32.mrf.mxu0  ;;  %v2805_v9 = vpop.f32.mrf.mxu1  ;;  %6241 = vmatprep.subr.bf16.mxu0 %v7985_v3  ;;  %v8027_v3 = vld [vmem:[#allocation19 + $0x4] ss:$28 sps:$4 sm:$0xff]  }
 0x462   :  { %v3057_v2 = vrot.slane %v3056_v4, 2  ;;  %v3062_v10 = vadd.f32 %v3061_v7, %v2803_v1  ;;  %v7983_v9 = vld [vmem:[#allocation19 + $0x188] ss:$28 sps:$4 sm:$0xff]  }
 0x463   :  { %6242 = vmatpush1.bf16.msra.mxu0 %v7983_v9  ;;  %v8033_v9 = vld [vmem:[#allocation19 + $0x34c] ss:$28 sps:$4 sm:$0xff]  }
 0x464   :  { %v3058_v11 = vadd.f32 %v3057_v2, %v3056_v4  ;;  %v3063_v12 = vrot.slane %v3062_v10, 2  ;;  %v7988_v4 = vld [vmem:[#allocation19 + $0x50c] ss:$28 sps:$4 sm:$0xff]  }
 0x465   :  { %v7986_v2 = vld [vmem:[#allocation19 + $0x508] ss:$28 sps:$4 sm:$0xff]   ;;  %6282 = vmatprep.subr.bf16.mxu1 %v7988_v4 }
 0x466   :  { %v3059_v5 = vrot.slane %v3058_v11, 1  ;;  %v3064_v13 = vadd.f32 %v3063_v12, %v3062_v10  ;;  %6283 = vmatpush1.bf16.msra.mxu1 %v7986_v2  ;;  %v7991_v12 = vld [vmem:[#allocation19 + $0x154] ss:$28 sps:$4 sm:$0xff]   ;;  %v8030_v4 = vld [vmem:[#allocation19 + $0x384] ss:$28 sps:$4 sm:$0xff]  }
 0x467   :  { %6243 = vmatprep.subr.bf16.mxu0 %v7991_v12  ;;  %v8036_v2 = vld [vmem:[#allocation19 + $0x6cc] ss:$28 sps:$4 sm:$0xff]   ;;  %v8039_v12 = vld [vmem:[#allocation19 + $0x314] ss:$28 sps:$4 sm:$0xff]  }
 0x468   :  { %v3060_v31 = vadd.f32 %v3059_v5, %v3058_v11  ;;  %v3065_v15 = vrot.slane %v3064_v13, 1  ;;  %v7994_v5 = vld [vmem:[#allocation19 + $0x4d4] ss:$28 sps:$4 sm:$0xff]  }
 0x469   :  { %6284 = vmatprep.subr.bf16.mxu1 %v7994_v5  ;;  %v8042_v5 = vld [vmem:[#allocation19 + $0x694] ss:$28 sps:$4 sm:$0xff]  }
 0x46a   :  { %v3103_v6 = vmul.f32 0.125, %v3060_v31  ;;  %v3066_v17 = vadd.f32 %v3065_v15, %v3064_v13  ;;  %v7989_v15 = vld [vmem:[#allocation19 + $0x150] ss:$28 sps:$4 sm:$0xff]  }
 0x46b   :  { %6244 = vmatpush1.bf16.msra.mxu0 %v7989_v15  ;;  %v8040_v15 = vld [vmem:[#allocation19 + $0x690] ss:$28 sps:$4 sm:$0xff]  }
 0x46c   :  { %v9178_v18 = vsub.f32 %v2801_v63, %v3103_v6  ;;  %v3104_v19 = vmul.f32 0.125, %v3066_v17  ;;  %v7992_v6 = vld [vmem:[#allocation19 + $0x4d0] ss:$28 sps:$4 sm:$0xff]  }
 0x46d   :  { %6285 = vmatpush1.bf16.msra.mxu1 %v7992_v6 }
 0x46e   :  { %v3119_v20 = vmul.f32 %v9178_v18, %v9178_v18  ;;  %v9182_v21 = vsub.f32 %v2803_v1, %v3104_v19 }
 0x470   :  { %v3127_v24 = vrot.slane %v3119_v20, 4  ;;  %v3120_v48 = vmul.f32 %v9182_v21, %v9182_v21 }
 0x472   :  { %v3128_v49 = vadd.f32 %v3127_v24, %v3119_v20  ;;  %v3133_v50 = vrot.slane %v3120_v48, 4  ;;  %v7997_v20 = vld [vmem:[#allocation19 + $0x11c] ss:$28 sps:$4 sm:$0xff]  }
 0x473   :  { %v8000_v24 = vld [vmem:[#allocation19 + $0x49c] ss:$28 sps:$4 sm:$0xff]   ;;  %6245 = vmatprep.subr.bf16.mxu0 %v7997_v20 }
 0x474   :  { %v3129_v52 = vrot.slane %v3128_v49, 2  ;;  %v3134_v53 = vadd.f32 %v3133_v50, %v3120_v48  ;;  %v7995_v50 = vld [vmem:[#allocation19 + $0x118] ss:$28 sps:$4 sm:$0xff]   ;;  %6286 = vmatprep.subr.bf16.mxu1 %v8000_v24 }
 0x475   :  { %6246 = vmatpush1.bf16.msra.mxu0 %v7995_v50  ;;  %v8045_v20 = vld [vmem:[#allocation19 + $0x2dc] ss:$28 sps:$4 sm:$0xff]  }
 0x476   :  { %v3130_v54 = vadd.f32 %v3129_v52, %v3128_v49  ;;  %v3135_v25 = vrot.slane %v3134_v53, 2  ;;  %v7998_v52 = vld [vmem:[#allocation19 + $0x498] ss:$28 sps:$4 sm:$0xff]  }
 0x477   :  { %6287 = vmatpush1.bf16.msra.mxu1 %v7998_v52  ;;  %v8048_v24 = vld [vmem:[#allocation19 + $0x65c] ss:$28 sps:$4 sm:$0xff]  }
 0x478   :  { %v3131_v26 = vrot.slane %v3130_v54, 1  ;;  %v3136_v27 = vadd.f32 %v3135_v25, %v3134_v53  ;;  %v8003_v25 = vld [vmem:[#allocation19 + $0xe4] ss:$28 sps:$4 sm:$0xff]   ;;  %v8046_v50 = vld [vmem:[#allocation19 + $0x658] ss:$28 sps:$4 sm:$0xff]  }
 0x479   :  { %6247 = vmatprep.subr.bf16.mxu0 %v8003_v25  ;;  %v8054_v25 = vld [vmem:[#allocation19 + $0x624] ss:$28 sps:$4 sm:$0xff]  }
 0x47a   :  { %v3132_v28 = vadd.f32 %v3131_v26, %v3130_v54  ;;  %v3137_v29 = vrot.slane %v3136_v27, 1  ;;  %v8006_v26 = vld [vmem:[#allocation19 + $0x464] ss:$28 sps:$4 sm:$0xff]  }
 0x47b   :  { %6288 = vmatprep.subr.bf16.mxu1 %v8006_v26 }
 0x47c   :  { %v3175_v34 = vmul.f32 0.125, %v3132_v28  ;;  %v3138_v35 = vadd.f32 %v3137_v29, %v3136_v27  ;;  %v8001_v29 = vld [vmem:[#allocation19 + $0xe0] ss:$28 sps:$4 sm:$0xff]  }
 0x47d   :  { %6248 = vmatpush1.bf16.msra.mxu0 %v8001_v29  ;;  %v8057_v29 = vld [vmem:[#allocation19 + $0x26c] ss:$28 sps:$4 sm:$0xff]  }
 0x47e   :  { %v3183_v38 = vadd.f32 0.8, %v3175_v34  ;;  %v3176_v39 = vmul.f32 0.125, %v3138_v35  ;;  %v8004_v34 = vld [vmem:[#allocation19 + $0x460] ss:$28 sps:$4 sm:$0xff]  }
 0x47f   :  { %6289 = vmatpush1.bf16.msra.mxu1 %v8004_v34 }
 0x480   :  { %v3184_v40 = vadd.f32 0.8, %v3176_v39  ;;  %8635 = vrsqrt.f32 %v3183_v38  ;;  %v8009_v39 = vld [vmem:[#allocation19 + $0xac] ss:$28 sps:$4 sm:$0xff]  }
 0x481   :  { %6249 = vmatprep.subr.bf16.mxu0 %v8009_v39 }
 0x482   :  { %8637 = vrsqrt.f32 %v3184_v40  ;;  %v8012_v40 = vld [vmem:[#allocation19 + $0x42c] ss:$28 sps:$4 sm:$0xff]  }
 0x483   :  { %6290 = vmatprep.subr.bf16.mxu1 %v8012_v40  ;;  %v8061_v40 = vld [vmem:[#allocation19 + $0x230] ss:$28 sps:$4 sm:$0xff]  }
 0x48d   :  { %v9186_v41 = vpop.eup %8635 }
 0x48f   :  { %v9188_v42 = vpop.eup %8637 }
 0x490   :  { %v3207_v43 = vcombine.low %v9186_v41, %v9188_v42  ;;  %v8060_v41 = vld [vmem:[#allocation19 + $0x5ec] ss:$28 sps:$4 sm:$0xff]  }
 0x491   :  { %v8055_v42 = vld [vmem:[#allocation19 + $0x268] ss:$28 sps:$4 sm:$0xff]  }
 0x492   :  { %v9204_v52 = vrot.slane %v3207_v43, %v9086_v16  ;;  %v8058_v43 = vld [vmem:[#allocation19 + $0x5e8] ss:$28 sps:$4 sm:$0xff]  }
 0x49b   :  { %v2841_v44 = vpop.f32.mrf.mxu0  ;;  %v2882_v45 = vpop.f32.mrf.mxu1 }
 0x49c   :  { %v2883_v46 = vadd.f32 %v2882_v45, %v2841_v44 }
 0x49d   :  { %v2843_v47 = vpop.f32.mrf.mxu0  ;;  %v2884_v51 = vpop.f32.mrf.mxu1 }
 0x49e   :  { %v3067_v55 = vrot.slane %v2883_v46, 4  ;;  %v2885_v56 = vadd.f32 %v2884_v51, %v2843_v47  ;;  %v8010_v47 = vld [vmem:[#allocation19 + $0x428] ss:$28 sps:$4 sm:$0xff]  }
 0x49f   :  { %v2845_v57 = vpop.f32.mrf.mxu0  ;;  %v2886_v58 = vpop.f32.mrf.mxu1  ;;  %6291 = vmatpush1.bf16.msra.mxu1 %v8010_v47 }
 0x4a0   :  { %v3068_v59 = vadd.f32 %v3067_v55, %v2883_v46  ;;  %v3073_v60 = vrot.slane %v2885_v56, 4  ;;  %v8018_v57 = vld [vmem:[#allocation19 + $0x3f4] ss:$28 sps:$4 sm:$0xff]  }
 0x4a1   :  { %v2846_v61 = vpop.f32.mrf.mxu0  ;;  %v2887_v62 = vpop.f32.mrf.mxu1  ;;  %6292 = vmatprep.subr.bf16.mxu1 %v8018_v57  ;;  %v8072_v57 = vld [vmem:[#allocation19 + $0x57c] ss:$28 sps:$4 sm:$0xff]  }
 0x4a2   :  { %v3069_v63 = vrot.slane %v3068_v59, 2  ;;  %v3074_v37 = vadd.f32 %v3073_v60, %v2885_v56  ;;  %v8013_v60 = vld [vmem:[#allocation19 + $0x70] ss:$28 sps:$4 sm:$0xff]  }
 0x4a3   :  { %v8016_v61 = vld [vmem:[#allocation19 + $0x3f0] ss:$28 sps:$4 sm:$0xff]  }
 0x4a4   :  { %v3070_v0 = vadd.f32 %v3069_v63, %v3068_v59  ;;  %v3075_v36 = vrot.slane %v3074_v37, 2  ;;  %6293 = vmatpush1.bf16.msra.mxu1 %v8016_v61 }
 0x4a6   :  { %v3071_v1 = vrot.slane %v3070_v0, 1  ;;  %v3076_v30 = vadd.f32 %v3075_v36, %v3074_v37  ;;  %v8021_v37 = vld [vmem:[#allocation19 + $0x3c] ss:$28 sps:$4 sm:$0xff]  }
 0x4a8   :  { %v3072_v7 = vadd.f32 %v3071_v1, %v3070_v0  ;;  %v3077_v8 = vrot.slane %v3076_v30, 1  ;;  %v8024_v0 = vld [vmem:[#allocation19 + $0x3bc] ss:$28 sps:$4 sm:$0xff]  }
 0x4a9   :  { %v8019_v1 = vld [vmem:[#allocation19 + $0x38] ss:$28 sps:$4 sm:$0xff]   ;;  %6294 = vmatprep.subr.bf16.mxu1 %v8024_v0  ;;  %v8076_v0 = vld [vmem:[#allocation19 + $0x540] ss:$28 sps:$4 sm:$0xff]  }
 0x4aa   :  { %v3105_v10 = vmul.f32 0.125, %v3072_v7  ;;  %v3078_v11 = vadd.f32 %v3077_v8, %v3076_v30  ;;  %v8022_v30 = vld [vmem:[#allocation19 + $0x3b8] ss:$28 sps:$4 sm:$0xff]   ;;  %v8025_v7 = vld [vmem:[#allocation19] ss:$28 sps:$4 sm:$0xff]  }
 0x4ab   :  { %6295 = vmatpush1.bf16.msra.mxu1 %v8022_v30  ;;  %v8028_v8 = vld [vmem:[#allocation19 + $0x380] ss:$28 sps:$4 sm:$0xff]   ;;  %v8084_v30 = vld [vmem:[#allocation19 + $0xc0c] ss:$28 sps:$4 sm:$0xff]  }
 0x4ac   :  { %v9192_v13 = vsub.f32 %v2883_v46, %v3105_v10  ;;  %v3106_v31 = vmul.f32 0.125, %v3078_v11  ;;  %v8007_v46 = vld [vmem:[#allocation19 + $0xa8] ss:$28 sps:$4 sm:$0xff]   ;;  %6296 = vmatprep.subr.bf16.mxu1 %v8030_v4 }
 0x4ad   :  { %6250 = vmatpush1.bf16.msra.mxu0 %v8007_v46  ;;  %v8031_v10 = vld [vmem:[#allocation19 + $0x348] ss:$28 sps:$4 sm:$0xff]  }
 0x4ae   :  { %v3121_v17 = vmul.f32 %v9192_v13, %v9192_v13  ;;  %v9196_v19 = vsub.f32 %v2885_v56, %v3106_v31  ;;  %v8015_v56 = vld [vmem:[#allocation19 + $0x74] ss:$28 sps:$4 sm:$0xff]   ;;  %v8034_v11 = vld [vmem:[#allocation19 + $0x6c8] ss:$28 sps:$4 sm:$0xff]  }
 0x4af   :  { %6251 = vmatprep.subr.bf16.mxu0 %v8015_v56  ;;  %6297 = vmatpush1.bf16.msra.mxu1 %v8028_v8  ;;  %v8037_v31 = vld [vmem:[#allocation19 + $0x310] ss:$28 sps:$4 sm:$0xff]   ;;  %v8069_v56 = vld [vmem:[#allocation19 + $0x1fc] ss:$28 sps:$4 sm:$0xff]  }
 0x4b0   :  { %v3139_v48 = vrot.slane %v3121_v17, 4  ;;  %v3122_v49 = vmul.f32 %v9196_v19, %v9196_v19  ;;  %6298 = vmatprep.subr.bf16.mxu1 %v8036_v2 }
 0x4b1   :  { %6252 = vmatpush1.bf16.msra.mxu0 %v8013_v60  ;;  %v8070_v60 = vld [vmem:[#allocation19 + $0x578] ss:$28 sps:$4 sm:$0xff]  }
 0x4b2   :  { %v3140_v53 = vadd.f32 %v3139_v48, %v3121_v17  ;;  %v3145_v54 = vrot.slane %v3122_v49, 4  ;;  %6253 = vmatprep.subr.bf16.mxu0 %v8021_v37  ;;  %v8073_v37 = vld [vmem:[#allocation19 + $0x1c0] ss:$28 sps:$4 sm:$0xff]  }
 0x4b3   :  { %6299 = vmatpush2.bf16.msra.mxu1 %v8034_v11 }
 0x4b4   :  { %v3141_v27 = vrot.slane %v3140_v53, 2  ;;  %v3146_v28 = vadd.f32 %v3145_v54, %v3122_v49  ;;  %6300 = vmatprep.subr.bf16.mxu1 %v8042_v5  ;;  %v8043_v49 = vld [vmem:[#allocation19 + $0x2d8] ss:$28 sps:$4 sm:$0xff]   ;;  %v8051_v54 = vld [vmem:[#allocation19 + $0x2a4] ss:$28 sps:$4 sm:$0xff]  }
 0x4b5   :  { %6254 = vmatpush1.bf16.msra.mxu0 %v8019_v1  ;;  %v8081_v1 = vld [vmem:[#allocation19 + $0x88c] ss:$28 sps:$4 sm:$0xff]  }
 0x4b6   :  { %v3142_v35 = vadd.f32 %v3141_v27, %v3140_v53  ;;  %v3147_v38 = vrot.slane %v3146_v28, 2  ;;  %6255 = vmatprep.subr.bf16.mxu0 %v8027_v3  ;;  %v8049_v27 = vld [vmem:[#allocation19 + $0x2a0] ss:$28 sps:$4 sm:$0xff]  }
 0x4b7   :  { %6301 = vmatpush2.bf16.msra.mxu1 %v8040_v15 }
 0x4b8   :  { %v3143_v44 = vrot.slane %v3142_v35, 1  ;;  %v3148_v45 = vadd.f32 %v3147_v38, %v3146_v28  ;;  %6302 = vmatprep.subr.bf16.mxu1 %v8048_v24  ;;  %v8052_v28 = vld [vmem:[#allocation19 + $0x620] ss:$28 sps:$4 sm:$0xff]   ;;  %v8066_v38 = vld [vmem:[#allocation19 + $0x5b4] ss:$28 sps:$4 sm:$0xff]  }
 0x4b9   :  { %6256 = vmatpush1.bf16.msra.mxu0 %v8025_v7 }
 0x4ba   :  { %v3144_v51 = vadd.f32 %v3143_v44, %v3142_v35  ;;  %v3149_v55 = vrot.slane %v3148_v45, 1  ;;  %6257 = vmatprep.subr.bf16.mxu0 %v8033_v9  ;;  %v8063_v35 = vld [vmem:[#allocation19 + $0x234] ss:$28 sps:$4 sm:$0xff]  }
 0x4bb   :  { %6303 = vmatpush2.bf16.msra.mxu1 %v8046_v50  ;;  %v8064_v44 = vld [vmem:[#allocation19 + $0x5b0] ss:$28 sps:$4 sm:$0xff]  }
 0x4bc   :  { %v3177_v58 = vmul.f32 0.125, %v3144_v51  ;;  %v3150_v59 = vadd.f32 %v3149_v55, %v3148_v45  ;;  %6304 = vmatprep.subr.bf16.mxu1 %v8054_v25 }
 0x4bd   :  { %6258 = vmatpush2.bf16.msra.mxu0 %v8031_v10 }
 0x4be   :  { %v3185_v62 = vadd.f32 0.8, %v3177_v58  ;;  %v3178_v63 = vmul.f32 0.125, %v3150_v59  ;;  %6259 = vmatprep.subr.bf16.mxu0 %v8039_v12  ;;  %v8067_v59 = vld [vmem:[#allocation19 + $0x1f8] ss:$28 sps:$4 sm:$0xff]  }
 0x4bf   :  { %6305 = vmatpush2.bf16.msra.mxu1 %v8052_v28 }
 0x4c0   :  { %v3186_v36 = vadd.f32 0.8, %v3178_v63  ;;  %8639 = vrsqrt.f32 %v3185_v62  ;;  %6306 = vmatprep.subr.bf16.mxu1 %v8060_v41  ;;  %v8075_v62 = vld [vmem:[#allocation19 + $0x1c4] ss:$28 sps:$4 sm:$0xff]  }
 0x4c1   :  { %6260 = vmatpush2.bf16.msra.mxu0 %v8037_v31 }
 0x4c2   :  { %8641 = vrsqrt.f32 %v3186_v36  ;;  %6261 = vmatprep.subr.bf16.mxu0 %v8045_v20  ;;  %v8078_v36 = vld [vmem:[#allocation19 + $0x544] ss:$28 sps:$4 sm:$0xff]  }
 0x4c3   :  { %6307 = vmatpush2.bf16.msra.mxu1 %v8058_v43 }
 0x4c4   :  { %6308 = vmatprep.subr.bf16.mxu1 %v8066_v38 }
 0x4c5   :  { %6262 = vmatpush2.bf16.msra.mxu0 %v8043_v49 }
 0x4c6   :  { %6263 = vmatprep.subr.bf16.mxu0 %v8051_v54 }
 0x4c7   :  { %6309 = vmatpush2.bf16.msra.mxu1 %v8064_v44 }
 0x4c8   :  { %6310 = vmatprep.subr.bf16.mxu1 %v8072_v57 }
 0x4c9   :  { %6264 = vmatpush2.bf16.msra.mxu0 %v8049_v27 }
 0x4ca   :  { %6265 = vmatprep.subr.bf16.mxu0 %v8057_v29 }
 0x4cb   :  { %6311 = vmatpush2.bf16.msra.mxu1 %v8070_v60 }
 0x4cc   :  { %6312 = vmatprep.subr.bf16.mxu1 %v8078_v36 }
 0x4cd   :  { %v8640_v6 = vpop.eup %8639  ;;  %6266 = vmatpush2.bf16.msra.mxu0 %v8055_v42 }
 0x4ce   :  { %6267 = vmatprep.subr.bf16.mxu0 %v8063_v35 }
 0x4cf   :  { %v8642_v17 = vpop.eup %8641  ;;  %6313 = vmatpush2.bf16.msra.mxu1 %v8076_v0 }
 0x4d0   :  { %v3208_v48 = vcombine.low %v8640_v6, %v8642_v17  ;;  %6364 = vmatprep.subr.bf16.mxu1 %v8084_v30 }
 0x4d1   :  { %6268 = vmatpush2.bf16.msra.mxu0 %v8061_v40 }
 0x4d2   :  { %v9207_v53 = vrot.slane %v3208_v48, %v9086_v16  ;;  %6269 = vmatprep.subr.bf16.mxu0 %v8069_v56 }
 0x4d4   :  { %v3239_v26 = vcombine.low %v9204_v52, %v9207_v53 }
 0x4d5   :  { %6270 = vmatpush2.bf16.msra.mxu0 %v8067_v59 }
 0x4d6   :  { %6271 = vmatprep.subr.bf16.mxu0 %v8075_v62 }
 0x4d9   :  { %6272 = vmatpush2.bf16.msra.mxu0 %v8073_v37 }
 0x4da   :  { %6323 = vmatprep.subr.bf16.mxu0 %v8081_v1 }
 0x4db   :  { %v2923_v34 = vpop.f32.mrf.mxu0 }
 0x4dc   :  { %v2964_v39 = vpop.f32.mrf.mxu1 }
 0x4dd   :  { %v2965_v45 = vadd.f32 %v2964_v39, %v2923_v34  ;;  %v2925_v46 = vpop.f32.mrf.mxu0 }
 0x4de   :  { %v2966_v47 = vpop.f32.mrf.mxu1 }
 0x4df   :  { %v2967_v51 = vadd.f32 %v2966_v47, %v2925_v46  ;;  %v2927_v55 = vpop.f32.mrf.mxu0  ;;  %v3079_v4 = vrot.slane %v2965_v45, 4 }
 0x4e0   :  { %v2968_v58 = vpop.f32.mrf.mxu1 }
 0x4e1   :  { %v2928_v61 = vpop.f32.mrf.mxu0  ;;  %v3085_v3 = vrot.slane %v2967_v51, 4  ;;  %v3080_v8 = vadd.f32 %v3079_v4, %v2965_v45 }
 0x4e2   :  { %v2969_v63 = vpop.f32.mrf.mxu1 }
 0x4e3   :  { %v3086_v7 = vadd.f32 %v3085_v3, %v2967_v51  ;;  %v3081_v2 = vrot.slane %v3080_v8, 2 }
 0x4e5   :  { %v3087_v9 = vrot.slane %v3086_v7, 2  ;;  %v3082_v11 = vadd.f32 %v3081_v2, %v3080_v8 }
 0x4e7   :  { %v3088_v10 = vadd.f32 %v3087_v9, %v3086_v7  ;;  %v3083_v5 = vrot.slane %v3082_v11, 1 }
 0x4e9   :  { %v3089_v12 = vrot.slane %v3088_v10, 1  ;;  %v3084_v15 = vadd.f32 %v3083_v5, %v3082_v11 }
 0x4eb   :  { %v3090_v31 = vadd.f32 %v3089_v12, %v3088_v10  ;;  %v3107_v17 = vmul.f32 0.125, %v3084_v15 }
 0x4ed   :  { %v3108_v6 = vmul.f32 0.125, %v3090_v31  ;;  %v9213_v24 = vsub.f32 %v2965_v45, %v3107_v17 }
 0x4ef   :  { %v9211_v20 = vsub.f32 %v2967_v51, %v3108_v6  ;;  %v3123_v54 = vmul.f32 %v9213_v24, %v9213_v24 }
 0x4f1   :  { %v3124_v48 = vmul.f32 %v9211_v20, %v9211_v20  ;;  %v3151_v35 = vrot.slane %v3123_v54, 4 }
 0x4f3   :  { %v3157_v29 = vrot.slane %v3124_v48, 4  ;;  %v3152_v51 = vadd.f32 %v3151_v35, %v3123_v54 }
 0x4f5   :  { %v3158_v45 = vadd.f32 %v3157_v29, %v3124_v48  ;;  %v3153_v60 = vrot.slane %v3152_v51, 2 }
 0x4f7   :  { %v3159_v57 = vrot.slane %v3158_v45, 2  ;;  %v3154_v36 = vadd.f32 %v3153_v60, %v3152_v51  ;;  %v3289_v60 = vsub.s32 7, %v9083_v14 }
 0x4f9   :  { %v3160_v63 = vadd.f32 %v3159_v57, %v3158_v45  ;;  %v3155_v8 = vrot.slane %v3154_v36, 1  ;;  %v3054_v57 = vld [vmem:[#allocation18] sm:$0xff] }
 0x4fa   :  { %v3315_v52 = vrot.slane %v3054_v57, %v9094_v23  ;;  %v3323_v53 = vrot.slane %v3054_v57, %v9132_v32 }
 0x4fb   :  { %v3161_v3 = vrot.slane %v3160_v63, 1  ;;  %v3156_v5 = vadd.f32 %v3155_v8, %v3154_v36 }
 0x4fd   :  { %v3162_v10 = vadd.f32 %v3161_v3, %v3160_v63  ;;  %v9236_v63 = vsub.s32 5, %v9083_v14 }
 0x4ff   :  { %v3180_v6 = vmul.f32 0.125, %v3162_v10 }
 0x51b   :  { %v3005_v49 = vpop.f32.mrf.mxu0 }
 0x51c   :  { %v3046_v50 = vpop.f32.mrf.mxu1 }
 0x51d   :  { %v3047_v25 = vadd.f32 %v3046_v50, %v3005_v49  ;;  %v3007_v27 = vpop.f32.mrf.mxu0  ;;  %v3179_v49 = vmul.f32 0.125, %v3156_v5 }
 0x51e   :  { %v3048_v28 = vpop.f32.mrf.mxu1 }
 0x51f   :  { %v3091_v41 = vrot.slane %v3047_v25, 4  ;;  %v3049_v42 = vadd.f32 %v3048_v28, %v3007_v27  ;;  %v3009_v43 = vpop.f32.mrf.mxu0  ;;  %v3187_v29 = vadd.f32 0.8, %v3179_v49 }
 0x520   :  { %v3050_v34 = vpop.f32.mrf.mxu1 }
 0x521   :  { %v3092_v38 = vadd.f32 %v3091_v41, %v3047_v25  ;;  %v3097_v39 = vrot.slane %v3049_v42, 4  ;;  %v3010_v40 = vpop.f32.mrf.mxu0 }
 0x522   :  { %v3051_v44 = vpop.f32.mrf.mxu1 }
 0x523   :  { %v3093_v46 = vrot.slane %v3092_v38, 2  ;;  %v3098_v47 = vadd.f32 %v3097_v39, %v3049_v42 }
 0x525   :  { %v3094_v55 = vadd.f32 %v3093_v46, %v3092_v38  ;;  %v3099_v56 = vrot.slane %v3098_v47, 2 }
 0x527   :  { %v3095_v58 = vrot.slane %v3094_v55, 1  ;;  %v3100_v59 = vadd.f32 %v3099_v56, %v3098_v47  ;;  %v3247_v56 = vrot.slane %v3239_v26, %v9086_v16  ;;  %v3319_v26 = vrot.slane %v3054_v57, %v9135_v33 }
 0x529   :  { %v3096_v61 = vadd.f32 %v3095_v58, %v3094_v55  ;;  %v3101_v62 = vrot.slane %v3100_v59, 1 }
 0x52b   :  { %v3109_v37 = vmul.f32 0.125, %v3096_v61  ;;  %v3102_v0 = vadd.f32 %v3101_v62, %v3100_v59  ;;  %v3053_v59 = vld [vmem:[#allocation16] sm:$0xff]  ;;  %v3339_v62 = vrot.slane %v3054_v57, %v3289_v60 }
 0x52d   :  { %v9219_v1 = vsub.f32 %v3047_v25, %v3109_v37  ;;  %v3110_v30 = vmul.f32 0.125, %v3102_v0  ;;  %v3188_v25 = vadd.f32 0.8, %v3180_v6  ;;  %v9239_v37 = vsub.s32 4, %v9083_v14 }
 0x52e   :  { %v9242_v0 = vsub.s32 6, %v9083_v14 }
 0x52f   :  { %v3125_v4 = vmul.f32 %v9219_v1, %v9219_v1  ;;  %v9223_v7 = vsub.f32 %v3049_v42, %v3110_v30  ;;  %8643 = vrsqrt.f32 %v3188_v25  ;;  %v3331_v30 = vrot.slane %v3054_v57, %v9236_v63 }
 0x530   :  { %8645 = vrsqrt.f32 %v3187_v29  ;;  %v3327_v3 = vrot.slane %v3054_v57, %v9239_v37 }
 0x531   :  { %v3163_v9 = vrot.slane %v3125_v4, 4  ;;  %v3126_v2 = vmul.f32 %v9223_v7, %v9223_v7 }
 0x533   :  { %v3164_v11 = vadd.f32 %v3163_v9, %v3125_v4  ;;  %v3169_v12 = vrot.slane %v3126_v2, 4  ;;  %v3335_v4 = vrot.slane %v3054_v57, %v9242_v0 }
 0x535   :  { %v3165_v31 = vrot.slane %v3164_v11, 2  ;;  %v3170_v15 = vadd.f32 %v3169_v12, %v3126_v2 }
 0x537   :  { %v3166_v17 = vadd.f32 %v3165_v31, %v3164_v11  ;;  %v3171_v48 = vrot.slane %v3170_v15, 2 }
 0x539   :  { %v3167_v50 = vrot.slane %v3166_v17, 1  ;;  %v3172_v54 = vadd.f32 %v3171_v48, %v3170_v15 }
 0x53b   :  { %v3168_v27 = vadd.f32 %v3167_v50, %v3166_v17  ;;  %v3173_v28 = vrot.slane %v3172_v54, 1 }
 0x53c   :  { %v8644_v38 = vpop.eup %8643 }
 0x53d   :  { %v3181_v41 = vmul.f32 0.125, %v3168_v27  ;;  %v3174_v42 = vadd.f32 %v3173_v28, %v3172_v54  ;;  %v8646_v39 = vpop.eup %8645 }
 0x53e   :  { %v3209_v44 = vcombine.low %v8646_v39, %v8644_v38  ;;  %v8079_v38 = vld [vmem:[#allocation19 + $0x888] ss:$28 sps:$4 sm:$0xff]  }
 0x53f   :  { %v3189_v43 = vadd.f32 0.8, %v3181_v41  ;;  %v3182_v34 = vmul.f32 0.125, %v3174_v42  ;;  %v8082_v39 = vld [vmem:[#allocation19 + $0xc08] ss:$28 sps:$4 sm:$0xff]  }
 0x540   :  { %v3231_v47 = vrot.slane %v3209_v44, %v9086_v16 }
 0x541   :  { %v3190_v35 = vadd.f32 0.8, %v3182_v34  ;;  %8647 = vrsqrt.f32 %v3189_v43 }
 0x543   :  { %8649 = vrsqrt.f32 %v3190_v35 }
 0x54e   :  { %v8648_v40 = vpop.eup %8647 }
 0x550   :  { %v8650_v45 = vpop.eup %8649 }
 0x551   :  { %v3210_v46 = vcombine.low %v8648_v40, %v8650_v45 }
 0x553   :  { %v3238_v51 = vrot.slane %v3210_v46, %v9086_v16 }
 0x555   :  { %v3240_v55 = vcombine.low %v3231_v47, %v3238_v51  ;;  %v8087_v51 = vld [vmem:[#allocation19 + $0x854] ss:$28 sps:$4 sm:$0xff]  }
 0x557   :  { %v3254_v58 = vrot.slane %v3240_v55, %v9086_v16  ;;  %v3311_v16 = vrot.slane %v3054_v57, %v9091_v22 }
 0x559   :  { %v3255_v61 = vcombine.low %v3247_v56, %v3254_v58  ;;  %v8090_v56 = vld [vmem:[#allocation19 + $0xbd4] ss:$28 sps:$4 sm:$0xff]  }
 0x55b   :  { %v3257_v36 = vmul.f32 %v3255_v61, %v3053_v59  ;;  %v8085_v59 = vld [vmem:[#allocation19 + $0x850] ss:$28 sps:$4 sm:$0xff]  }
 0x55d   :  { %v3290_v8 = vrot.slane %v3257_v36, %v3289_v60  ;;  %v3266_v9 = vrot.slane %v3257_v36, %v9094_v23  ;;  %v3274_v14 = vrot.slane %v3257_v36, %v9132_v32  ;;  %v3262_v2 = vrot.slane %v3257_v36, %v9091_v22  ;;  %v8088_v60 = vld [vmem:[#allocation19 + $0xbd0] ss:$28 sps:$4 sm:$0xff]  }
 0x55e   :  { %v3270_v10 = vrot.slane %v3257_v36, %v9135_v33  ;;  %v3282_v11 = vrot.slane %v3257_v36, %v9236_v63  ;;  %v3278_v12 = vrot.slane %v3257_v36, %v9239_v37  ;;  %v3286_v5 = vrot.slane %v3257_v36, %v9242_v0  ;;  %v8096_v36 = vld [vmem:[#allocation19 + $0xb9c] ss:$28 sps:$4 sm:$0xff]  }
 0x55f   :  { %v3306_v31 = vmul.f32 %v3290_v8, %v9223_v7  ;;  %v3300_v15 = vmul.f32 %v3266_v9, %v9182_v21  ;;  %v3302_v6 = vmul.f32 %v3274_v14, %v9196_v19  ;;  %v3299_v17 = vmul.f32 %v3262_v2, %v9178_v18  ;;  %v8108_v8 = vld [vmem:[#allocation19 + $0xb2c] ss:$28 sps:$4 sm:$0xff]   ;;  %v8111_v2 = vld [vmem:[#allocation19 + $0x774] ss:$28 sps:$4 sm:$0xff]  }
 0x560   :  { %v3301_v48 = vmul.f32 %v3270_v10, %v9192_v13  ;;  %v3304_v49 = vmul.f32 %v3282_v11, %v9211_v20  ;;  %v3303_v50 = vmul.f32 %v3278_v12, %v9213_v24  ;;  %v3305_v54 = vmul.f32 %v3286_v5, %v9219_v1  ;;  %v8103_v9 = vld [vmem:[#allocation19 + $0x7a8] ss:$28 sps:$4 sm:$0xff]   ;;  %v8114_v10 = vld [vmem:[#allocation19 + $0xaf4] ss:$28 sps:$4 sm:$0xff]   ;;  %v8117_v5 = vld [vmem:[#allocation19 + $0x73c] ss:$28 sps:$4 sm:$0xff]  }
 0x561   :  { %v3355_v25 = vadd.f32 %v3339_v62, %v3306_v31  ;;  %v3349_v27 = vadd.f32 %v3315_v52, %v3300_v15  ;;  %v3351_v28 = vadd.f32 %v3323_v53, %v3302_v6  ;;  %v3348_v29 = vadd.f32 %v3311_v16, %v3299_v17  ;;  %v8093_v62 = vld [vmem:[#allocation19 + $0x81c] ss:$28 sps:$4 sm:$0xff]   ;;  %v8099_v16 = vld [vmem:[#allocation19 + $0x7e4] ss:$28 sps:$4 sm:$0xff]   ;;  %v8109_v11 = vld [vmem:[#allocation19 + $0x770] ss:$28 sps:$4 sm:$0xff]  }
 0x562   :  { %v3350_v41 = vadd.f32 %v3319_v26, %v3301_v48  ;;  %v3353_v7 = vadd.f32 %v3331_v30, %v3304_v49  ;;  %v9266_v42 = vadd.f32 %v3327_v3, %v3303_v50  ;;  %v9268_v21 = vadd.f32 %v3335_v4, %v3305_v54  ;;  %v8091_v52 = vld [vmem:[#allocation19 + $0x818] ss:$28 sps:$4 sm:$0xff]   ;;  %v8102_v26 = vld [vmem:[#allocation19 + $0xb64] ss:$28 sps:$4 sm:$0xff]   ;;  %v8105_v4 = vld [vmem:[#allocation19 + $0x7ac] ss:$28 sps:$4 sm:$0xff]  }
 0x563   :  { %vm3357_vm8 = vcmp.gt.f32.partialorder %v3349_v27, 0.0  ;;  %v3365_v18 = vmul.f32 0.2, %v3349_v27  ;;  %vm3359_vm9 = vcmp.gt.f32.partialorder %v3351_v28, 0.0  ;;  %v3367_v13 = vmul.f32 0.2, %v3351_v28 }
 0x564   :  { %vm3356_vm10 = vcmp.gt.f32.partialorder %v3348_v29, 0.0  ;;  %v3364_v19 = vmul.f32 0.2, %v3348_v29  ;;  %vm3358_vm11 = vcmp.gt.f32.partialorder %v3350_v41, 0.0  ;;  %v3366_v20 = vmul.f32 0.2, %v3350_v41 }
 0x565   :  { %v3373_v24 = vsel %vm3357_vm8, %v3349_v27, %v3365_v18  ;;  %v3375_v1 = vsel %vm3359_vm9, %v3351_v28, %v3367_v13  ;;  %vm3361_vm12 = vcmp.gt.f32.partialorder %v3353_v7, 0.0  ;;  %v3369_v43 = vmul.f32 0.2, %v3353_v7  ;;  %v8094_v53 = vld [vmem:[#allocation19 + $0xb98] ss:$28 sps:$4 sm:$0xff]  }
 0x566   :  { %v9270_v34 = vpack.c.bf16 %v3373_v24, %v3373_v24  ;;  %v9272_v35 = vpack.c.bf16 %v3375_v1, %v3375_v1  ;;  %v3372_v40 = vsel %vm3356_vm10, %v3348_v29, %v3364_v19  ;;  %v3374_v44 = vsel %vm3358_vm11, %v3350_v41, %v3366_v20  ;;  %v8097_v30 = vld [vmem:[#allocation19 + $0x7e0] ss:$28 sps:$4 sm:$0xff]   ;;  %v8106_v14 = vld [vmem:[#allocation19 + $0xb28] ss:$28 sps:$4 sm:$0xff]   ;;  %v8112_v12 = vld [vmem:[#allocation19 + $0xaf0] ss:$28 sps:$4 sm:$0xff]  }
 0x567   :  { %v9274_v45 = vpack.c.bf16 %v3372_v40, %v3372_v40  ;;  %v9276_v46 = vpack.c.bf16 %v3374_v44, %v3374_v44  ;;  %v3377_v47 = vsel %vm3361_vm12, %v3353_v7, %v3369_v43  ;;  %vm3363_vm13 = vcmp.gt.f32.partialorder %v3355_v25, 0.0  ;;  %v8100_v3 = vld [vmem:[#allocation19 + $0xb60] ss:$28 sps:$4 sm:$0xff]   ;;  %v8115_v15 = vld [vmem:[#allocation19 + $0x738] ss:$28 sps:$4 sm:$0xff]  }
 0x568   :  { %6273 = vmatprep.mubr.bf16.mxu0 %v9270_v34  ;;  %6314 = vmatprep.mubr.bf16.mxu1 %v9272_v35  ;;  %v3371_v55 = vmul.f32 0.2, %v3355_v25  ;;  %v9282_v57 = vpack.c.bf16 %v3377_v47, %v3377_v47  ;;  %v8120_v31 = vld [vmem:[#allocation19 + $0xabc] ss:$28 sps:$4 sm:$0xff]   ;;  %v8123_v17 = vld [vmem:[#allocation19 + $0x704] ss:$28 sps:$4 sm:$0xff]  }
 0x569   :  { %6274 = vmatmul.mubr.bf16.vlgmr.msra.gmra.mxu0 %v9274_v45  ;;  %6315 = vmatmul.mubr.bf16.vlgmr.msra.gmra.mxu1 %v9276_v46  ;;  %v8118_v6 = vld [vmem:[#allocation19 + $0xab8] ss:$28 sps:$4 sm:$0xff]   ;;  %v8126_v48 = vld [vmem:[#allocation19 + $0xa84] ss:$28 sps:$4 sm:$0xff]   ;;  %v8129_v54 = vld [vmem:[#allocation19 + $0xa4c] ss:$28 sps:$4 sm:$0xff]  }
 0x56a   :  { %6324 = vmatpush1.bf16.msra.mxu0 %v8079_v38  ;;  %6365 = vmatpush1.bf16.msra.mxu1 %v8082_v39  ;;  %v3379_v58 = vsel %vm3363_vm13, %v3355_v25, %v3371_v55  ;;  %v8121_v49 = vld [vmem:[#allocation19 + $0x700] ss:$28 sps:$4 sm:$0xff]   ;;  %v8132_v25 = vld [vmem:[#allocation19 + $0xdcc] ss:$28 sps:$4 sm:$0xff]   ;;  %v8135_v29 = vld [vmem:[#allocation19 + $0xa14] ss:$28 sps:$4 sm:$0xff]  }
 0x56b   :  { %6355 = vmatprep.mubr.bf16.mxu0 %v9282_v57  ;;  %v9285_v61 = vpack.c.bf16 %v3379_v58, %v3379_v58  ;;  %6325 = vmatprep.subr.bf16.mxu0 %v8087_v51  ;;  %v8124_v50 = vld [vmem:[#allocation19 + $0xa80] ss:$28 sps:$4 sm:$0xff]   ;;  %v8127_v27 = vld [vmem:[#allocation19 + $0xa48] ss:$28 sps:$4 sm:$0xff]   ;;  %v8138_v41 = vld [vmem:[#allocation19 + $0xd94] ss:$28 sps:$4 sm:$0xff]  }
 0x56c   :  { %6366 = vmatprep.subr.bf16.mxu1 %v8090_v56  ;;  %v8130_v28 = vld [vmem:[#allocation19 + $0xdc8] ss:$28 sps:$4 sm:$0xff]   ;;  %v8133_v7 = vld [vmem:[#allocation19 + $0xa10] ss:$28 sps:$4 sm:$0xff]   ;;  %v8141_v13 = vld [vmem:[#allocation19 + $0x9dc] ss:$28 sps:$4 sm:$0xff]  }
 0x56d   :  { %6396 = vmatprep.mubr.bf16.mxu1 %v9285_v61  ;;  %v8136_v18 = vld [vmem:[#allocation19 + $0xd90] ss:$28 sps:$4 sm:$0xff]   ;;  %v8144_v19 = vld [vmem:[#allocation19 + $0xd5c] ss:$28 sps:$4 sm:$0xff]   ;;  %v8147_v1 = vld [vmem:[#allocation19 + $0x9a4] ss:$28 sps:$4 sm:$0xff]  }
 0x56e   :  { %6326 = vmatpush1.bf16.msra.mxu0 %v8085_v59  ;;  %6367 = vmatpush1.bf16.msra.mxu1 %v8088_v60  ;;  %v8139_v20 = vld [vmem:[#allocation19 + $0x9d8] ss:$28 sps:$4 sm:$0xff]   ;;  %v8150_v43 = vld [vmem:[#allocation19 + $0xd24] ss:$28 sps:$4 sm:$0xff]   ;;  %v8153_v40 = vld [vmem:[#allocation19 + $0x96c] ss:$28 sps:$4 sm:$0xff]  }
 0x56f   :  { %6327 = vmatprep.subr.bf16.mxu0 %v8093_v62  ;;  %6368 = vmatprep.subr.bf16.mxu1 %v8096_v36  ;;  %v8142_v24 = vld [vmem:[#allocation19 + $0xd58] ss:$28 sps:$4 sm:$0xff]   ;;  %v8145_v38 = vld [vmem:[#allocation19 + $0x9a0] ss:$28 sps:$4 sm:$0xff]   ;;  %v8156_v44 = vld [vmem:[#allocation19 + $0xcec] ss:$28 sps:$4 sm:$0xff]  }
 0x570   :  { %v8148_v39 = vld [vmem:[#allocation19 + $0xd20] ss:$28 sps:$4 sm:$0xff]   ;;  %v8151_v47 = vld [vmem:[#allocation19 + $0x968] ss:$28 sps:$4 sm:$0xff]   ;;  %v8159_v55 = vld [vmem:[#allocation19 + $0x934] ss:$28 sps:$4 sm:$0xff]  }
 0x571   :  { %v8154_v51 = vld [vmem:[#allocation19 + $0xce8] ss:$28 sps:$4 sm:$0xff]   ;;  %v8162_v56 = vld [vmem:[#allocation19 + $0xcb4] ss:$28 sps:$4 sm:$0xff]   ;;  %v8165_v60 = vld [vmem:[#allocation19 + $0x8fc] ss:$28 sps:$4 sm:$0xff]  }
 0x572   :  { %6328 = vmatpush1.bf16.msra.mxu0 %v8091_v52  ;;  %6369 = vmatpush1.bf16.msra.mxu1 %v8094_v53  ;;  %v8157_v58 = vld [vmem:[#allocation19 + $0x930] ss:$28 sps:$4 sm:$0xff]   ;;  %v8168_v62 = vld [vmem:[#allocation19 + $0xc7c] ss:$28 sps:$4 sm:$0xff]   ;;  %v8171_v53 = vld [vmem:[#allocation19 + $0x8c4] ss:$28 sps:$4 sm:$0xff]  }
 0x573   :  { %6329 = vmatprep.subr.bf16.mxu0 %v8099_v16  ;;  %6370 = vmatprep.subr.bf16.mxu1 %v8102_v26  ;;  %v8160_v59 = vld [vmem:[#allocation19 + $0xcb0] ss:$28 sps:$4 sm:$0xff]   ;;  %v8163_v36 = vld [vmem:[#allocation19 + $0x8f8] ss:$28 sps:$4 sm:$0xff]   ;;  %v8174_v16 = vld [vmem:[#allocation19 + $0xc44] ss:$28 sps:$4 sm:$0xff]  }
 0x574   :  { %v8166_v52 = vld [vmem:[#allocation19 + $0xc78] ss:$28 sps:$4 sm:$0xff]   ;;  %v3368_v26 = vmul.f32 0.2, %v9266_v42  ;;  %vm3360_vm14 = vcmp.gt.f32.partialorder %v9266_v42, 0.0  ;;  %vm3362_vm15 = vcmp.gt.f32.partialorder %v9268_v21, 0.0 }
 0x576   :  { %6330 = vmatpush1.bf16.msra.mxu0 %v8097_v30  ;;  %6371 = vmatpush1.bf16.msra.mxu1 %v8100_v3  ;;  %v3370_v30 = vmul.f32 0.2, %v9268_v21  ;;  %v8169_v3 = vld [vmem:[#allocation19 + $0x8c0] ss:$28 sps:$4 sm:$0xff]  }
 0x577   :  { %6331 = vmatprep.subr.bf16.mxu0 %v8105_v4  ;;  %6372 = vmatprep.subr.bf16.mxu1 %v8108_v8  ;;  %v8172_v4 = vld [vmem:[#allocation19 + $0xc40] ss:$28 sps:$4 sm:$0xff]   ;;  %v8177_v8 = vld [vmem:[#allocation19 + $0x194] ss:$28 sps:$4 sm:$0xff]  }
 0x57a   :  { %6332 = vmatpush1.bf16.msra.mxu0 %v8103_v9  ;;  %6373 = vmatpush1.bf16.msra.mxu1 %v8106_v14  ;;  %v8180_v9 = vld [vmem:[#allocation19 + $0x514] ss:$28 sps:$4 sm:$0xff]   ;;  %v3376_v14 = vsel %vm3360_vm14, %v9266_v42, %v3368_v26  ;;  %v8238_v26 = vld [vmem:[#allocation19 + $0x660] ss:$28 sps:$4 sm:$0xff]  }
 0x57b   :  { %6333 = vmatprep.subr.bf16.mxu0 %v8111_v2  ;;  %6374 = vmatprep.subr.bf16.mxu1 %v8114_v10  ;;  %v3378_v2 = vsel %vm3362_vm15, %v9268_v21, %v3370_v30  ;;  %v8175_v10 = vld [vmem:[#allocation19 + $0x190] ss:$28 sps:$4 sm:$0xff]   ;;  %v8181_v42 = vld [vmem:[#allocation19 + $0x158] ss:$28 sps:$4 sm:$0xff]  }
 0x57c   :  { %v8184_v21 = vld [vmem:[#allocation19 + $0x4d8] ss:$28 sps:$4 sm:$0xff]   ;;  %v8243_v30 = vld [vmem:[#allocation19 + $0x2ac] ss:$28 sps:$4 sm:$0xff]  }
 0x57e   :  { %6334 = vmatpush1.bf16.msra.mxu0 %v8109_v11  ;;  %6375 = vmatpush1.bf16.msra.mxu1 %v8112_v12  ;;  %v9294_v11 = vpack.c.bf16 %v3376_v14, %v3376_v14  ;;  %v9296_v12 = vpack.c.bf16 %v3378_v2, %v3378_v2  ;;  %v8252_v14 = vld [vmem:[#allocation19 + $0x5f4] ss:$28 sps:$4 sm:$0xff]  }
 0x57f   :  { %6335 = vmatprep.subr.bf16.mxu0 %v8117_v5  ;;  %6376 = vmatprep.subr.bf16.mxu1 %v8120_v31  ;;  %v8178_v5 = vld [vmem:[#allocation19 + $0x510] ss:$28 sps:$4 sm:$0xff]   ;;  %v8183_v31 = vld [vmem:[#allocation19 + $0x15c] ss:$28 sps:$4 sm:$0xff]  }
 0x580   :  { %v8247_v2 = vld [vmem:[#allocation19 + $0x270] ss:$28 sps:$4 sm:$0xff]  }
 0x582   :  { %6336 = vmatpush1.bf16.msra.mxu0 %v8115_v15  ;;  %6377 = vmatpush1.bf16.msra.mxu1 %v8118_v6  ;;  %v8186_v15 = vld [vmem:[#allocation19 + $0x4dc] ss:$28 sps:$4 sm:$0xff]   ;;  %v8189_v6 = vld [vmem:[#allocation19 + $0x124] ss:$28 sps:$4 sm:$0xff]  }
 0x583   :  { %6337 = vmatprep.subr.bf16.mxu0 %v8123_v17  ;;  %6378 = vmatprep.subr.bf16.mxu1 %v8126_v48  ;;  %v8192_v17 = vld [vmem:[#allocation19 + $0x4a4] ss:$28 sps:$4 sm:$0xff]  }
 0x584   :  { %v8187_v48 = vld [vmem:[#allocation19 + $0x120] ss:$28 sps:$4 sm:$0xff]  }
 0x586   :  { %6338 = vmatpush1.bf16.msra.mxu0 %v8121_v49  ;;  %6379 = vmatpush1.bf16.msra.mxu1 %v8124_v50  ;;  %v8190_v49 = vld [vmem:[#allocation19 + $0x4a0] ss:$28 sps:$4 sm:$0xff]   ;;  %v8195_v50 = vld [vmem:[#allocation19 + $0xec] ss:$28 sps:$4 sm:$0xff]  }
 0x587   :  { %6339 = vmatprep.subr.bf16.mxu0 %v8129_v54  ;;  %6380 = vmatprep.subr.bf16.mxu1 %v8132_v25  ;;  %v8198_v54 = vld [vmem:[#allocation19 + $0x46c] ss:$28 sps:$4 sm:$0xff]  }
 0x588   :  { %v8193_v25 = vld [vmem:[#allocation19 + $0xe8] ss:$28 sps:$4 sm:$0xff]  }
 0x58a   :  { %6340 = vmatpush2.bf16.msra.mxu0 %v8127_v27  ;;  %6381 = vmatpush2.bf16.msra.mxu1 %v8130_v28  ;;  %v8196_v27 = vld [vmem:[#allocation19 + $0x468] ss:$28 sps:$4 sm:$0xff]   ;;  %v8201_v28 = vld [vmem:[#allocation19 + $0xb4] ss:$28 sps:$4 sm:$0xff]  }
 0x58b   :  { %6341 = vmatprep.subr.bf16.mxu0 %v8135_v29  ;;  %6382 = vmatprep.subr.bf16.mxu1 %v8138_v41  ;;  %v8204_v29 = vld [vmem:[#allocation19 + $0x434] ss:$28 sps:$4 sm:$0xff]  }
 0x58c   :  { %v8199_v41 = vld [vmem:[#allocation19 + $0xb0] ss:$28 sps:$4 sm:$0xff]  }
 0x58e   :  { %6342 = vmatpush2.bf16.msra.mxu0 %v8133_v7  ;;  %6383 = vmatpush2.bf16.msra.mxu1 %v8136_v18  ;;  %v8202_v7 = vld [vmem:[#allocation19 + $0x430] ss:$28 sps:$4 sm:$0xff]   ;;  %v8207_v18 = vld [vmem:[#allocation19 + $0x7c] ss:$28 sps:$4 sm:$0xff]  }
 0x58f   :  { %6343 = vmatprep.subr.bf16.mxu0 %v8141_v13  ;;  %6384 = vmatprep.subr.bf16.mxu1 %v8144_v19  ;;  %v8210_v13 = vld [vmem:[#allocation19 + $0x3fc] ss:$28 sps:$4 sm:$0xff]  }
 0x590   :  { %v8205_v19 = vld [vmem:[#allocation19 + $0x78] ss:$28 sps:$4 sm:$0xff]  }
 0x592   :  { %6344 = vmatpush2.bf16.msra.mxu0 %v8139_v20  ;;  %6385 = vmatpush2.bf16.msra.mxu1 %v8142_v24  ;;  %v8208_v20 = vld [vmem:[#allocation19 + $0x3f8] ss:$28 sps:$4 sm:$0xff]   ;;  %v8213_v24 = vld [vmem:[#allocation19 + $0x44] ss:$28 sps:$4 sm:$0xff]  }
 0x593   :  { %6345 = vmatprep.subr.bf16.mxu0 %v8147_v1  ;;  %6386 = vmatprep.subr.bf16.mxu1 %v8150_v43  ;;  %v8216_v1 = vld [vmem:[#allocation19 + $0x3c4] ss:$28 sps:$4 sm:$0xff]  }
 0x594   :  { %v8211_v43 = vld [vmem:[#allocation19 + $0x40] ss:$28 sps:$4 sm:$0xff]  }
 0x596   :  { %6346 = vmatpush2.bf16.msra.mxu0 %v8145_v38  ;;  %6387 = vmatpush2.bf16.msra.mxu1 %v8148_v39  ;;  %v8214_v38 = vld [vmem:[#allocation19 + $0x3c0] ss:$28 sps:$4 sm:$0xff]   ;;  %v8219_v39 = vld [vmem:[#allocation19 + $0xc] ss:$28 sps:$4 sm:$0xff]  }
 0x597   :  { %6347 = vmatprep.subr.bf16.mxu0 %v8153_v40  ;;  %6388 = vmatprep.subr.bf16.mxu1 %v8156_v44  ;;  %v8222_v40 = vld [vmem:[#allocation19 + $0x38c] ss:$28 sps:$4 sm:$0xff]  }
 0x598   :  { %v8217_v44 = vld [vmem:[#allocation19 + $0x8] ss:$28 sps:$4 sm:$0xff]  }
 0x59a   :  { %6348 = vmatpush2.bf16.msra.mxu0 %v8151_v47  ;;  %6389 = vmatpush2.bf16.msra.mxu1 %v8154_v51  ;;  %v8220_v47 = vld [vmem:[#allocation19 + $0x388] ss:$28 sps:$4 sm:$0xff]   ;;  %v8225_v51 = vld [vmem:[#allocation19 + $0x354] ss:$28 sps:$4 sm:$0xff]  }
 0x59b   :  { %6349 = vmatprep.subr.bf16.mxu0 %v8159_v55  ;;  %6390 = vmatprep.subr.bf16.mxu1 %v8162_v56  ;;  %v8228_v55 = vld [vmem:[#allocation19 + $0x6d4] ss:$28 sps:$4 sm:$0xff]  }
 0x59c   :  { %v8223_v56 = vld [vmem:[#allocation19 + $0x350] ss:$28 sps:$4 sm:$0xff]  }
 0x59e   :  { %6350 = vmatpush2.bf16.msra.mxu0 %v8157_v58  ;;  %6391 = vmatpush2.bf16.msra.mxu1 %v8160_v59  ;;  %v8226_v58 = vld [vmem:[#allocation19 + $0x6d0] ss:$28 sps:$4 sm:$0xff]   ;;  %v8231_v59 = vld [vmem:[#allocation19 + $0x31c] ss:$28 sps:$4 sm:$0xff]  }
 0x59f   :  { %6351 = vmatprep.subr.bf16.mxu0 %v8165_v60  ;;  %6392 = vmatprep.subr.bf16.mxu1 %v8168_v62  ;;  %v8234_v60 = vld [vmem:[#allocation19 + $0x69c] ss:$28 sps:$4 sm:$0xff]  }
 0x5a0   :  { %v8229_v62 = vld [vmem:[#allocation19 + $0x318] ss:$28 sps:$4 sm:$0xff]  }
 0x5a2   :  { %6352 = vmatpush2.bf16.msra.mxu0 %v8163_v36  ;;  %6393 = vmatpush2.bf16.msra.mxu1 %v8166_v52  ;;  %v8232_v36 = vld [vmem:[#allocation19 + $0x698] ss:$28 sps:$4 sm:$0xff]   ;;  %v8237_v52 = vld [vmem:[#allocation19 + $0x2e4] ss:$28 sps:$4 sm:$0xff]  }
 0x5a3   :  { %6353 = vmatprep.subr.bf16.mxu0 %v8171_v53  ;;  %6394 = vmatprep.subr.bf16.mxu1 %v8174_v16  ;;  %v8240_v53 = vld [vmem:[#allocation19 + $0x664] ss:$28 sps:$4 sm:$0xff]  }
 0x5a4   :  { %v8235_v16 = vld [vmem:[#allocation19 + $0x2e0] ss:$28 sps:$4 sm:$0xff]  }
 0x5a6   :  { %6354 = vmatpush2.bf16.msra.mxu0 %v8169_v3  ;;  %6395 = vmatpush2.bf16.msra.mxu1 %v8172_v4  ;;  %v8246_v3 = vld [vmem:[#allocation19 + $0x62c] ss:$28 sps:$4 sm:$0xff]  }
 0x5a7   :  { %6405 = vmatprep.subr.bf16.mxu0 %v8177_v8  ;;  %6446 = vmatprep.subr.bf16.mxu1 %v8180_v9  ;;  %v8241_v4 = vld [vmem:[#allocation19 + $0x2a8] ss:$28 sps:$4 sm:$0xff]   ;;  %v8249_v9 = vld [vmem:[#allocation19 + $0x274] ss:$28 sps:$4 sm:$0xff]  }
 0x5a8   :  { %v8244_v8 = vld [vmem:[#allocation19 + $0x628] ss:$28 sps:$4 sm:$0xff]  }
 0x5a9   :  { %6356 = vmatmul.mubr.bf16.vlgmr.msra.gmra.mxu0 %v9294_v11  ;;  %6397 = vmatmul.mubr.bf16.vlgmr.msra.gmra.mxu1 %v9296_v12 }
 0x5aa   :  { %6406 = vmatpush1.bf16.msra.mxu0 %v8175_v10  ;;  %6437 = vmatprep.mubr.bf16.mxu0 %v9270_v34  ;;  %v8250_v10 = vld [vmem:[#allocation19 + $0x5f0] ss:$28 sps:$4 sm:$0xff]  }
 0x5ab   :  { %6447 = vmatpush1.bf16.msra.mxu1 %v8178_v5  ;;  %6478 = vmatprep.mubr.bf16.mxu1 %v9272_v35  ;;  %v8255_v5 = vld [vmem:[#allocation19 + $0x23c] ss:$28 sps:$4 sm:$0xff]  }
 0x5ac   :  { %6407 = vmatprep.subr.bf16.mxu0 %v8183_v31  ;;  %6448 = vmatprep.subr.bf16.mxu1 %v8186_v15  ;;  %v8258_v31 = vld [vmem:[#allocation19 + $0x5bc] ss:$28 sps:$4 sm:$0xff]  }
 0x5ad   :  { %v8253_v15 = vld [vmem:[#allocation19 + $0x238] ss:$28 sps:$4 sm:$0xff]  }
 0x5ae   :  { %6408 = vmatpush1.bf16.msra.mxu0 %v8181_v42  ;;  %v8256_v42 = vld [vmem:[#allocation19 + $0x5b8] ss:$28 sps:$4 sm:$0xff]  }
 0x5af   :  { %6449 = vmatpush1.bf16.msra.mxu1 %v8184_v21  ;;  %6409 = vmatprep.subr.bf16.mxu0 %v8189_v6  ;;  %v8261_v21 = vld [vmem:[#allocation19 + $0x204] ss:$28 sps:$4 sm:$0xff]  }
 0x5b0   :  { %6450 = vmatprep.subr.bf16.mxu1 %v8192_v17  ;;  %v8264_v6 = vld [vmem:[#allocation19 + $0x584] ss:$28 sps:$4 sm:$0xff]  }
 0x5b1   :  { %v8259_v17 = vld [vmem:[#allocation19 + $0x200] ss:$28 sps:$4 sm:$0xff]  }
 0x5b2   :  { %6410 = vmatpush1.bf16.msra.mxu0 %v8187_v48  ;;  %v8262_v48 = vld [vmem:[#allocation19 + $0x580] ss:$28 sps:$4 sm:$0xff]  }
 0x5b3   :  { %6451 = vmatpush1.bf16.msra.mxu1 %v8190_v49  ;;  %6411 = vmatprep.subr.bf16.mxu0 %v8195_v50  ;;  %v8267_v49 = vld [vmem:[#allocation19 + $0x1cc] ss:$28 sps:$4 sm:$0xff]  }
 0x5b4   :  { %6452 = vmatprep.subr.bf16.mxu1 %v8198_v54  ;;  %v8270_v50 = vld [vmem:[#allocation19 + $0x54c] ss:$28 sps:$4 sm:$0xff]  }
 0x5b5   :  { %v8265_v54 = vld [vmem:[#allocation19 + $0x1c8] ss:$28 sps:$4 sm:$0xff]  }
 0x5b6   :  { %6412 = vmatpush1.bf16.msra.mxu0 %v8193_v25  ;;  %v8268_v25 = vld [vmem:[#allocation19 + $0x548] ss:$28 sps:$4 sm:$0xff]  }
 0x5b7   :  { %6453 = vmatpush1.bf16.msra.mxu1 %v8196_v27  ;;  %6413 = vmatprep.subr.bf16.mxu0 %v8201_v28  ;;  %v8273_v27 = vld [vmem:[#allocation19 + $0x894] ss:$28 sps:$4 sm:$0xff]  }
 0x5b8   :  { %6454 = vmatprep.subr.bf16.mxu1 %v8204_v29  ;;  %v8276_v28 = vld [vmem:[#allocation19 + $0xc14] ss:$28 sps:$4 sm:$0xff]  }
 0x5b9   :  { %v8271_v29 = vld [vmem:[#allocation19 + $0x890] ss:$28 sps:$4 sm:$0xff]  }
 0x5ba   :  { %6414 = vmatpush1.bf16.msra.mxu0 %v8199_v41  ;;  %v8274_v41 = vld [vmem:[#allocation19 + $0xc10] ss:$28 sps:$4 sm:$0xff]  }
 0x5bb   :  { %6455 = vmatpush1.bf16.msra.mxu1 %v8202_v7  ;;  %6415 = vmatprep.subr.bf16.mxu0 %v8207_v18  ;;  %v8279_v7 = vld [vmem:[#allocation19 + $0x85c] ss:$28 sps:$4 sm:$0xff]  }
 0x5bc   :  { %6456 = vmatprep.subr.bf16.mxu1 %v8210_v13  ;;  %v8282_v18 = vld [vmem:[#allocation19 + $0xbdc] ss:$28 sps:$4 sm:$0xff]  }
 0x5bd   :  { %v8277_v13 = vld [vmem:[#allocation19 + $0x858] ss:$28 sps:$4 sm:$0xff]  }
 0x5be   :  { %6416 = vmatpush1.bf16.msra.mxu0 %v8205_v19  ;;  %v8280_v19 = vld [vmem:[#allocation19 + $0xbd8] ss:$28 sps:$4 sm:$0xff]  }
 0x5bf   :  { %6457 = vmatpush1.bf16.msra.mxu1 %v8208_v20  ;;  %6417 = vmatprep.subr.bf16.mxu0 %v8213_v24  ;;  %v8285_v20 = vld [vmem:[#allocation19 + $0x824] ss:$28 sps:$4 sm:$0xff]  }
 0x5c0   :  { %6458 = vmatprep.subr.bf16.mxu1 %v8216_v1  ;;  %v8288_v24 = vld [vmem:[#allocation19 + $0xba4] ss:$28 sps:$4 sm:$0xff]  }
 0x5c1   :  { %v8283_v1 = vld [vmem:[#allocation19 + $0x820] ss:$28 sps:$4 sm:$0xff]  }
 0x5c2   :  { %6418 = vmatpush1.bf16.msra.mxu0 %v8211_v43  ;;  %v8286_v43 = vld [vmem:[#allocation19 + $0xba0] ss:$28 sps:$4 sm:$0xff]  }
 0x5c3   :  { %6459 = vmatpush1.bf16.msra.mxu1 %v8214_v38  ;;  %6419 = vmatprep.subr.bf16.mxu0 %v8219_v39  ;;  %v8291_v38 = vld [vmem:[#allocation19 + $0x7ec] ss:$28 sps:$4 sm:$0xff]  }
 0x5c4   :  { %6460 = vmatprep.subr.bf16.mxu1 %v8222_v40  ;;  %v8294_v39 = vld [vmem:[#allocation19 + $0xb6c] ss:$28 sps:$4 sm:$0xff]  }
 0x5c5   :  { %v8289_v40 = vld [vmem:[#allocation19 + $0x7e8] ss:$28 sps:$4 sm:$0xff]  }
 0x5c6   :  { %6420 = vmatpush1.bf16.msra.mxu0 %v8217_v44  ;;  %v8292_v44 = vld [vmem:[#allocation19 + $0xb68] ss:$28 sps:$4 sm:$0xff]  }
 0x5c7   :  { %6461 = vmatpush1.bf16.msra.mxu1 %v8220_v47  ;;  %6421 = vmatprep.subr.bf16.mxu0 %v8225_v51  ;;  %v8297_v47 = vld [vmem:[#allocation19 + $0x7b4] ss:$28 sps:$4 sm:$0xff]  }
 0x5c8   :  { %6462 = vmatprep.subr.bf16.mxu1 %v8228_v55  ;;  %v8300_v51 = vld [vmem:[#allocation19 + $0xb34] ss:$28 sps:$4 sm:$0xff]  }
 0x5c9   :  { %v8295_v55 = vld [vmem:[#allocation19 + $0x7b0] ss:$28 sps:$4 sm:$0xff]  }
 0x5ca   :  { %6422 = vmatpush2.bf16.msra.mxu0 %v8223_v56  ;;  %v8298_v56 = vld [vmem:[#allocation19 + $0xb30] ss:$28 sps:$4 sm:$0xff]  }
 0x5cb   :  { %6463 = vmatpush2.bf16.msra.mxu1 %v8226_v58  ;;  %6423 = vmatprep.subr.bf16.mxu0 %v8231_v59  ;;  %v8303_v58 = vld [vmem:[#allocation19 + $0x77c] ss:$28 sps:$4 sm:$0xff]  }
 0x5cc   :  { %6464 = vmatprep.subr.bf16.mxu1 %v8234_v60  ;;  %v8306_v59 = vld [vmem:[#allocation19 + $0xafc] ss:$28 sps:$4 sm:$0xff]  }
 0x5cd   :  { %v8301_v60 = vld [vmem:[#allocation19 + $0x778] ss:$28 sps:$4 sm:$0xff]  }
 0x5ce   :  { %6424 = vmatpush2.bf16.msra.mxu0 %v8229_v62  ;;  %v8304_v62 = vld [vmem:[#allocation19 + $0xaf8] ss:$28 sps:$4 sm:$0xff]  }
 0x5cf   :  { %6465 = vmatpush2.bf16.msra.mxu1 %v8232_v36  ;;  %6425 = vmatprep.subr.bf16.mxu0 %v8237_v52  ;;  %v8309_v36 = vld [vmem:[#allocation19 + $0x744] ss:$28 sps:$4 sm:$0xff]  }
 0x5d0   :  { %6466 = vmatprep.subr.bf16.mxu1 %v8240_v53  ;;  %v8312_v52 = vld [vmem:[#allocation19 + $0xac4] ss:$28 sps:$4 sm:$0xff]  }
 0x5d1   :  { %v8307_v53 = vld [vmem:[#allocation19 + $0x740] ss:$28 sps:$4 sm:$0xff]  }
 0x5d2   :  { %6426 = vmatpush2.bf16.msra.mxu0 %v8235_v16  ;;  %v8310_v16 = vld [vmem:[#allocation19 + $0xac0] ss:$28 sps:$4 sm:$0xff]  }
 0x5d3   :  { %6467 = vmatpush2.bf16.msra.mxu1 %v8238_v26  ;;  %6427 = vmatprep.subr.bf16.mxu0 %v8243_v30  ;;  %v8315_v26 = vld [vmem:[#allocation19 + $0x70c] ss:$28 sps:$4 sm:$0xff]  }
 0x5d4   :  { %6468 = vmatprep.subr.bf16.mxu1 %v8246_v3  ;;  %v8318_v30 = vld [vmem:[#allocation19 + $0xa8c] ss:$28 sps:$4 sm:$0xff]  }
 0x5d5   :  { %v8313_v3 = vld [vmem:[#allocation19 + $0x708] ss:$28 sps:$4 sm:$0xff]  }
 0x5d6   :  { %6428 = vmatpush2.bf16.msra.mxu0 %v8241_v4  ;;  %v8316_v4 = vld [vmem:[#allocation19 + $0xa88] ss:$28 sps:$4 sm:$0xff]  }
 0x5d7   :  { %6469 = vmatpush2.bf16.msra.mxu1 %v8244_v8  ;;  %6429 = vmatprep.subr.bf16.mxu0 %v8249_v9  ;;  %v8321_v8 = vld [vmem:[#allocation19 + $0xa54] ss:$28 sps:$4 sm:$0xff]  }
 0x5d8   :  { %6470 = vmatprep.subr.bf16.mxu1 %v8252_v14  ;;  %v8324_v9 = vld [vmem:[#allocation19 + $0xdd4] ss:$28 sps:$4 sm:$0xff]  }
 0x5d9   :  { %v8319_v14 = vld [vmem:[#allocation19 + $0xa50] ss:$28 sps:$4 sm:$0xff]  }
 0x5da   :  { %6430 = vmatpush2.bf16.msra.mxu0 %v8247_v2  ;;  %v8322_v2 = vld [vmem:[#allocation19 + $0xdd0] ss:$28 sps:$4 sm:$0xff]  }
 0x5db   :  { %6471 = vmatpush2.bf16.msra.mxu1 %v8250_v10  ;;  %6431 = vmatprep.subr.bf16.mxu0 %v8255_v5  ;;  %v8327_v10 = vld [vmem:[#allocation19 + $0xa1c] ss:$28 sps:$4 sm:$0xff]  }
 0x5dc   :  { %6472 = vmatprep.subr.bf16.mxu1 %v8258_v31  ;;  %v8330_v5 = vld [vmem:[#allocation19 + $0xd9c] ss:$28 sps:$4 sm:$0xff]  }
 0x5dd   :  { %v8325_v31 = vld [vmem:[#allocation19 + $0xa18] ss:$28 sps:$4 sm:$0xff]  }
 0x5de   :  { %6432 = vmatpush2.bf16.msra.mxu0 %v8253_v15  ;;  %v8328_v15 = vld [vmem:[#allocation19 + $0xd98] ss:$28 sps:$4 sm:$0xff]  }
 0x5df   :  { %6473 = vmatpush2.bf16.msra.mxu1 %v8256_v42  ;;  %6433 = vmatprep.subr.bf16.mxu0 %v8261_v21  ;;  %v8333_v42 = vld [vmem:[#allocation19 + $0x9e4] ss:$28 sps:$4 sm:$0xff]  }
 0x5e0   :  { %6474 = vmatprep.subr.bf16.mxu1 %v8264_v6  ;;  %v8336_v21 = vld [vmem:[#allocation19 + $0xd64] ss:$28 sps:$4 sm:$0xff]  }
 0x5e1   :  { %v8331_v6 = vld [vmem:[#allocation19 + $0x9e0] ss:$28 sps:$4 sm:$0xff]  }
 0x5e2   :  { %6434 = vmatpush2.bf16.msra.mxu0 %v8259_v17  ;;  %v8334_v17 = vld [vmem:[#allocation19 + $0xd60] ss:$28 sps:$4 sm:$0xff]  }
 0x5e3   :  { %6475 = vmatpush2.bf16.msra.mxu1 %v8262_v48  ;;  %6435 = vmatprep.subr.bf16.mxu0 %v8267_v49  ;;  %v8339_v48 = vld [vmem:[#allocation19 + $0x9ac] ss:$28 sps:$4 sm:$0xff]  }
 0x5e4   :  { %6476 = vmatprep.subr.bf16.mxu1 %v8270_v50  ;;  %v8342_v49 = vld [vmem:[#allocation19 + $0xd2c] ss:$28 sps:$4 sm:$0xff]  }
 0x5e5   :  { %v8337_v50 = vld [vmem:[#allocation19 + $0x9a8] ss:$28 sps:$4 sm:$0xff]  }
 0x5e6   :  { %6436 = vmatpush2.bf16.msra.mxu0 %v8265_v54  ;;  %v8340_v54 = vld [vmem:[#allocation19 + $0xd28] ss:$28 sps:$4 sm:$0xff]  }
 0x5e7   :  { %6477 = vmatpush2.bf16.msra.mxu1 %v8268_v25  ;;  %6487 = vmatprep.subr.bf16.mxu0 %v8273_v27  ;;  %v8345_v25 = vld [vmem:[#allocation19 + $0x974] ss:$28 sps:$4 sm:$0xff]  }
 0x5e8   :  { %6528 = vmatprep.subr.bf16.mxu1 %v8276_v28  ;;  %v8348_v27 = vld [vmem:[#allocation19 + $0xcf4] ss:$28 sps:$4 sm:$0xff]  }
 0x5e9   :  { %6438 = vmatmul.mubr.bf16.vlgmr.msra.gmra.mxu0 %v9274_v45  ;;  %v8343_v28 = vld [vmem:[#allocation19 + $0x970] ss:$28 sps:$4 sm:$0xff]  }
 0x5ea   :  { %6479 = vmatmul.mubr.bf16.vlgmr.msra.gmra.mxu1 %v9276_v46  ;;  %6488 = vmatpush1.bf16.msra.mxu0 %v8271_v29  ;;  %v8346_v29 = vld [vmem:[#allocation19 + $0xcf0] ss:$28 sps:$4 sm:$0xff]  }
 0x5eb   :  { %6519 = vmatprep.mubr.bf16.mxu0 %v9282_v57  ;;  %6529 = vmatpush1.bf16.msra.mxu1 %v8274_v41  ;;  %v8351_v41 = vld [vmem:[#allocation19 + $0x93c] ss:$28 sps:$4 sm:$0xff]  }
 0x5ec   :  { %6560 = vmatprep.mubr.bf16.mxu1 %v9285_v61  ;;  %6489 = vmatprep.subr.bf16.mxu0 %v8279_v7  ;;  %v8354_v7 = vld [vmem:[#allocation19 + $0xcbc] ss:$28 sps:$4 sm:$0xff]  }
 0x5ed   :  { %6530 = vmatprep.subr.bf16.mxu1 %v8282_v18  ;;  %v8349_v18 = vld [vmem:[#allocation19 + $0x938] ss:$28 sps:$4 sm:$0xff]  }
 0x5ee   :  { %6490 = vmatpush1.bf16.msra.mxu0 %v8277_v13  ;;  %v8352_v13 = vld [vmem:[#allocation19 + $0xcb8] ss:$28 sps:$4 sm:$0xff]  }
 0x5ef   :  { %6531 = vmatpush1.bf16.msra.mxu1 %v8280_v19  ;;  %6491 = vmatprep.subr.bf16.mxu0 %v8285_v20  ;;  %v8357_v19 = vld [vmem:[#allocation19 + $0x904] ss:$28 sps:$4 sm:$0xff]  }
 0x5f0   :  { %6532 = vmatprep.subr.bf16.mxu1 %v8288_v24  ;;  %v8360_v20 = vld [vmem:[#allocation19 + $0xc84] ss:$28 sps:$4 sm:$0xff]  }
 0x5f1   :  { %v8355_v24 = vld [vmem:[#allocation19 + $0x900] ss:$28 sps:$4 sm:$0xff]  }
 0x5f2   :  { %6492 = vmatpush1.bf16.msra.mxu0 %v8283_v1  ;;  %v8358_v1 = vld [vmem:[#allocation19 + $0xc80] ss:$28 sps:$4 sm:$0xff]  }
 0x5f3   :  { %6533 = vmatpush1.bf16.msra.mxu1 %v8286_v43  ;;  %6493 = vmatprep.subr.bf16.mxu0 %v8291_v38  ;;  %v8363_v43 = vld [vmem:[#allocation19 + $0x8cc] ss:$28 sps:$4 sm:$0xff]  }
 0x5f4   :  { %6534 = vmatprep.subr.bf16.mxu1 %v8294_v39  ;;  %v8366_v38 = vld [vmem:[#allocation19 + $0xc4c] ss:$28 sps:$4 sm:$0xff]  }
 0x5f5   :  { %v8361_v39 = vld [vmem:[#allocation19 + $0x8c8] ss:$28 sps:$4 sm:$0xff]  }
 0x5f6   :  { %6494 = vmatpush1.bf16.msra.mxu0 %v8289_v40  ;;  %v8364_v40 = vld [vmem:[#allocation19 + $0xc48] ss:$28 sps:$4 sm:$0xff]  }
 0x5f7   :  { %6535 = vmatpush1.bf16.msra.mxu1 %v8292_v44  ;;  %6495 = vmatprep.subr.bf16.mxu0 %v8297_v47  ;;  %v8369_v44 = vld [vmem:[#allocation19 + $0x19c] ss:$28 sps:$4 sm:$0xff]  }
 0x5f8   :  { %6536 = vmatprep.subr.bf16.mxu1 %v8300_v51  ;;  %v8372_v47 = vld [vmem:[#allocation19 + $0x51c] ss:$28 sps:$4 sm:$0xff]  }
 0x5f9   :  { %v8367_v51 = vld [vmem:[#allocation19 + $0x198] ss:$28 sps:$4 sm:$0xff]  }
 0x5fa   :  { %6496 = vmatpush1.bf16.msra.mxu0 %v8295_v55  ;;  %v8370_v55 = vld [vmem:[#allocation19 + $0x518] ss:$28 sps:$4 sm:$0xff]  }
 0x5fb   :  { %6537 = vmatpush1.bf16.msra.mxu1 %v8298_v56  ;;  %6497 = vmatprep.subr.bf16.mxu0 %v8303_v58  ;;  %v8375_v56 = vld [vmem:[#allocation19 + $0x164] ss:$28 sps:$4 sm:$0xff]  }
 0x5fc   :  { %6538 = vmatprep.subr.bf16.mxu1 %v8306_v59 }
 0x5fe   :  { %6498 = vmatpush1.bf16.msra.mxu0 %v8301_v60  ;;  %v8378_v60 = vld [vmem:[#allocation19 + $0x4e4] ss:$28 sps:$4 sm:$0xff]  }
 0x5ff   :  { %6539 = vmatpush1.bf16.msra.mxu1 %v8304_v62  ;;  %6499 = vmatprep.subr.bf16.mxu0 %v8309_v36  ;;  %v8373_v62 = vld [vmem:[#allocation19 + $0x160] ss:$28 sps:$4 sm:$0xff]  }
 0x600   :  { %6540 = vmatprep.subr.bf16.mxu1 %v8312_v52 }
 0x602   :  { %6500 = vmatpush1.bf16.msra.mxu0 %v8307_v53  ;;  %v8376_v53 = vld [vmem:[#allocation19 + $0x4e0] ss:$28 sps:$4 sm:$0xff]  }
 0x603   :  { %6541 = vmatpush1.bf16.msra.mxu1 %v8310_v16  ;;  %6501 = vmatprep.subr.bf16.mxu0 %v8315_v26  ;;  %v8381_v16 = vld [vmem:[#allocation19 + $0x12c] ss:$28 sps:$4 sm:$0xff]  }
 0x604   :  { %6542 = vmatprep.subr.bf16.mxu1 %v8318_v30  ;;  %v8384_v26 = vld [vmem:[#allocation19 + $0x4ac] ss:$28 sps:$4 sm:$0xff]  }
 0x606   :  { %6502 = vmatpush1.bf16.msra.mxu0 %v8313_v3 }
 0x607   :  { %6543 = vmatpush1.bf16.msra.mxu1 %v8316_v4  ;;  %6503 = vmatprep.subr.bf16.mxu0 %v8321_v8  ;;  %v8379_v4 = vld [vmem:[#allocation19 + $0x128] ss:$28 sps:$4 sm:$0xff]  }
 0x608   :  { %6544 = vmatprep.subr.bf16.mxu1 %v8324_v9 }
 0x60a   :  { %6504 = vmatpush2.bf16.msra.mxu0 %v8319_v14  ;;  %v8382_v14 = vld [vmem:[#allocation19 + $0x4a8] ss:$28 sps:$4 sm:$0xff]  }
 0x60b   :  { %6545 = vmatpush2.bf16.msra.mxu1 %v8322_v2  ;;  %6505 = vmatprep.subr.bf16.mxu0 %v8327_v10  ;;  %v8387_v2 = vld [vmem:[#allocation19 + $0xf4] ss:$28 sps:$4 sm:$0xff]  }
 0x60c   :  { %6546 = vmatprep.subr.bf16.mxu1 %v8330_v5  ;;  %v8390_v10 = vld [vmem:[#allocation19 + $0x474] ss:$28 sps:$4 sm:$0xff]  }
 0x60d   :  { %v8385_v5 = vld [vmem:[#allocation19 + $0xf0] ss:$28 sps:$4 sm:$0xff]  }
 0x60e   :  { %6506 = vmatpush2.bf16.msra.mxu0 %v8325_v31  ;;  %v8388_v31 = vld [vmem:[#allocation19 + $0x470] ss:$28 sps:$4 sm:$0xff]  }
 0x60f   :  { %6547 = vmatpush2.bf16.msra.mxu1 %v8328_v15  ;;  %6507 = vmatprep.subr.bf16.mxu0 %v8333_v42  ;;  %v8393_v15 = vld [vmem:[#allocation19 + $0xbc] ss:$28 sps:$4 sm:$0xff]  }
 0x610   :  { %6548 = vmatprep.subr.bf16.mxu1 %v8336_v21  ;;  %v8396_v42 = vld [vmem:[#allocation19 + $0x43c] ss:$28 sps:$4 sm:$0xff]  }
 0x611   :  { %v8391_v21 = vld [vmem:[#allocation19 + $0xb8] ss:$28 sps:$4 sm:$0xff]  }
 0x612   :  { %6508 = vmatpush2.bf16.msra.mxu0 %v8331_v6  ;;  %v8394_v6 = vld [vmem:[#allocation19 + $0x438] ss:$28 sps:$4 sm:$0xff]  }
 0x613   :  { %6549 = vmatpush2.bf16.msra.mxu1 %v8334_v17  ;;  %6509 = vmatprep.subr.bf16.mxu0 %v8339_v48  ;;  %v8399_v17 = vld [vmem:[#allocation19 + $0x84] ss:$28 sps:$4 sm:$0xff]  }
 0x614   :  { %6550 = vmatprep.subr.bf16.mxu1 %v8342_v49  ;;  %v8402_v48 = vld [vmem:[#allocation19 + $0x404] ss:$28 sps:$4 sm:$0xff]  }
 0x615   :  { %v8397_v49 = vld [vmem:[#allocation19 + $0x80] ss:$28 sps:$4 sm:$0xff]  }
 0x616   :  { %6510 = vmatpush2.bf16.msra.mxu0 %v8337_v50  ;;  %v8400_v50 = vld [vmem:[#allocation19 + $0x400] ss:$28 sps:$4 sm:$0xff]  }
 0x617   :  { %6551 = vmatpush2.bf16.msra.mxu1 %v8340_v54  ;;  %6511 = vmatprep.subr.bf16.mxu0 %v8345_v25  ;;  %v8405_v54 = vld [vmem:[#allocation19 + $0x4c] ss:$28 sps:$4 sm:$0xff]  }
 0x618   :  { %6552 = vmatprep.subr.bf16.mxu1 %v8348_v27  ;;  %v8408_v25 = vld [vmem:[#allocation19 + $0x3cc] ss:$28 sps:$4 sm:$0xff]  }
 0x619   :  { %v8403_v27 = vld [vmem:[#allocation19 + $0x48] ss:$28 sps:$4 sm:$0xff]  }
 0x61a   :  { %6512 = vmatpush2.bf16.msra.mxu0 %v8343_v28  ;;  %v8406_v28 = vld [vmem:[#allocation19 + $0x3c8] ss:$28 sps:$4 sm:$0xff]  }
 0x61b   :  { %6553 = vmatpush2.bf16.msra.mxu1 %v8346_v29  ;;  %6513 = vmatprep.subr.bf16.mxu0 %v8351_v41  ;;  %v8411_v29 = vld [vmem:[#allocation19 + $0x14] ss:$28 sps:$4 sm:$0xff]  }
 0x61c   :  { %6554 = vmatprep.subr.bf16.mxu1 %v8354_v7  ;;  %v8414_v41 = vld [vmem:[#allocation19 + $0x394] ss:$28 sps:$4 sm:$0xff]  }
 0x61d   :  { %v8409_v7 = vld [vmem:[#allocation19 + $0x10] ss:$28 sps:$4 sm:$0xff]  }
 0x61e   :  { %6514 = vmatpush2.bf16.msra.mxu0 %v8349_v18  ;;  %v8412_v18 = vld [vmem:[#allocation19 + $0x390] ss:$28 sps:$4 sm:$0xff]  }
 0x61f   :  { %6555 = vmatpush2.bf16.msra.mxu1 %v8352_v13  ;;  %6515 = vmatprep.subr.bf16.mxu0 %v8357_v19  ;;  %v8417_v13 = vld [vmem:[#allocation19 + $0x35c] ss:$28 sps:$4 sm:$0xff]  }
 0x620   :  { %6556 = vmatprep.subr.bf16.mxu1 %v8360_v20  ;;  %v8420_v19 = vld [vmem:[#allocation19 + $0x6dc] ss:$28 sps:$4 sm:$0xff]  }
 0x621   :  { %v8415_v20 = vld [vmem:[#allocation19 + $0x358] ss:$28 sps:$4 sm:$0xff]  }
 0x622   :  { %6516 = vmatpush2.bf16.msra.mxu0 %v8355_v24  ;;  %v8418_v24 = vld [vmem:[#allocation19 + $0x6d8] ss:$28 sps:$4 sm:$0xff]  }
 0x623   :  { %6557 = vmatpush2.bf16.msra.mxu1 %v8358_v1  ;;  %6517 = vmatprep.subr.bf16.mxu0 %v8363_v43  ;;  %v8423_v1 = vld [vmem:[#allocation19 + $0x324] ss:$28 sps:$4 sm:$0xff]  }
 0x624   :  { %6558 = vmatprep.subr.bf16.mxu1 %v8366_v38  ;;  %v8426_v43 = vld [vmem:[#allocation19 + $0x6a4] ss:$28 sps:$4 sm:$0xff]  }
 0x625   :  { %v8421_v38 = vld [vmem:[#allocation19 + $0x320] ss:$28 sps:$4 sm:$0xff]  }
 0x626   :  { %6518 = vmatpush2.bf16.msra.mxu0 %v8361_v39  ;;  %v8424_v39 = vld [vmem:[#allocation19 + $0x6a0] ss:$28 sps:$4 sm:$0xff]  }
 0x627   :  { %6559 = vmatpush2.bf16.msra.mxu1 %v8364_v40  ;;  %6569 = vmatprep.subr.bf16.mxu0 %v8369_v44  ;;  %v8429_v40 = vld [vmem:[#allocation19 + $0x2ec] ss:$28 sps:$4 sm:$0xff]  }
 0x628   :  { %6610 = vmatprep.subr.bf16.mxu1 %v8372_v47  ;;  %v8432_v44 = vld [vmem:[#allocation19 + $0x66c] ss:$28 sps:$4 sm:$0xff]  }
 0x629   :  { %6520 = vmatmul.mubr.bf16.vlgmr.msra.gmra.mxu0 %v9294_v11  ;;  %v9307_v58 = vpop.f32.mrf.mxu0  ;;  %v9309_v59 = vpop.f32.mrf.mxu1  ;;  %v8427_v47 = vld [vmem:[#allocation19 + $0x2e8] ss:$28 sps:$4 sm:$0xff]  }
 0x62a   :  { %6561 = vmatmul.mubr.bf16.vlgmr.msra.gmra.mxu1 %v9296_v12  ;;  %6570 = vmatpush1.bf16.msra.mxu0 %v8367_v51  ;;  %v8430_v51 = vld [vmem:[#allocation19 + $0x668] ss:$28 sps:$4 sm:$0xff]  }
 0x62b   :  { %6601 = vmatprep.mubr.bf16.mxu0 %v9270_v34  ;;  %6611 = vmatpush1.bf16.msra.mxu1 %v8370_v55  ;;  %v9313_v36 = vpop.f32.mrf.mxu0  ;;  %v9315_v52 = vpop.f32.mrf.mxu1  ;;  %v8435_v55 = vld [vmem:[#allocation19 + $0x2b4] ss:$28 sps:$4 sm:$0xff]  }
 0x62c   :  { %6642 = vmatprep.mubr.bf16.mxu1 %v9272_v35  ;;  %6571 = vmatprep.subr.bf16.mxu0 %v8375_v56  ;;  %v8438_v56 = vld [vmem:[#allocation19 + $0x634] ss:$28 sps:$4 sm:$0xff]  }
 0x62d   :  { %6612 = vmatprep.subr.bf16.mxu1 %v8378_v60  ;;  %v6279_v30 = vpop.f32.mrf.mxu0  ;;  %v6320_v3 = vpop.f32.mrf.mxu1  ;;  %v8433_v60 = vld [vmem:[#allocation19 + $0x2b0] ss:$28 sps:$4 sm:$0xff]  }
 0x62e   :  { %6572 = vmatpush1.bf16.msra.mxu0 %v8373_v62  ;;  %v8436_v62 = vld [vmem:[#allocation19 + $0x630] ss:$28 sps:$4 sm:$0xff]   ;;  %v8442_v30 = vld [vmem:[#allocation19 + $0x5f8] ss:$28 sps:$4 sm:$0xff]   ;;  %v8447_v3 = vld [vmem:[#allocation19 + $0x244] ss:$28 sps:$4 sm:$0xff]  }
 0x62f   :  { %6613 = vmatpush1.bf16.msra.mxu1 %v8376_v53  ;;  %v6280_v8 = vpop.f32.mrf.mxu0  ;;  %v6321_v9 = vpop.f32.mrf.mxu1  ;;  %6573 = vmatprep.subr.bf16.mxu0 %v8381_v16  ;;  %v8441_v53 = vld [vmem:[#allocation19 + $0x27c] ss:$28 sps:$4 sm:$0xff]  }
 0x630   :  { %6614 = vmatprep.subr.bf16.mxu1 %v8384_v26  ;;  %v8444_v16 = vld [vmem:[#allocation19 + $0x5fc] ss:$28 sps:$4 sm:$0xff]  }
 0x631   :  { %v8439_v26 = vld [vmem:[#allocation19 + $0x278] ss:$28 sps:$4 sm:$0xff]   ;;  %v8445_v8 = vld [vmem:[#allocation19 + $0x240] ss:$28 sps:$4 sm:$0xff]  }
 0x632   :  { %6574 = vmatpush1.bf16.msra.mxu0 %v8379_v4  ;;  %v8450_v4 = vld [vmem:[#allocation19 + $0x5c4] ss:$28 sps:$4 sm:$0xff]  }
 0x633   :  { %6615 = vmatpush1.bf16.msra.mxu1 %v8382_v14  ;;  %6575 = vmatprep.subr.bf16.mxu0 %v8387_v2  ;;  %v8448_v9 = vld [vmem:[#allocation19 + $0x5c0] ss:$28 sps:$4 sm:$0xff]   ;;  %v8453_v14 = vld [vmem:[#allocation19 + $0x20c] ss:$28 sps:$4 sm:$0xff]  }
 0x634   :  { %6616 = vmatprep.subr.bf16.mxu1 %v8390_v10  ;;  %v8456_v2 = vld [vmem:[#allocation19 + $0x58c] ss:$28 sps:$4 sm:$0xff]   ;;  %v9318_v10 = vld [vmem:[#allocation21] sm:$0xff] }
 0x636   :  { %6576 = vmatpush1.bf16.msra.mxu0 %v8385_v5  ;;  %v8451_v5 = vld [vmem:[#allocation19 + $0x208] ss:$28 sps:$4 sm:$0xff]  }
 0x637   :  { %6617 = vmatpush1.bf16.msra.mxu1 %v8388_v31  ;;  %6577 = vmatprep.subr.bf16.mxu0 %v8393_v15  ;;  %v8454_v31 = vld [vmem:[#allocation19 + $0x588] ss:$28 sps:$4 sm:$0xff]   ;;  %v8459_v15 = vld [vmem:[#allocation19 + $0x1d4] ss:$28 sps:$4 sm:$0xff]  }
 0x638   :  { %6618 = vmatprep.subr.bf16.mxu1 %v8396_v42  ;;  %v3905_v42 = vrot.slane %v9318_v10, %v9091_v22  ;;  %v8466_v22 = vld [vmem:[#allocation19 + $0xc18] ss:$28 sps:$4 sm:$0xff]  }
 0x63a   :  { %6578 = vmatpush1.bf16.msra.mxu0 %v8391_v21  ;;  %v8462_v21 = vld [vmem:[#allocation19 + $0x554] ss:$28 sps:$4 sm:$0xff]  }
 0x63b   :  { %6619 = vmatpush1.bf16.msra.mxu1 %v8394_v6  ;;  %6579 = vmatprep.subr.bf16.mxu0 %v8399_v17  ;;  %v3909_v6 = vrot.slane %v9318_v10, %v9094_v23  ;;  %v8457_v17 = vld [vmem:[#allocation19 + $0x1d0] ss:$28 sps:$4 sm:$0xff]   ;;  %v8471_v23 = vld [vmem:[#allocation19 + $0x864] ss:$28 sps:$4 sm:$0xff]  }
 0x63c   :  { %6620 = vmatprep.subr.bf16.mxu1 %v8402_v48  ;;  %v8460_v48 = vld [vmem:[#allocation19 + $0x550] ss:$28 sps:$4 sm:$0xff]  }
 0x63e   :  { %6580 = vmatpush1.bf16.msra.mxu0 %v8397_v49  ;;  %v8465_v49 = vld [vmem:[#allocation19 + $0x89c] ss:$28 sps:$4 sm:$0xff]  }
 0x63f   :  { %6621 = vmatpush1.bf16.msra.mxu1 %v8400_v50  ;;  %6581 = vmatprep.subr.bf16.mxu0 %v8405_v54  ;;  %v6276_v50 = vadd.f32 %v9307_v58, %v3905_v42  ;;  %v8468_v54 = vld [vmem:[#allocation19 + $0xc1c] ss:$28 sps:$4 sm:$0xff]   ;;  %v8502_v42 = vld [vmem:[#allocation19 + $0xac8] ss:$28 sps:$4 sm:$0xff]  }
 0x640   :  { %6622 = vmatprep.subr.bf16.mxu1 %v8408_v25  ;;  %v6278_v25 = vadd.f32 %v9313_v36, %v3909_v6  ;;  %v8469_v36 = vld [vmem:[#allocation19 + $0x860] ss:$28 sps:$4 sm:$0xff]   ;;  %v8510_v6 = vld [vmem:[#allocation19 + $0xa94] ss:$28 sps:$4 sm:$0xff]  }
 0x642   :  { %6582 = vmatpush1.bf16.msra.mxu0 %v8403_v27  ;;  %v8463_v27 = vld [vmem:[#allocation19 + $0x898] ss:$28 sps:$4 sm:$0xff]   ;;  %v6319_v58 = vadd.f32 %v9315_v52, %v6278_v25 }
 0x643   :  { %6623 = vmatpush1.bf16.msra.mxu1 %v8406_v28  ;;  %6583 = vmatprep.subr.bf16.mxu0 %v8411_v29  ;;  %v6317_v28 = vadd.f32 %v9309_v59, %v6276_v50  ;;  %v8472_v59 = vld [vmem:[#allocation19 + $0xbe0] ss:$28 sps:$4 sm:$0xff]   ;;  %v8514_v25 = vld [vmem:[#allocation19 + $0xdd8] ss:$28 sps:$4 sm:$0xff]  }
 0x644   :  { %6624 = vmatprep.subr.bf16.mxu1 %v8414_v41  ;;  %v8516_v50 = vld [vmem:[#allocation19 + $0xddc] ss:$28 sps:$4 sm:$0xff]  }
 0x646   :  { %6584 = vmatpush1.bf16.msra.mxu0 %v8409_v7  ;;  %v8474_v7 = vld [vmem:[#allocation19 + $0xbe4] ss:$28 sps:$4 sm:$0xff]  }
 0x647   :  { %6625 = vmatpush1.bf16.msra.mxu1 %v8412_v18  ;;  %6585 = vmatprep.subr.bf16.mxu0 %v8417_v13 }
 0x648   :  { %6626 = vmatprep.subr.bf16.mxu1 %v8420_v19 }
 0x64a   :  { %6586 = vmatpush2.bf16.msra.mxu0 %v8415_v20  ;;  %v8477_v20 = vld [vmem:[#allocation19 + $0x82c] ss:$28 sps:$4 sm:$0xff]  }
 0x64b   :  { %6627 = vmatpush2.bf16.msra.mxu1 %v8418_v24  ;;  %6587 = vmatprep.subr.bf16.mxu0 %v8423_v1 }
 0x64c   :  { %6628 = vmatprep.subr.bf16.mxu1 %v8426_v43  ;;  %v8480_v43 = vld [vmem:[#allocation19 + $0xbac] ss:$28 sps:$4 sm:$0xff]  }
 0x64e   :  { %6588 = vmatpush2.bf16.msra.mxu0 %v8421_v38 }
 0x64f   :  { %6629 = vmatpush2.bf16.msra.mxu1 %v8424_v39  ;;  %6589 = vmatprep.subr.bf16.mxu0 %v8429_v40  ;;  %v8475_v40 = vld [vmem:[#allocation19 + $0x828] ss:$28 sps:$4 sm:$0xff]  }
 0x650   :  { %6630 = vmatprep.subr.bf16.mxu1 %v8432_v44 }
 0x652   :  { %6590 = vmatpush2.bf16.msra.mxu0 %v8427_v47 }
 0x653   :  { %6631 = vmatpush2.bf16.msra.mxu1 %v8430_v51  ;;  %6591 = vmatprep.subr.bf16.mxu0 %v8435_v55  ;;  %v8478_v51 = vld [vmem:[#allocation19 + $0xba8] ss:$28 sps:$4 sm:$0xff]   ;;  %v8483_v55 = vld [vmem:[#allocation19 + $0x7f4] ss:$28 sps:$4 sm:$0xff]  }
 0x654   :  { %6632 = vmatprep.subr.bf16.mxu1 %v8438_v56  ;;  %v8486_v56 = vld [vmem:[#allocation19 + $0xb74] ss:$28 sps:$4 sm:$0xff]  }
 0x656   :  { %6592 = vmatpush2.bf16.msra.mxu0 %v8433_v60  ;;  %v8481_v60 = vld [vmem:[#allocation19 + $0x7f0] ss:$28 sps:$4 sm:$0xff]  }
 0x657   :  { %6633 = vmatpush2.bf16.msra.mxu1 %v8436_v62  ;;  %6593 = vmatprep.subr.bf16.mxu0 %v8441_v53  ;;  %v8484_v62 = vld [vmem:[#allocation19 + $0xb70] ss:$28 sps:$4 sm:$0xff]   ;;  %v8489_v53 = vld [vmem:[#allocation19 + $0x7bc] ss:$28 sps:$4 sm:$0xff]  }
 0x658   :  { %6634 = vmatprep.subr.bf16.mxu1 %v8444_v16  ;;  %v8492_v16 = vld [vmem:[#allocation19 + $0xb3c] ss:$28 sps:$4 sm:$0xff]  }
 0x65a   :  { %6594 = vmatpush2.bf16.msra.mxu0 %v8439_v26  ;;  %v8487_v26 = vld [vmem:[#allocation19 + $0x7b8] ss:$28 sps:$4 sm:$0xff]  }
 0x65b   :  { %6635 = vmatpush2.bf16.msra.mxu1 %v8442_v30  ;;  %6595 = vmatprep.subr.bf16.mxu0 %v8447_v3  ;;  %v8490_v30 = vld [vmem:[#allocation19 + $0xb38] ss:$28 sps:$4 sm:$0xff]   ;;  %v8495_v3 = vld [vmem:[#allocation19 + $0x784] ss:$28 sps:$4 sm:$0xff]  }
 0x65c   :  { %6636 = vmatprep.subr.bf16.mxu1 %v8450_v4  ;;  %v8498_v4 = vld [vmem:[#allocation19 + $0xb04] ss:$28 sps:$4 sm:$0xff]  }
 0x65e   :  { %6596 = vmatpush2.bf16.msra.mxu0 %v8445_v8  ;;  %v8493_v8 = vld [vmem:[#allocation19 + $0x780] ss:$28 sps:$4 sm:$0xff]  }
 0x65f   :  { %6637 = vmatpush2.bf16.msra.mxu1 %v8448_v9  ;;  %6597 = vmatprep.subr.bf16.mxu0 %v8453_v14  ;;  %v8496_v14 = vld [vmem:[#allocation19 + $0xb00] ss:$28 sps:$4 sm:$0xff]  }
 0x660   :  { %6638 = vmatprep.subr.bf16.mxu1 %v8456_v2  ;;  %v8501_v2 = vld [vmem:[#allocation19 + $0x74c] ss:$28 sps:$4 sm:$0xff]  }
 0x662   :  { %6598 = vmatpush2.bf16.msra.mxu0 %v8451_v5  ;;  %v8504_v5 = vld [vmem:[#allocation19 + $0xacc] ss:$28 sps:$4 sm:$0xff]  }
 0x663   :  { %6639 = vmatpush2.bf16.msra.mxu1 %v8454_v31  ;;  %6599 = vmatprep.subr.bf16.mxu0 %v8459_v15  ;;  %v8499_v15 = vld [vmem:[#allocation19 + $0x748] ss:$28 sps:$4 sm:$0xff]  }
 0x664   :  { %6640 = vmatprep.subr.bf16.mxu1 %v8462_v21  ;;  %v8507_v21 = vld [vmem:[#allocation19 + $0x714] ss:$28 sps:$4 sm:$0xff]  }
 0x666   :  { %6600 = vmatpush2.bf16.msra.mxu0 %v8457_v17  ;;  %v8505_v17 = vld [vmem:[#allocation19 + $0x710] ss:$28 sps:$4 sm:$0xff]  }
 0x667   :  { %6641 = vmatpush2.bf16.msra.mxu1 %v8460_v48  ;;  %6651 = vmatprep.subr.bf16.mxu0 %v8465_v49  ;;  %v8508_v48 = vld [vmem:[#allocation19 + $0xa90] ss:$28 sps:$4 sm:$0xff]   ;;  %v8513_v49 = vld [vmem:[#allocation19 + $0xa5c] ss:$28 sps:$4 sm:$0xff]  }
 0x668   :  { %6692 = vmatprep.subr.bf16.mxu1 %v8468_v54  ;;  %v8511_v54 = vld [vmem:[#allocation19 + $0xa58] ss:$28 sps:$4 sm:$0xff]  }
 0x669   :  { %v6357_v29 = vpop.f32.mrf.mxu0  ;;  %v6398_v41 = vpop.f32.mrf.mxu1  ;;  %6602 = vmatmul.mubr.bf16.vlgmr.msra.gmra.mxu0 %v9274_v45 }
 0x66a   :  { %v6358_v18 = vadd.f32 %v6357_v29, %v6317_v28  ;;  %6643 = vmatmul.mubr.bf16.vlgmr.msra.gmra.mxu1 %v9276_v46  ;;  %6652 = vmatpush1.bf16.msra.mxu0 %v8463_v27  ;;  %v8519_v27 = vld [vmem:[#allocation19 + $0xa24] ss:$28 sps:$4 sm:$0xff]   ;;  %v8525_v29 = vld [vmem:[#allocation19 + $0x9ec] ss:$28 sps:$4 sm:$0xff]  }
 0x66b   :  { %6683 = vmatprep.mubr.bf16.mxu0 %v9282_v57  ;;  %6693 = vmatpush1.bf16.msra.mxu1 %v8466_v22  ;;  %v6359_v13 = vpop.f32.mrf.mxu0  ;;  %v6400_v19 = vpop.f32.mrf.mxu1  ;;  %v8522_v22 = vld [vmem:[#allocation19 + $0xda4] ss:$28 sps:$4 sm:$0xff]  }
 0x66c   :  { %v6399_v24 = vadd.f32 %v6398_v41, %v6358_v18  ;;  %6724 = vmatprep.mubr.bf16.mxu1 %v9285_v61  ;;  %v6360_v1 = vadd.f32 %v6359_v13, %v6319_v58  ;;  %6653 = vmatprep.subr.bf16.mxu0 %v8471_v23  ;;  %v8517_v28 = vld [vmem:[#allocation19 + $0xa20] ss:$28 sps:$4 sm:$0xff]   ;;  %v8528_v41 = vld [vmem:[#allocation19 + $0xd6c] ss:$28 sps:$4 sm:$0xff]   ;;  %v8531_v18 = vld [vmem:[#allocation19 + $0x9b4] ss:$28 sps:$4 sm:$0xff]  }
 0x66d   :  { %v6361_v38 = vpop.f32.mrf.mxu0  ;;  %v6402_v52 = vpop.f32.mrf.mxu1  ;;  %6694 = vmatprep.subr.bf16.mxu1 %v8474_v7  ;;  %v8520_v23 = vld [vmem:[#allocation19 + $0xda0] ss:$28 sps:$4 sm:$0xff]   ;;  %v8523_v7 = vld [vmem:[#allocation19 + $0x9e8] ss:$28 sps:$4 sm:$0xff]   ;;  %v8529_v13 = vld [vmem:[#allocation19 + $0x9b0] ss:$28 sps:$4 sm:$0xff]  }
 0x66e   :  { %8651 = vtanh.f32 %v6399_v24  ;;  %v6401_v39 = vadd.f32 %v6400_v19, %v6360_v1  ;;  %6654 = vmatpush1.bf16.msra.mxu0 %v8469_v36  ;;  %v8526_v58 = vld [vmem:[#allocation19 + $0xd68] ss:$28 sps:$4 sm:$0xff]   ;;  %v8534_v36 = vld [vmem:[#allocation19 + $0xd34] ss:$28 sps:$4 sm:$0xff]   ;;  %v8541_v52 = vld [vmem:[#allocation19 + $0x940] ss:$28 sps:$4 sm:$0xff]  }
 0x66f   :  { %6695 = vmatpush1.bf16.msra.mxu1 %v8472_v59  ;;  %v6362_v44 = vpop.f32.mrf.mxu0  ;;  %v6403_v47 = vpop.f32.mrf.mxu1  ;;  %6655 = vmatprep.subr.bf16.mxu0 %v8477_v20  ;;  %v8532_v19 = vld [vmem:[#allocation19 + $0xd30] ss:$28 sps:$4 sm:$0xff]   ;;  %v8537_v59 = vld [vmem:[#allocation19 + $0x97c] ss:$28 sps:$4 sm:$0xff]   ;;  %v8546_v38 = vld [vmem:[#allocation19 + $0xcc4] ss:$28 sps:$4 sm:$0xff]  }
 0x670   :  { %8653 = vtanh.f32 %v6401_v39  ;;  %6696 = vmatprep.subr.bf16.mxu1 %v8480_v43  ;;  %v8540_v20 = vld [vmem:[#allocation19 + $0xcfc] ss:$28 sps:$4 sm:$0xff]   ;;  %v8543_v43 = vld [vmem:[#allocation19 + $0x944] ss:$28 sps:$4 sm:$0xff]   ;;  %v8552_v44 = vld [vmem:[#allocation19 + $0xc8c] ss:$28 sps:$4 sm:$0xff]  }
 0x671   :  { %v8535_v24 = vld [vmem:[#allocation19 + $0x978] ss:$28 sps:$4 sm:$0xff]   ;;  %v8544_v39 = vld [vmem:[#allocation19 + $0xcc0] ss:$28 sps:$4 sm:$0xff]   ;;  %v8547_v47 = vld [vmem:[#allocation19 + $0x908] ss:$28 sps:$4 sm:$0xff]  }
 0x672   :  { %6656 = vmatpush1.bf16.msra.mxu0 %v8475_v40  ;;  %v8538_v1 = vld [vmem:[#allocation19 + $0xcf8] ss:$28 sps:$4 sm:$0xff]   ;;  %v8549_v40 = vld [vmem:[#allocation19 + $0x90c] ss:$28 sps:$4 sm:$0xff]  }
 0x673   :  { %6697 = vmatpush1.bf16.msra.mxu1 %v8478_v51  ;;  %6657 = vmatprep.subr.bf16.mxu0 %v8483_v55  ;;  %v8550_v51 = vld [vmem:[#allocation19 + $0xc88] ss:$28 sps:$4 sm:$0xff]   ;;  %v8555_v55 = vld [vmem:[#allocation19 + $0x8d4] ss:$28 sps:$4 sm:$0xff]  }
 0x674   :  { %6698 = vmatprep.subr.bf16.mxu1 %v8486_v56  ;;  %v8558_v56 = vld [vmem:[#allocation19 + $0xc54] ss:$28 sps:$4 sm:$0xff]  }
 0x676   :  { %6658 = vmatpush1.bf16.msra.mxu0 %v8481_v60  ;;  %v8553_v60 = vld [vmem:[#allocation19 + $0x8d0] ss:$28 sps:$4 sm:$0xff]  }
 0x677   :  { %6699 = vmatpush1.bf16.msra.mxu1 %v8484_v62  ;;  %6659 = vmatprep.subr.bf16.mxu0 %v8489_v53  ;;  %v8556_v62 = vld [vmem:[#allocation19 + $0xc50] ss:$28 sps:$4 sm:$0xff]   ;;  %v8559_v53 = vld [vmem:[#allocation19 + $0x360] ss:$28 sps:$4 sm:$0xff]  }
 0x678   :  { %6700 = vmatprep.subr.bf16.mxu1 %v8492_v16  ;;  %v8560_v16 = vld [vmem:[#allocation19 + $0x6e0] ss:$28 sps:$4 sm:$0xff]  }
 0x67a   :  { %6660 = vmatpush1.bf16.msra.mxu0 %v8487_v26  ;;  %v8561_v26 = vld [vmem:[#allocation19 + $0x1a0] ss:$28 sps:$4 sm:$0xff]  }
 0x67b   :  { %v8652_v9 = vpop.eup %8651  ;;  %6701 = vmatpush1.bf16.msra.mxu1 %v8490_v30  ;;  %6661 = vmatprep.subr.bf16.mxu0 %v8495_v3  ;;  %v8562_v30 = vld [vmem:[#allocation19 + $0x520] ss:$28 sps:$4 sm:$0xff]   ;;  %v8563_v3 = vld [vmem:[#allocation19 + $0x328] ss:$28 sps:$4 sm:$0xff]  }
 0x67c   :  { %6900 = vst [vmem:[%s9399_s14] sm:$0xff] %v8652_v9  ;;  %6702 = vmatprep.subr.bf16.mxu1 %v8498_v4 }
 0x67d   :  { %v8654_v31 = vpop.eup %8653 }
 0x67e   :  { %6901 = vst [vmem:[%s9399_s14 + $0x8] sm:$0xff] %v8654_v31  ;;  %6662 = vmatpush1.bf16.msra.mxu0 %v8493_v8  ;;  %v8564_v8 = vld [vmem:[#allocation19 + $0x6a8] ss:$28 sps:$4 sm:$0xff]   ;;  %v8567_v31 = vld [vmem:[#allocation19 + $0x2f0] ss:$28 sps:$4 sm:$0xff]  }
 0x67f   :  { %6703 = vmatpush1.bf16.msra.mxu1 %v8496_v14  ;;  %6663 = vmatprep.subr.bf16.mxu0 %v8501_v2  ;;  %v8565_v14 = vld [vmem:[#allocation19 + $0x168] ss:$28 sps:$4 sm:$0xff]  }
 0x680   :  { %6704 = vmatprep.subr.bf16.mxu1 %v8504_v5  ;;  %v8566_v5 = vld [vmem:[#allocation19 + $0x4e8] ss:$28 sps:$4 sm:$0xff]  }
 0x682   :  { %6664 = vmatpush1.bf16.msra.mxu0 %v8499_v15 }
 0x683   :  { %6705 = vmatpush1.bf16.msra.mxu1 %v8502_v42  ;;  %6665 = vmatprep.subr.bf16.mxu0 %v8507_v21  ;;  %v8568_v42 = vld [vmem:[#allocation19 + $0x670] ss:$28 sps:$4 sm:$0xff]  }
 0x684   :  { %6706 = vmatprep.subr.bf16.mxu1 %v8510_v6 }
 0x686   :  { %6666 = vmatpush1.bf16.msra.mxu0 %v8505_v17  ;;  %v8569_v17 = vld [vmem:[#allocation19 + $0x130] ss:$28 sps:$4 sm:$0xff]  }
 0x687   :  { %6707 = vmatpush1.bf16.msra.mxu1 %v8508_v48  ;;  %6667 = vmatprep.subr.bf16.mxu0 %v8513_v49  ;;  %v8571_v49 = vld [vmem:[#allocation19 + $0x2b8] ss:$28 sps:$4 sm:$0xff]  }
 0x688   :  { %6708 = vmatprep.subr.bf16.mxu1 %v8516_v50 }
 0x68a   :  { %6668 = vmatpush2.bf16.msra.mxu0 %v8511_v54  ;;  %v8572_v54 = vld [vmem:[#allocation19 + $0x638] ss:$28 sps:$4 sm:$0xff]  }
 0x68b   :  { %6709 = vmatpush2.bf16.msra.mxu1 %v8514_v25  ;;  %6669 = vmatprep.subr.bf16.mxu0 %v8519_v27  ;;  %v8573_v25 = vld [vmem:[#allocation19 + $0xf8] ss:$28 sps:$4 sm:$0xff]   ;;  %v8575_v27 = vld [vmem:[#allocation19 + $0x280] ss:$28 sps:$4 sm:$0xff]  }
 0x68c   :  { %6710 = vmatprep.subr.bf16.mxu1 %v8522_v22  ;;  %v8576_v22 = vld [vmem:[#allocation19 + $0x600] ss:$28 sps:$4 sm:$0xff]  }
 0x68e   :  { %6670 = vmatpush2.bf16.msra.mxu0 %v8517_v28  ;;  %v8577_v28 = vld [vmem:[#allocation19 + $0xc0] ss:$28 sps:$4 sm:$0xff]  }
 0x68f   :  { %6711 = vmatpush2.bf16.msra.mxu1 %v8520_v23  ;;  %6671 = vmatprep.subr.bf16.mxu0 %v8525_v29  ;;  %v8578_v23 = vld [vmem:[#allocation19 + $0x440] ss:$28 sps:$4 sm:$0xff]   ;;  %v8579_v29 = vld [vmem:[#allocation19 + $0x248] ss:$28 sps:$4 sm:$0xff]  }
 0x690   :  { %6712 = vmatprep.subr.bf16.mxu1 %v8528_v41  ;;  %v8580_v41 = vld [vmem:[#allocation19 + $0x5c8] ss:$28 sps:$4 sm:$0xff]  }
 0x692   :  { %6672 = vmatpush2.bf16.msra.mxu0 %v8523_v7  ;;  %v8581_v7 = vld [vmem:[#allocation19 + $0x88] ss:$28 sps:$4 sm:$0xff]  }
 0x693   :  { %6713 = vmatpush2.bf16.msra.mxu1 %v8526_v58  ;;  %6673 = vmatprep.subr.bf16.mxu0 %v8531_v18  ;;  %v8582_v58 = vld [vmem:[#allocation19 + $0x408] ss:$28 sps:$4 sm:$0xff]   ;;  %v8583_v18 = vld [vmem:[#allocation19 + $0x210] ss:$28 sps:$4 sm:$0xff]  }
 0x694   :  { %6714 = vmatprep.subr.bf16.mxu1 %v8534_v36  ;;  %v8584_v36 = vld [vmem:[#allocation19 + $0x590] ss:$28 sps:$4 sm:$0xff]  }
 0x696   :  { %6674 = vmatpush2.bf16.msra.mxu0 %v8529_v13  ;;  %v8585_v13 = vld [vmem:[#allocation19 + $0x50] ss:$28 sps:$4 sm:$0xff]  }
 0x697   :  { %6715 = vmatpush2.bf16.msra.mxu1 %v8532_v19  ;;  %6675 = vmatprep.subr.bf16.mxu0 %v8537_v59  ;;  %v8586_v19 = vld [vmem:[#allocation19 + $0x3d0] ss:$28 sps:$4 sm:$0xff]   ;;  %v8587_v59 = vld [vmem:[#allocation19 + $0x1d8] ss:$28 sps:$4 sm:$0xff]  }
 0x698   :  { %6716 = vmatprep.subr.bf16.mxu1 %v8540_v20  ;;  %v8588_v20 = vld [vmem:[#allocation19 + $0x558] ss:$28 sps:$4 sm:$0xff]  }
 0x69a   :  { %6676 = vmatpush2.bf16.msra.mxu0 %v8535_v24  ;;  %v8589_v24 = vld [vmem:[#allocation19 + $0x18] ss:$28 sps:$4 sm:$0xff]  }
 0x69b   :  { %6717 = vmatpush2.bf16.msra.mxu1 %v8538_v1  ;;  %6677 = vmatprep.subr.bf16.mxu0 %v8543_v43  ;;  %v8590_v1 = vld [vmem:[#allocation19 + $0x398] ss:$28 sps:$4 sm:$0xff]   ;;  %v8591_v43 = vld [vmem:[#allocation19 + $0xa60] ss:$28 sps:$4 sm:$0xff]  }
 0x69c   :  { %6718 = vmatprep.subr.bf16.mxu1 %v8546_v38  ;;  %v8592_v38 = vld [vmem:[#allocation19 + $0xde0] ss:$28 sps:$4 sm:$0xff]  }
 0x69e   :  { %6678 = vmatpush2.bf16.msra.mxu0 %v8541_v52  ;;  %v8593_v52 = vld [vmem:[#allocation19 + $0x8a0] ss:$28 sps:$4 sm:$0xff]  }
 0x69f   :  { %6719 = vmatpush2.bf16.msra.mxu1 %v8544_v39  ;;  %6679 = vmatprep.subr.bf16.mxu0 %v8549_v40  ;;  %v8594_v39 = vld [vmem:[#allocation19 + $0xc20] ss:$28 sps:$4 sm:$0xff]   ;;  %v8595_v40 = vld [vmem:[#allocation19 + $0xa28] ss:$28 sps:$4 sm:$0xff]  }
 0x6a0   :  { %6720 = vmatprep.subr.bf16.mxu1 %v8552_v44  ;;  %v8596_v44 = vld [vmem:[#allocation19 + $0xda8] ss:$28 sps:$4 sm:$0xff]  }
 0x6a2   :  { %6680 = vmatpush2.bf16.msra.mxu0 %v8547_v47  ;;  %v8597_v47 = vld [vmem:[#allocation19 + $0x868] ss:$28 sps:$4 sm:$0xff]  }
 0x6a3   :  { %6721 = vmatpush2.bf16.msra.mxu1 %v8550_v51  ;;  %6681 = vmatprep.subr.bf16.mxu0 %v8555_v55  ;;  %v8598_v51 = vld [vmem:[#allocation19 + $0xbe8] ss:$28 sps:$4 sm:$0xff]   ;;  %v8599_v55 = vld [vmem:[#allocation19 + $0x9f0] ss:$28 sps:$4 sm:$0xff]  }
 0x6a4   :  { %6722 = vmatprep.subr.bf16.mxu1 %v8558_v56  ;;  %v8600_v56 = vld [vmem:[#allocation19 + $0xd70] ss:$28 sps:$4 sm:$0xff]  }
 0x6a6   :  { %6682 = vmatpush2.bf16.msra.mxu0 %v8553_v60  ;;  %v8601_v60 = vld [vmem:[#allocation19 + $0x830] ss:$28 sps:$4 sm:$0xff]  }
 0x6a7   :  { %6723 = vmatpush2.bf16.msra.mxu1 %v8556_v62  ;;  %7720 = vmatprep.subr.bf16.mxu0 %v8559_v53  ;;  %v8603_v62 = vld [vmem:[#allocation19 + $0x9b8] ss:$28 sps:$4 sm:$0xff]  }
 0x6a8   :  { %7742 = vmatprep.subr.bf16.mxu1 %v8560_v16  ;;  %v8605_v53 = vld [vmem:[#allocation19 + $0x7f8] ss:$28 sps:$4 sm:$0xff]   ;;  %v8607_v16 = vld [vmem:[#allocation19 + $0x980] ss:$28 sps:$4 sm:$0xff]  }
 0x6a9   :  { %v9338_v4 = vpop.f32.mrf.mxu0  ;;  %6684 = vmatmul.mubr.bf16.vlgmr.msra.gmra.mxu0 %v9294_v11 }
 0x6aa   :  { %v9341_v9 = vpop.f32.mrf.mxu1  ;;  %6725 = vmatmul.mubr.bf16.vlgmr.msra.gmra.mxu1 %v9296_v12  ;;  %7721 = vmatpush3.bf16.msra.mxu0 %v8561_v26  ;;  %v8608_v26 = vld [vmem:[#allocation19 + $0xd00] ss:$28 sps:$4 sm:$0xff]  }
 0x6ab   :  { %6765 = vmatprep.mubr.bf16.mxu0 %v9270_v34  ;;  %7743 = vmatpush3.bf16.msra.mxu1 %v8562_v30  ;;  %v9345_v2 = vpop.f32.mrf.mxu0  ;;  %v8570_v34 = vld [vmem:[#allocation19 + $0x4b0] ss:$28 sps:$4 sm:$0xff]   ;;  %v8610_v30 = vld [vmem:[#allocation19 + $0xb40] ss:$28 sps:$4 sm:$0xff]  }
 0x6ac   :  { %6805 = vmatprep.mubr.bf16.mxu1 %v9272_v35  ;;  %v9348_v15 = vpop.f32.mrf.mxu1  ;;  %7722 = vmatprep.subr.bf16.mxu0 %v8563_v3  ;;  %v8574_v35 = vld [vmem:[#allocation19 + $0x478] ss:$28 sps:$4 sm:$0xff]   ;;  %v8611_v3 = vld [vmem:[#allocation19 + $0x948] ss:$28 sps:$4 sm:$0xff]  }
 0x6ad   :  { %v6443_v21 = vpop.f32.mrf.mxu0  ;;  %7744 = vmatprep.subr.bf16.mxu1 %v8564_v8  ;;  %v8612_v8 = vld [vmem:[#allocation19 + $0xcc8] ss:$28 sps:$4 sm:$0xff]  }
 0x6ae   :  { %v6484_v6 = vpop.f32.mrf.mxu1  ;;  %7723 = vmatpush3.bf16.msra.mxu0 %v8565_v14  ;;  %v8613_v14 = vld [vmem:[#allocation19 + $0x788] ss:$28 sps:$4 sm:$0xff]   ;;  %v8617_v21 = vld [vmem:[#allocation19 + $0x750] ss:$28 sps:$4 sm:$0xff]  }
 0x6af   :  { %7745 = vmatpush3.bf16.msra.mxu1 %v8566_v5  ;;  %v6444_v48 = vpop.f32.mrf.mxu0  ;;  %7724 = vmatprep.subr.bf16.mxu0 %v8567_v31  ;;  %v8614_v5 = vld [vmem:[#allocation19 + $0xb08] ss:$28 sps:$4 sm:$0xff]   ;;  %v8615_v31 = vld [vmem:[#allocation19 + $0x910] ss:$28 sps:$4 sm:$0xff]  }
 0x6b0   :  { %v6485_v50 = vpop.f32.mrf.mxu1  ;;  %7746 = vmatprep.subr.bf16.mxu1 %v8568_v42  ;;  %v8616_v42 = vld [vmem:[#allocation19 + $0xc90] ss:$28 sps:$4 sm:$0xff]   ;;  %v3913_v48 = vrot.slane %v9318_v10, %v9135_v33 }
 0x6b1   :  { %v8618_v6 = vld [vmem:[#allocation19 + $0xad0] ss:$28 sps:$4 sm:$0xff]   ;;  %v8621_v50 = vld [vmem:[#allocation19 + $0x718] ss:$28 sps:$4 sm:$0xff]  }
 0x6b2   :  { %7725 = vmatpush3.bf16.msra.mxu0 %v8569_v17  ;;  %v8619_v17 = vld [vmem:[#allocation19 + $0x8d8] ss:$28 sps:$4 sm:$0xff]  }
 0x6b3   :  { %7747 = vmatpush3.bf16.msra.mxu1 %v8570_v34  ;;  %7726 = vmatprep.subr.bf16.mxu0 %v8571_v49  ;;  %v8620_v34 = vld [vmem:[#allocation19 + $0xc58] ss:$28 sps:$4 sm:$0xff]   ;;  %v3917_v49 = vrot.slane %v9318_v10, %v9132_v32 }
 0x6b4   :  { %7748 = vmatprep.subr.bf16.mxu1 %v8572_v54  ;;  %v8622_v54 = vld [vmem:[#allocation19 + $0xa98] ss:$28 sps:$4 sm:$0xff]  }
 0x6b6   :  { %7727 = vmatpush3.bf16.msra.mxu0 %v8573_v25  ;;  %v6440_v25 = vadd.f32 %v9338_v4, %v3913_v48 }
 0x6b7   :  { %7749 = vmatpush3.bf16.msra.mxu1 %v8574_v35  ;;  %7728 = vmatprep.subr.bf16.mxu0 %v8575_v27  ;;  %v6442_v35 = vadd.f32 %v9345_v2, %v3917_v49 }
 0x6b8   :  { %7750 = vmatprep.subr.bf16.mxu1 %v8576_v22  ;;  %v6481_v27 = vadd.f32 %v9341_v9, %v6440_v25 }
 0x6b9   :  { %v6483_v22 = vadd.f32 %v9348_v15, %v6442_v35 }
 0x6ba   :  { %7729 = vmatpush3.bf16.msra.mxu0 %v8577_v28 }
 0x6bb   :  { %7751 = vmatpush3.bf16.msra.mxu1 %v8578_v23  ;;  %7730 = vmatprep.subr.bf16.mxu0 %v8579_v29 }
 0x6bc   :  { %7752 = vmatprep.subr.bf16.mxu1 %v8580_v41 }
 0x6be   :  { %7731 = vmatpush3.bf16.msra.mxu0 %v8581_v7 }
 0x6bf   :  { %7753 = vmatpush3.bf16.msra.mxu1 %v8582_v58  ;;  %7732 = vmatprep.subr.bf16.mxu0 %v8583_v18 }
 0x6c0   :  { %7754 = vmatprep.subr.bf16.mxu1 %v8584_v36 }
 0x6c2   :  { %7733 = vmatpush3.bf16.msra.mxu0 %v8585_v13 }
 0x6c3   :  { %7755 = vmatpush3.bf16.msra.mxu1 %v8586_v19  ;;  %7734 = vmatprep.subr.bf16.mxu0 %v8587_v59 }
 0x6c4   :  { %7756 = vmatprep.subr.bf16.mxu1 %v8588_v20 }
 0x6c6   :  { %7735 = vmatpush3.bf16.msra.mxu0 %v8589_v24 }
 0x6c7   :  { %7757 = vmatpush3.bf16.msra.mxu1 %v8590_v1  ;;  %7764 = vmatprep.subr.bf16.mxu0 %v8591_v43  ;;  %v3921_v43 = vrot.slane %v9318_v10, %v9239_v37 }
 0x6c8   :  { %7786 = vmatprep.subr.bf16.mxu1 %v8592_v38  ;;  %v3925_v38 = vrot.slane %v9318_v10, %v9236_v63 }
 0x6c9   :  { %6766 = vmatmul.mubr.bf16.vlgmr.msra.gmra.mxu0 %v9274_v45  ;;  %v8602_v45 = vld [vmem:[#allocation19 + $0xbb0] ss:$28 sps:$4 sm:$0xff]  }
 0x6ca   :  { %6806 = vmatmul.mubr.bf16.vlgmr.msra.gmra.mxu1 %v9276_v46  ;;  %7765 = vmatpush3.bf16.msra.mxu0 %v8593_v52  ;;  %v8604_v46 = vld [vmem:[#allocation19 + $0xd38] ss:$28 sps:$4 sm:$0xff]  }
 0x6cb   :  { %6845 = vmatprep.mubr.bf16.mxu0 %v9282_v57  ;;  %7787 = vmatpush3.bf16.msra.mxu1 %v8594_v39  ;;  %v8606_v57 = vld [vmem:[#allocation19 + $0xb78] ss:$28 sps:$4 sm:$0xff]  }
 0x6cc   :  { %6885 = vmatprep.mubr.bf16.mxu1 %v9285_v61  ;;  %7766 = vmatprep.subr.bf16.mxu0 %v8595_v40  ;;  %v8609_v61 = vld [vmem:[#allocation19 + $0x7c0] ss:$28 sps:$4 sm:$0xff]  }
 0x6cd   :  { %7788 = vmatprep.subr.bf16.mxu1 %v8596_v44 }
 0x6ce   :  { %7767 = vmatpush3.bf16.msra.mxu0 %v8597_v47 }
 0x6cf   :  { %7789 = vmatpush3.bf16.msra.mxu1 %v8598_v51  ;;  %7768 = vmatprep.subr.bf16.mxu0 %v8599_v55 }
 0x6d0   :  { %7790 = vmatprep.subr.bf16.mxu1 %v8600_v56 }
 0x6d2   :  { %7769 = vmatpush3.bf16.msra.mxu0 %v8601_v60 }
 0x6d3   :  { %7791 = vmatpush3.bf16.msra.mxu1 %v8602_v45  ;;  %7770 = vmatprep.subr.bf16.mxu0 %v8603_v62 }
 0x6d4   :  { %7792 = vmatprep.subr.bf16.mxu1 %v8604_v46 }
 0x6d6   :  { %7771 = vmatpush3.bf16.msra.mxu0 %v8605_v53 }
 0x6d7   :  { %7793 = vmatpush3.bf16.msra.mxu1 %v8606_v57  ;;  %7772 = vmatprep.subr.bf16.mxu0 %v8607_v16 }
 0x6d8   :  { %7794 = vmatprep.subr.bf16.mxu1 %v8608_v26 }
 0x6da   :  { %7773 = vmatpush3.bf16.msra.mxu0 %v8609_v61 }
 0x6db   :  { %7795 = vmatpush3.bf16.msra.mxu1 %v8610_v30  ;;  %7774 = vmatprep.subr.bf16.mxu0 %v8611_v3 }
 0x6dc   :  { %7796 = vmatprep.subr.bf16.mxu1 %v8612_v8 }
 0x6de   :  { %7775 = vmatpush3.bf16.msra.mxu0 %v8613_v14 }
 0x6df   :  { %7797 = vmatpush3.bf16.msra.mxu1 %v8614_v5  ;;  %7776 = vmatprep.subr.bf16.mxu0 %v8615_v31 }
 0x6e0   :  { %7798 = vmatprep.subr.bf16.mxu1 %v8616_v42 }
 0x6e2   :  { %7777 = vmatpush3.bf16.msra.mxu0 %v8617_v21  ;;  %v3929_v21 = vrot.slane %v9318_v10, %v9242_v0 }
 0x6e3   :  { %7799 = vmatpush3.bf16.msra.mxu1 %v8618_v6  ;;  %7778 = vmatprep.subr.bf16.mxu0 %v8619_v17 }
 0x6e4   :  { %7800 = vmatprep.subr.bf16.mxu1 %v8620_v34 }
 0x6e6   :  { %7779 = vmatpush3.bf16.msra.mxu0 %v8621_v50 }
 0x6e7   :  { %7801 = vmatpush3.bf16.msra.mxu1 %v8622_v54 }
 0x6e9   :  { %v6521_v33 = vpop.f32.mrf.mxu0  ;;  %6846 = vmatmul.mubr.bf16.vlgmr.msra.gmra.mxu0 %v9294_v11 }
 0x6ea   :  { %v6522_v32 = vadd.f32 %v6521_v33, %v6481_v27  ;;  %v6562_v28 = vpop.f32.mrf.mxu1  ;;  %6886 = vmatmul.mubr.bf16.vlgmr.msra.gmra.mxu1 %v9296_v12 }
 0x6eb   :  { %v6523_v23 = vpop.f32.mrf.mxu0 }
 0x6ec   :  { %v6563_v29 = vadd.f32 %v6562_v28, %v6522_v32  ;;  %v6524_v41 = vadd.f32 %v6523_v23, %v6483_v22  ;;  %v6564_v4 = vpop.f32.mrf.mxu1 }
 0x6ed   :  { %v6525_v7 = vpop.f32.mrf.mxu0 }
 0x6ee   :  { %8655 = vtanh.f32 %v6563_v29  ;;  %v6565_v2 = vadd.f32 %v6564_v4, %v6524_v41  ;;  %v6566_v58 = vpop.f32.mrf.mxu1 }
 0x6ef   :  { %v6526_v18 = vpop.f32.mrf.mxu0 }
 0x6f0   :  { %8657 = vtanh.f32 %v6565_v2  ;;  %v6567_v9 = vpop.f32.mrf.mxu1 }
 0x6fb   :  { %v8656_v36 = vpop.eup %8655 }
 0x6fc   :  { %6902 = vst [vmem:[%s9399_s14 + $0x10] sm:$0xff] %v8656_v36 }
 0x6fd   :  { %v8658_v11 = vpop.eup %8657 }
 0x6fe   :  { %6903 = vst [vmem:[%s9399_s14 + $0x18] sm:$0xff] %v8658_v11 }
 0x729   :  { %v6603_v12 = vpop.f32.mrf.mxu0 }
 0x72a   :  { %v6644_v15 = vpop.f32.mrf.mxu1  ;;  %v6604_v52 = vadd.f32 %v6603_v12, %v3921_v43 }
 0x72b   :  { %v6605_v13 = vpop.f32.mrf.mxu0 }
 0x72c   :  { %v6646_v19 = vpop.f32.mrf.mxu1  ;;  %v6606_v39 = vadd.f32 %v6605_v13, %v3925_v38  ;;  %v6645_v40 = vadd.f32 %v6644_v15, %v6604_v52 }
 0x72d   :  { %v6607_v59 = vpop.f32.mrf.mxu0 }
 0x72e   :  { %v6648_v20 = vpop.f32.mrf.mxu1  ;;  %v6647_v47 = vadd.f32 %v6646_v19, %v6606_v39 }
 0x72f   :  { %v6608_v24 = vpop.f32.mrf.mxu0 }
 0x730   :  { %v6649_v1 = vpop.f32.mrf.mxu1 }
 0x769   :  { %v6685_v44 = vpop.f32.mrf.mxu0 }
 0x76a   :  { %v6686_v51 = vadd.f32 %v6685_v44, %v6645_v40  ;;  %v6726_v55 = vpop.f32.mrf.mxu1 }
 0x76b   :  { %v6687_v56 = vpop.f32.mrf.mxu0 }
 0x76c   :  { %v6727_v60 = vadd.f32 %v6726_v55, %v6686_v51  ;;  %v6688_v45 = vadd.f32 %v6687_v56, %v6647_v47  ;;  %v6728_v62 = vpop.f32.mrf.mxu1 }
 0x76d   :  { %v6689_v46 = vpop.f32.mrf.mxu0 }
 0x76e   :  { %8659 = vtanh.f32 %v6727_v60  ;;  %v6729_v53 = vadd.f32 %v6728_v62, %v6688_v45  ;;  %v6730_v57 = vpop.f32.mrf.mxu1 }
 0x76f   :  { %v6690_v16 = vpop.f32.mrf.mxu0 }
 0x770   :  { %8661 = vtanh.f32 %v6729_v53  ;;  %v6731_v37 = vpop.f32.mrf.mxu1 }
 0x77b   :  { %v8660_v26 = vpop.eup %8659 }
 0x77c   :  { %6904 = vst [vmem:[%s9399_s14 + $0x20] sm:$0xff] %v8660_v26 }
 0x77d   :  { %v8662_v63 = vpop.eup %8661 }
 0x77e   :  { %6905 = vst [vmem:[%s9399_s14 + $0x28] sm:$0xff] %v8662_v63 }
 0x789   :  { %v7736_v61 = vpop.f32.mrf.mxu0 }
 0x78a   :  { %v7758_v30 = vpop.f32.mrf.mxu1 }
 0x78b   :  { %v7737_v3 = vpop.f32.mrf.mxu0 }
 0x78c   :  { %v7759_v8 = vpop.f32.mrf.mxu1  ;;  %v7738_v6 = vadd.f32 %v7737_v3, %v7736_v61 }
 0x78d   :  { %v7739_v14 = vpop.f32.mrf.mxu0  ;;  %v7760_v34 = vadd.f32 %v7759_v8, %v7758_v30 }
 0x78e   :  { %v7761_v5 = vpop.f32.mrf.mxu1  ;;  %v6768_v17 = vadd.f32 %v7738_v6, %v3929_v21 }
 0x78f   :  { %v7740_v31 = vpop.f32.mrf.mxu0 }
 0x790   :  { %v7762_v42 = vpop.f32.mrf.mxu1  ;;  %v6808_v54 = vadd.f32 %v7760_v34, %v6768_v17 }
 0x7a9   :  { %v7780_v48 = vpop.f32.mrf.mxu0 }
 0x7aa   :  { %v7802_v49 = vpop.f32.mrf.mxu1 }
 0x7ab   :  { %v7781_v50 = vpop.f32.mrf.mxu0 }
 0x7ac   :  { %v7782_v25 = vadd.f32 %v7781_v50, %v7780_v48  ;;  %v7803_v35 = vpop.f32.mrf.mxu1 }
 0x7ad   :  { %v7783_v27 = vpop.f32.mrf.mxu0  ;;  %v7804_v22 = vadd.f32 %v7803_v35, %v7802_v49 }
 0x7ae   :  { %v6848_v33 = vadd.f32 %v7782_v25, %v6808_v54  ;;  %v7805_v32 = vpop.f32.mrf.mxu1 }
 0x7af   :  { %v7784_v28 = vpop.f32.mrf.mxu0 }
 0x7b0   :  { %v6888_v23 = vadd.f32 %v7804_v22, %v6848_v33  ;;  %v7806_v29 = vpop.f32.mrf.mxu1 }
 0x7b2   :  { %8663 = vtanh.f32 %v6888_v23 }
 0x7bf   :  { %v8664_v41 = vpop.eup %8663 }
 0x7c0   :  { %6906 = vst [vmem:[%s9399_s14 + $0x30] sm:$0xff] %v8664_v41 }
 0x7c1   :  { %6911 = vsyncpa [#allocation3], 1 }
 0x7c2   :  { %6912 = vsyncpa [#allocation5], 1 }
 0x7c3   :  { %6913 = vsyncpa [#allocation8], 1 }
 0x7c4   :  { %6914 = vsyncpa [#allocation11], 1 }
 0x7c5   :  { %6915 = vsyncpa [#allocation14], 1 }
 0x7c6   :  { %6916 = vsyncpa [#allocation17], 1 }
 0x7c7   :  { %6917 = vsyncpa [#allocation20], 1 }

</bundles_post_ra>
